<compile_context>
chip_gen: v7x
topology: tpu7x:2x2x1
jax: 0.10.0
libtpu: 0.0.40
codegen_flags: <defaults>
</compile_context>

<pallas_src>
import math
from functools import partial

import numpy as np
import jax
import jax.numpy as jnp
from jax import lax
from jax.experimental import pallas as pl
from jax.experimental.pallas import tpu as pltpu

_VMEM = pl.BlockSpec(memory_space=pltpu.MemorySpace.VMEM)
_FF_PAD = 128   # lane-dense padding of dim_feedforward=5
_K = 3          # Conv1d kernel size


# --------------------------- packing helper (host) --------------------------
def _pack(entries, width=None):
    """Stack 2-D arrays into one (rows, width) f32 array.

    Each entry is zero-padded to `width` lanes and its row count padded to a
    multiple of 8 so every entry starts on a sublane-aligned offset (cheap,
    unshifted VMEM loads in-kernel).  Returns (packed, {name: (off, rows, cols)}).
    """
    if width is None:
        width = max(int(a.shape[1]) for _, a in entries)
    blocks, layout, off = [], {}, 0
    for name, a in entries:
        a = np.asarray(a, np.float32)
        r, c = a.shape
        rp = r + (-r % 8)
        blk = np.zeros((rp, width), np.float32)
        blk[:r, :c] = a
        blocks.append(blk)
        layout[name] = (off, r, c)
        off += rp
    return np.concatenate(blocks, axis=0), layout


# -------------------- shape-dependent selector constants --------------------
def _build_sel_pack(*, B, L, H, num_heads):
    K = _K
    E = 2 * H
    Lo1 = L - K + 1
    Lp1 = Lo1 // 2
    Lo2 = Lp1 - K + 1
    T = Lo2 // 2
    N = B * T
    hd = E // num_heads

    # MaxPool1d(2) as two row-selection matmuls (batch-major rows).
    p1e = np.zeros((B * Lp1, B * Lo1), np.float32)
    p1o = np.zeros_like(p1e)
    for b in range(B):
        for p in range(Lp1):
            p1e[b * Lp1 + p, b * Lo1 + 2 * p] = 1.0
            p1o[b * Lp1 + p, b * Lo1 + 2 * p + 1] = 1.0

    # Second pool also reorders output rows to time-major (row = t*B + b).
    p2e = np.zeros((N, B * Lo2), np.float32)
    p2o = np.zeros_like(p2e)
    for b in range(B):
        for t in range(T):
            p2e[t * B + b, b * Lo2 + 2 * t] = 1.0
            p2o[t * B + b, b * Lo2 + 2 * t + 1] = 1.0

    entries = [("pool1_even", p1e), ("pool1_odd", p1o),
               ("pool2_even", p2e), ("pool2_odd", p2o)]

    # Attention key/value group-broadcast: row r -> row (r//B)*B + bp.
    for bp in range(B):
        ks = np.zeros((N, N), np.float32)
        for r in range(N):
            ks[r, (r // B) * B + bp] = 1.0
        entries.append((f"ksel{bp}", ks))

    # Per-head score reduction selector (E, num_heads).
    hs = np.zeros((E, num_heads), np.float32)
    for d in range(E):
        hs[d, d // hd] = 1.0
    entries.append(("head_sel", hs))

    # Per-batch sum-over-time selector (B, N).
    sp = np.zeros((B, N), np.float32)
    for b in range(B):
        for t in range(T):
            sp[b, t * B + b] = 1.0
    entries.append(("statP", sp))

    return _pack(entries)


# --------------------------- parameter construction -------------------------
def init_params(key, *, input_spec_size, cnn_filter_size, num_layers_lstm,
                num_heads, hidden_size_lstm, num_emo_classes, n_mels):
    del n_mels, num_heads  # self.out = Linear(n_mels, 1) is unused in forward()
    K = _K
    Cin, C, H = input_spec_size, cnn_filter_size, hidden_size_lstm
    E = 2 * H
    keys = iter(jax.random.split(key, 256))

    def u(shape, fan_in):
        s = 1.0 / math.sqrt(fan_in)
        return np.asarray(jax.random.uniform(next(keys), shape, jnp.float32, -s, s))

    entries = []

    # CNN: PyTorch (Cout, Cin, K) folded once into im2col layout (K*Cin, Cout).
    w1 = u((C, Cin, K), Cin * K)
    entries.append(("conv1_w", np.transpose(w1, (2, 1, 0)).reshape(K * Cin, C)))
    entries.append(("conv1_b", u((1, C), Cin * K)))
    w2 = u((C, C, K), C * K)
    entries.append(("conv2_w", np.transpose(w2, (2, 1, 0)).reshape(K * C, C)))
    entries.append(("conv2_b", u((1, C), C * K)))

    # Bidirectional LSTM: per layer both directions are merged into ONE
    # (in, 8H) input projection, one block-diagonal (2H, 8H) recurrence matrix
    # and one folded bias (b_ih + b_hh), with gate-major interleaved columns
    # [i_f,i_b | f_f,f_b | g_f,g_b | o_f,o_b] (PyTorch gate order i,f,g,o).
    for l in range(num_layers_lstm):
        insz = C if l == 0 else 2 * H
        wih = np.zeros((insz, 8 * H), np.float32)
        whh = np.zeros((2 * H, 8 * H), np.float32)
        bias = np.zeros((1, 8 * H), np.float32)
        for d in range(2):  # 0 = forward, 1 = backward
            w_ih = u((4 * H, insz), H)
            w_hh = u((4 * H, H), H)
            b = u((1, 4 * H), H) + u((1, 4 * H), H)
            for j in range(4):
                dst = (2 * j + d) * H
                wih[:, dst:dst + H] = w_ih[j * H:(j + 1) * H, :].T
                whh[d * H:(d + 1) * H, dst:dst + H] = w_hh[j * H:(j + 1) * H, :].T
                bias[0, dst:dst + H] = b[0, j * H:(j + 1) * H]
        entries += [(f"lstm_wih{l}", wih), (f"lstm_whh{l}", whh),
                    (f"lstm_b{l}", bias)]
    mask_f = np.zeros((1, 8 * H), np.float32)
    for j in range(4):
        mask_f[0, 2 * j * H:(2 * j + 1) * H] = 1.0
    entries.append(("lstm_mask_f", mask_f))

    # TransformerEncoderLayer (d_model=E, dim_feedforward=5, post-norm, relu);
    # attention in/out projection biases init to zero like PyTorch.
    entries.append(("attn_in_wT", u((3 * E, E), E).T))
    entries.append(("attn_in_b", np.zeros((1, 3 * E), np.float32)))
    entries.append(("attn_out_wT", u((E, E), E).T))
    entries.append(("attn_out_b", np.zeros((1, E), np.float32)))
    entries.append(("ln1_g", np.ones((1, E), np.float32)))
    entries.append(("ln1_b", np.zeros((1, E), np.float32)))
    ffdim = 5
    ff1 = np.zeros((E, _FF_PAD), np.float32)
    ff1[:, :ffdim] = u((ffdim, E), E).T
    ff1b = np.zeros((1, _FF_PAD), np.float32)
    ff1b[0, :ffdim] = u((1, ffdim), E)
    ff2 = np.zeros((_FF_PAD, E), np.float32)
    ff2[:ffdim, :] = u((E, ffdim), ffdim).T
    entries += [("ff1_wT", ff1), ("ff1_b", ff1b),
                ("ff2_wT", ff2), ("ff2_b", u((1, E), ffdim)),
                ("ln2_g", np.ones((1, E), np.float32)),
                ("ln2_b", np.zeros((1, E), np.float32))]

    # Emotion head: Linear(4H, ncls) stored transposed (2E, ncls).
    entries.append(("emo_wT", u((num_emo_classes, 4 * H), 4 * H).T))
    entries.append(("emo_b", u((1, num_emo_classes), 4 * H)))

    packed, layout = _pack(entries, width=max(128, 8 * H))
    return {"w": jnp.asarray(packed)}, layout


# ------------------------------ fused kernel --------------------------------
def _build_fused_kernel(*, layout, sel_layout, num_layers, num_heads,
                        B, H, T, Lo1, Lp1, Lo2):
    K = _K
    E = 2 * H
    N = B * T
    hd = E // num_heads
    scale = 1.0 / math.sqrt(hd)

    def kernel(x_ref, w_ref, sel_ref, o_ref):
        def W(name):
            o, r, c = layout[name]
            return w_ref[o:o + r, :c]

        def S(name):
            o, r, c = sel_layout[name]
            return sel_ref[o:o + r, :c]

        # ---- CNN stack: im2col conv -> maxpool(2)+relu (batch on sublanes) --
        x = x_ref[...]                                        # (B, L, Cin)
        im1 = jnp.concatenate(
            [jnp.concatenate([x[b, k:k + Lo1, :] for k in range(K)], axis=1)
             for b in range(B)], axis=0)                      # (B*Lo1, K*Cin)
        y1 = jnp.dot(im1, W("conv1_w"),
                     preferred_element_type=jnp.float32) + W("conv1_b")
        p1 = jnp.maximum(
            jnp.maximum(
                jnp.dot(S("pool1_even"), y1, preferred_element_type=jnp.float32),
                jnp.dot(S("pool1_odd"), y1, preferred_element_type=jnp.float32)),
            0.0)                                              # (B*Lp1, C)

        im2 = jnp.concatenate(
            [jnp.concatenate([p1[b * Lp1 + k:b * Lp1 + k + Lo2, :]
                              for k in range(K)], axis=1)
             for b in range(B)], axis=0)                      # (B*Lo2, K*C)
        y2 = jnp.dot(im2, W("conv2_w"),
                     preferred_element_type=jnp.float32) + W("conv2_b")
        # pool2 selectors also reorder rows to time-major (row = t*B + b).
        h0 = jnp.maximum(
            jnp.maximum(
                jnp.dot(S("pool2_even"), y2, preferred_element_type=jnp.float32),
                jnp.dot(S("pool2_odd"), y2, preferred_element_type=jnp.float32)),
            0.0)                                              # (N, C)

        # ---- bidirectional LSTM stack, fwd/bwd interleaved per step --------
        # TODO(synk): inter-layer LSTM dropout (p=0.5) is train-only; omitted.
        mask_f = W("lstm_mask_f")                             # (1, 8H)
        layer_in = h0
        for l in range(num_layers):
            gx = jnp.dot(layer_in, W(f"lstm_wih{l}"),
                         preferred_element_type=jnp.float32) + W(f"lstm_b{l}")
            gxf = gx * mask_f                                 # forward-gate cols
            gxb = gx - gxf                                    # backward-gate cols
            whh = W(f"lstm_whh{l}")                           # (2H, 8H) block-diag
            hcur = jnp.zeros((B, 2 * H), jnp.float32)         # [h_f | h_b]
            ccur = jnp.zeros((B, 2 * H), jnp.float32)
            fwd_rows = [None] * T
            bwd_rows = [None] * T
            for s in range(T):                                # fully unrolled
                rt = T - 1 - s
                g = (gxf[s * B:(s + 1) * B, :]
                     + gxb[rt * B:(rt + 1) * B, :]
                     + jnp.dot(hcur, whh, preferred_element_type=jnp.float32))
                i = jax.nn.sigmoid(g[:, 0:2 * H])
                f = jax.nn.sigmoid(g[:, 2 * H:4 * H])
                gg = jnp.tanh(g[:, 4 * H:6 * H])
                o = jax.nn.sigmoid(g[:, 6 * H:8 * H])
                ccur = f * ccur + i * gg
                hcur = o * jnp.tanh(ccur)
                fwd_rows[s] = hcur[:, 0:H]                    # fwd output @ t=s
                bwd_rows[rt] = hcur[:, H:2 * H]               # bwd output @ t=rt
            layer_in = jnp.concatenate(
                [jnp.concatenate(fwd_rows, axis=0),
                 jnp.concatenate(bwd_rows, axis=0)], axis=1)  # (N, 2H)

        X = layer_in                                          # (N, E), time-major

        # ---- TransformerEncoderLayer -----------------------------------------
        # The reference feeds a (B, T, E) tensor into a batch_first=False layer,
        # so self-attention runs over the *batch* axis (sequence length == B);
        # with time-major rows the attention groups are consecutive row pairs.
        # TODO(synk): attention/FFN dropouts (p=0.1) are train-only; omitted.
        qkv = jnp.dot(X, W("attn_in_wT"),
                      preferred_element_type=jnp.float32) + W("attn_in_b")
        q = qkv[:, 0:E]
        kv = qkv[:, E:3 * E]                                  # [K | V]
        head_sel = S("head_sel")                              # (E, nheads)

        kv_p = [jnp.dot(S(f"ksel{bp}"), kv, preferred_element_type=jnp.float32)
                for bp in range(B)]                           # B x (N, 2E)
        sc = [jnp.dot(q * kvb[:, 0:E], head_sel,
                      preferred_element_type=jnp.float32) * scale
              for kvb in kv_p]                                # B x (N, nheads)
        m = sc[0]
        for bp in range(1, B):
            m = jnp.maximum(m, sc[bp])
        ex = [jnp.exp(s_ - m) for s_ in sc]
        den = ex[0]
        for bp in range(1, B):
            den = den + ex[bp]
        inv = 1.0 / den                                       # exact divide (parity)

        ctx = None
        for bp in range(B):
            wgt = ex[bp] * inv                                # (N, nheads)
            wexp = jnp.concatenate(
                [jnp.broadcast_to(wgt[:, hh:hh + 1], (N, hd))
                 for hh in range(num_heads)], axis=1)         # (N, E)
            contrib = wexp * kv_p[bp][:, E:2 * E]
            ctx = contrib if ctx is None else ctx + contrib
        attn = jnp.dot(ctx, W("attn_out_wT"),
                       preferred_element_type=jnp.float32) + W("attn_out_b")

        def layernorm(v, g_, b_):
            mu = jnp.mean(v, axis=-1, keepdims=True)
            var = jnp.mean((v - mu) ** 2, axis=-1, keepdims=True)
            return (v - mu) * lax.rsqrt(var + 1e-5) * g_ + b_

        x1 = layernorm(X + attn, W("ln1_g"), W("ln1_b"))
        ff = jnp.maximum(
            jnp.dot(x1, W("ff1_wT"), preferred_element_type=jnp.float32)
            + W("ff1_b"), 0.0)                                # (N, 128) padded
        x2 = layernorm(
            x1 + jnp.dot(ff, W("ff2_wT"), preferred_element_type=jnp.float32)
            + W("ff2_b"), W("ln2_g"), W("ln2_b"))             # (N, E)

        # ---- per-batch mean / unbiased std over time + emotion head --------
        sums = jnp.dot(S("statP"), x2, preferred_element_type=jnp.float32)
        mean = sums * (1.0 / T)                               # (B, E)
        mean_rows = jnp.concatenate([mean] * T, axis=0)       # row r -> batch r % B
        xc = x2 - mean_rows
        ssq = jnp.dot(S("statP"), xc * xc, preferred_element_type=jnp.float32)
        std = jnp.sqrt(ssq * (1.0 / (T - 1)))                 # (B, E)
        emo_w = W("emo_wT")                                   # (2E, ncls)
        o_ref[...] = (
            jnp.dot(mean, emo_w[0:E, :], preferred_element_type=jnp.float32)
            + jnp.dot(std, emo_w[E:2 * E, :], preferred_element_type=jnp.float32)
            + W("emo_b"))

    return kernel


# ------------------------------- forward pass --------------------------------
def forward(params, x, *, layout, num_layers_lstm, num_heads, hidden_size_lstm):
    B, Cin, L = x.shape
    del Cin
    K = _K
    H = hidden_size_lstm
    ncls = layout["emo_b"][2]
    Lo1 = L - K + 1
    Lp1 = Lo1 // 2
    Lo2 = Lp1 - K + 1
    T = Lo2 // 2

    # Channels-last once (the module's own permute(0, 2, 1) moved in front of
    # the CNN so every in-kernel matmul is standard / untransposed).
    xt = jnp.transpose(x, (0, 2, 1))                          # (B, L, Cin)

    # Shape-dependent 0/1 selector matrices, built with numpy -> baked constant.
    sel_np, sel_layout = _build_sel_pack(B=B, L=L, H=H, num_heads=num_heads)
    sel = jnp.asarray(sel_np)

    kernel = _build_fused_kernel(
        layout=layout, sel_layout=sel_layout, num_layers=num_layers_lstm,
        num_heads=num_heads, B=B, H=H, T=T, Lo1=Lo1, Lp1=Lp1, Lo2=Lo2)

    return pl.pallas_call(
        kernel,
        out_shape=jax.ShapeDtypeStruct((B, ncls), jnp.float32),
        in_specs=[_VMEM, _VMEM, _VMEM],
        out_specs=_VMEM,
    )(xt, params["w"], sel)


# -----------------------------------------------------------------------------
if __name__ == "__main__":
    input_spec_size = 8
    cnn_filter_size = 16
    num_layers_lstm = 2
    num_heads_self_attn = 2
    hidden_size_lstm = 16
    num_emo_classes = 4
    n_mels = 8

    B, L = 2, 32  # batch, input sequence length

    key = jax.random.PRNGKey(0)
    kx, kp = jax.random.split(key)
    x = jax.random.normal(kx, (B, input_spec_size, L), jnp.float32)

    params, layout = init_params(
        kp,
        input_spec_size=input_spec_size,
        cnn_filter_size=cnn_filter_size,
        num_layers_lstm=num_layers_lstm,
        num_heads=num_heads_self_attn,
        hidden_size_lstm=hidden_size_lstm,
        num_emo_classes=num_emo_classes,
        n_mels=n_mels,
    )

    fwd = jax.jit(partial(
        forward,
        layout=layout,
        num_layers_lstm=num_layers_lstm,
        num_heads=num_heads_self_attn,
        hidden_size_lstm=hidden_size_lstm,
    ))
    logits = jax.block_until_ready(fwd(params, x))
    assert logits.shape == (B, num_emo_classes)
    assert bool(jnp.all(jnp.isfinite(logits)))
    print("KERNEL_OK")
</pallas_src>

<mosaic_0001>
module attributes {stable_mosaic.version = 11 : i64} {
  func.func @kernel(%arg0: memref<2x32x8xf32, #tpu.memory_space<vmem>>, %arg1: memref<584x128xf32, #tpu.memory_space<vmem>>, %arg2: memref<168x60xf32, #tpu.memory_space<vmem>>, %arg3: memref<2x4xf32, #tpu.memory_space<vmem>>) attributes {dimension_semantics = [], scalar_prefetch = 0 : i64, scratch_operands = 0 : i64, tpu.core_type = #tpu.core_type<tc>} {
    %c0 = arith.constant 0 : index
    %c0_0 = arith.constant 0 : index
    %c0_1 = arith.constant 0 : index
    %0 = vector.load %arg0[%c0, %c0_0, %c0_1] : memref<2x32x8xf32, #tpu.memory_space<vmem>>, vector<2x32x8xf32>
    %1 = vector.extract_strided_slice %0 {offsets = [0, 0, 0], sizes = [1, 30, 8], strides = [1, 1, 1]} : vector<2x32x8xf32> to vector<1x30x8xf32>
    %2 = vector.shape_cast %1 : vector<1x30x8xf32> to vector<30x8xf32>
    %3 = vector.extract_strided_slice %0 {offsets = [0, 1, 0], sizes = [1, 30, 8], strides = [1, 1, 1]} : vector<2x32x8xf32> to vector<1x30x8xf32>
    %4 = vector.shape_cast %3 : vector<1x30x8xf32> to vector<30x8xf32>
    %5 = vector.extract_strided_slice %0 {offsets = [0, 2, 0], sizes = [1, 30, 8], strides = [1, 1, 1]} : vector<2x32x8xf32> to vector<1x30x8xf32>
    %6 = vector.shape_cast %5 : vector<1x30x8xf32> to vector<30x8xf32>
    %7 = tpu.concatenate %2, %4, %6 in 1 : vector<30x8xf32>, vector<30x8xf32>, vector<30x8xf32> -> vector<30x24xf32>
    %8 = vector.extract_strided_slice %0 {offsets = [1, 0, 0], sizes = [1, 30, 8], strides = [1, 1, 1]} : vector<2x32x8xf32> to vector<1x30x8xf32>
    %9 = vector.shape_cast %8 : vector<1x30x8xf32> to vector<30x8xf32>
    %10 = vector.extract_strided_slice %0 {offsets = [1, 1, 0], sizes = [1, 30, 8], strides = [1, 1, 1]} : vector<2x32x8xf32> to vector<1x30x8xf32>
    %11 = vector.shape_cast %10 : vector<1x30x8xf32> to vector<30x8xf32>
    %12 = vector.extract_strided_slice %0 {offsets = [1, 2, 0], sizes = [1, 30, 8], strides = [1, 1, 1]} : vector<2x32x8xf32> to vector<1x30x8xf32>
    %13 = vector.shape_cast %12 : vector<1x30x8xf32> to vector<30x8xf32>
    %14 = tpu.concatenate %9, %11, %13 in 1 : vector<30x8xf32>, vector<30x8xf32>, vector<30x8xf32> -> vector<30x24xf32>
    %15 = tpu.concatenate %7, %14 in 0 : vector<30x24xf32>, vector<30x24xf32> -> vector<60x24xf32>
    %c0_2 = arith.constant 0 : index
    %c0_3 = arith.constant 0 : index
    %16 = vector.load %arg1[%c0_2, %c0_3] : memref<584x128xf32, #tpu.memory_space<vmem>>, vector<24x16xf32>
    %cst = arith.constant dense<0.000000e+00> : vector<60x16xf32>
    %17 = tpu.matmul %15, %16, %cst {dimension_numbers = #tpu.dot_dimension_numbers<[1], [0], [0], [1], [0, 0, 1, 1], [], []>} : vector<60x24xf32>, vector<24x16xf32>, vector<60x16xf32> -> vector<60x16xf32>
    %c24 = arith.constant 24 : index
    %c0_4 = arith.constant 0 : index
    %18 = vector.load %arg1[%c24, %c0_4] : memref<584x128xf32, #tpu.memory_space<vmem>>, vector<1x16xf32>
    %19 = vector.broadcast %18 : vector<1x16xf32> to vector<60x16xf32>
    %20 = arith.addf %17, %19 : vector<60x16xf32>
    %c0_5 = arith.constant 0 : index
    %c0_6 = arith.constant 0 : index
    %21 = vector.load %arg2[%c0_5, %c0_6] : memref<168x60xf32, #tpu.memory_space<vmem>>, vector<30x60xf32>
    %cst_7 = arith.constant dense<0.000000e+00> : vector<30x16xf32>
    %22 = tpu.matmul %21, %20, %cst_7 {dimension_numbers = #tpu.dot_dimension_numbers<[1], [0], [0], [1], [0, 0, 1, 1], [], []>} : vector<30x60xf32>, vector<60x16xf32>, vector<30x16xf32> -> vector<30x16xf32>
    %c32 = arith.constant 32 : index
    %c0_8 = arith.constant 0 : index
    %23 = vector.load %arg2[%c32, %c0_8] : memref<168x60xf32, #tpu.memory_space<vmem>>, vector<30x60xf32>
    %cst_9 = arith.constant dense<0.000000e+00> : vector<30x16xf32>
    %24 = tpu.matmul %23, %20, %cst_9 {dimension_numbers = #tpu.dot_dimension_numbers<[1], [0], [0], [1], [0, 0, 1, 1], [], []>} : vector<30x60xf32>, vector<60x16xf32>, vector<30x16xf32> -> vector<30x16xf32>
    %25 = arith.maximumf %22, %24 : vector<30x16xf32>
    %cst_10 = arith.constant 0.000000e+00 : f32
    %26 = vector.broadcast %cst_10 : f32 to vector<30x16xf32>
    %27 = arith.maximumf %25, %26 : vector<30x16xf32>
    %28 = vector.extract_strided_slice %27 {offsets = [0, 0], sizes = [13, 16], strides = [1, 1]} : vector<30x16xf32> to vector<13x16xf32>
    %29 = vector.extract_strided_slice %27 {offsets = [1, 0], sizes = [13, 16], strides = [1, 1]} : vector<30x16xf32> to vector<13x16xf32>
    %30 = vector.extract_strided_slice %27 {offsets = [2, 0], sizes = [13, 16], strides = [1, 1]} : vector<30x16xf32> to vector<13x16xf32>
    %31 = tpu.concatenate %28, %29, %30 in 1 : vector<13x16xf32>, vector<13x16xf32>, vector<13x16xf32> -> vector<13x48xf32>
    %32 = vector.extract_strided_slice %27 {offsets = [15, 0], sizes = [13, 16], strides = [1, 1]} : vector<30x16xf32> to vector<13x16xf32>
    %33 = vector.extract_strided_slice %27 {offsets = [16, 0], sizes = [13, 16], strides = [1, 1]} : vector<30x16xf32> to vector<13x16xf32>
    %34 = vector.extract_strided_slice %27 {offsets = [17, 0], sizes = [13, 16], strides = [1, 1]} : vector<30x16xf32> to vector<13x16xf32>
    %35 = tpu.concatenate %32, %33, %34 in 1 : vector<13x16xf32>, vector<13x16xf32>, vector<13x16xf32> -> vector<13x48xf32>
    %36 = tpu.concatenate %31, %35 in 0 : vector<13x48xf32>, vector<13x48xf32> -> vector<26x48xf32>
    %c32_11 = arith.constant 32 : index
    %c0_12 = arith.constant 0 : index
    %37 = vector.load %arg1[%c32_11, %c0_12] : memref<584x128xf32, #tpu.memory_space<vmem>>, vector<48x16xf32>
    %cst_13 = arith.constant dense<0.000000e+00> : vector<26x16xf32>
    %38 = tpu.matmul %36, %37, %cst_13 {dimension_numbers = #tpu.dot_dimension_numbers<[1], [0], [0], [1], [0, 0, 1, 1], [], []>} : vector<26x48xf32>, vector<48x16xf32>, vector<26x16xf32> -> vector<26x16xf32>
    %c80 = arith.constant 80 : index
    %c0_14 = arith.constant 0 : index
    %39 = vector.load %arg1[%c80, %c0_14] : memref<584x128xf32, #tpu.memory_space<vmem>>, vector<1x16xf32>
    %40 = vector.broadcast %39 : vector<1x16xf32> to vector<26x16xf32>
    %41 = arith.addf %38, %40 : vector<26x16xf32>
    %c64 = arith.constant 64 : index
    %c0_15 = arith.constant 0 : index
    %42 = vector.load %arg2[%c64, %c0_15] : memref<168x60xf32, #tpu.memory_space<vmem>>, vector<12x26xf32>
    %cst_16 = arith.constant dense<0.000000e+00> : vector<12x16xf32>
    %43 = tpu.matmul %42, %41, %cst_16 {dimension_numbers = #tpu.dot_dimension_numbers<[1], [0], [0], [1], [0, 0, 1, 1], [], []>} : vector<12x26xf32>, vector<26x16xf32>, vector<12x16xf32> -> vector<12x16xf32>
    %c80_17 = arith.constant 80 : index
    %c0_18 = arith.constant 0 : index
    %44 = vector.load %arg2[%c80_17, %c0_18] : memref<168x60xf32, #tpu.memory_space<vmem>>, vector<12x26xf32>
    %cst_19 = arith.constant dense<0.000000e+00> : vector<12x16xf32>
    %45 = tpu.matmul %44, %41, %cst_19 {dimension_numbers = #tpu.dot_dimension_numbers<[1], [0], [0], [1], [0, 0, 1, 1], [], []>} : vector<12x26xf32>, vector<26x16xf32>, vector<12x16xf32> -> vector<12x16xf32>
    %46 = arith.maximumf %43, %45 : vector<12x16xf32>
    %cst_20 = arith.constant 0.000000e+00 : f32
    %47 = vector.broadcast %cst_20 : f32 to vector<12x16xf32>
    %48 = arith.maximumf %46, %47 : vector<12x16xf32>
    %c216 = arith.constant 216 : index
    %c0_21 = arith.constant 0 : index
    %49 = vector.load %arg1[%c216, %c0_21] : memref<584x128xf32, #tpu.memory_space<vmem>>, vector<1x128xf32>
    %c88 = arith.constant 88 : index
    %c0_22 = arith.constant 0 : index
    %50 = vector.load %arg1[%c88, %c0_22] : memref<584x128xf32, #tpu.memory_space<vmem>>, vector<16x128xf32>
    %cst_23 = arith.constant dense<0.000000e+00> : vector<12x128xf32>
    %51 = tpu.matmul %48, %50, %cst_23 {dimension_numbers = #tpu.dot_dimension_numbers<[1], [0], [0], [1], [0, 0, 1, 1], [], []>} : vector<12x16xf32>, vector<16x128xf32>, vector<12x128xf32> -> vector<12x128xf32>
    %c136 = arith.constant 136 : index
    %c0_24 = arith.constant 0 : index
    %52 = vector.load %arg1[%c136, %c0_24] : memref<584x128xf32, #tpu.memory_space<vmem>>, vector<1x128xf32>
    %53 = vector.broadcast %52 : vector<1x128xf32> to vector<12x128xf32>
    %54 = arith.addf %51, %53 : vector<12x128xf32>
    %55 = vector.broadcast %49 : vector<1x128xf32> to vector<12x128xf32>
    %56 = arith.mulf %54, %55 : vector<12x128xf32>
    %57 = arith.subf %54, %56 : vector<12x128xf32>
    %c104 = arith.constant 104 : index
    %c0_25 = arith.constant 0 : index
    %58 = vector.load %arg1[%c104, %c0_25] : memref<584x128xf32, #tpu.memory_space<vmem>>, vector<32x128xf32>
    %cst_26 = arith.constant 0.000000e+00 : f32
    %59 = vector.broadcast %cst_26 : f32 to vector<2x32xf32>
    %cst_27 = arith.constant 0.000000e+00 : f32
    %60 = vector.broadcast %cst_27 : f32 to vector<2x32xf32>
    %61 = vector.extract_strided_slice %56 {offsets = [0, 0], sizes = [2, 128], strides = [1, 1]} : vector<12x128xf32> to vector<2x128xf32>
    %62 = vector.extract_strided_slice %57 {offsets = [10, 0], sizes = [2, 128], strides = [1, 1]} : vector<12x128xf32> to vector<2x128xf32>
    %63 = arith.addf %61, %62 : vector<2x128xf32>
    %cst_28 = arith.constant dense<0.000000e+00> : vector<2x128xf32>
    %64 = tpu.matmul %59, %58, %cst_28 {dimension_numbers = #tpu.dot_dimension_numbers<[1], [0], [0], [1], [0, 0, 1, 1], [], []>} : vector<2x32xf32>, vector<32x128xf32>, vector<2x128xf32> -> vector<2x128xf32>
    %65 = arith.addf %63, %64 : vector<2x128xf32>
    %66 = vector.extract_strided_slice %65 {offsets = [0, 0], sizes = [2, 32], strides = [1, 1]} : vector<2x128xf32> to vector<2x32xf32>
    %67 = arith.negf %66 : vector<2x32xf32>
    %68 = math.exp %67 : vector<2x32xf32>
    %cst_29 = arith.constant 1.000000e+00 : f32
    %69 = vector.broadcast %cst_29 : f32 to vector<2x32xf32>
    %70 = arith.addf %69, %68 : vector<2x32xf32>
    %71 = arith.divf %69, %70 : vector<2x32xf32>
    %72 = vector.extract_strided_slice %65 {offsets = [0, 32], sizes = [2, 32], strides = [1, 1]} : vector<2x128xf32> to vector<2x32xf32>
    %73 = arith.negf %72 : vector<2x32xf32>
    %74 = math.exp %73 : vector<2x32xf32>
    %cst_30 = arith.constant 1.000000e+00 : f32
    %75 = vector.broadcast %cst_30 : f32 to vector<2x32xf32>
    %76 = arith.addf %75, %74 : vector<2x32xf32>
    %77 = arith.divf %75, %76 : vector<2x32xf32>
    %78 = vector.extract_strided_slice %65 {offsets = [0, 64], sizes = [2, 32], strides = [1, 1]} : vector<2x128xf32> to vector<2x32xf32>
    %79 = math.tanh %78 : vector<2x32xf32>
    %80 = vector.extract_strided_slice %65 {offsets = [0, 96], sizes = [2, 32], strides = [1, 1]} : vector<2x128xf32> to vector<2x32xf32>
    %81 = arith.negf %80 : vector<2x32xf32>
    %82 = math.exp %81 : vector<2x32xf32>
    %cst_31 = arith.constant 1.000000e+00 : f32
    %83 = vector.broadcast %cst_31 : f32 to vector<2x32xf32>
    %84 = arith.addf %83, %82 : vector<2x32xf32>
    %85 = arith.divf %83, %84 : vector<2x32xf32>
    %86 = arith.mulf %77, %60 : vector<2x32xf32>
    %87 = arith.mulf %71, %79 : vector<2x32xf32>
    %88 = arith.addf %86, %87 : vector<2x32xf32>
    %89 = math.tanh %88 : vector<2x32xf32>
    %90 = arith.mulf %85, %89 : vector<2x32xf32>
    %91 = vector.extract_strided_slice %90 {offsets = [0, 0], sizes = [2, 16], strides = [1, 1]} : vector<2x32xf32> to vector<2x16xf32>
    %92 = vector.extract_strided_slice %90 {offsets = [0, 16], sizes = [2, 16], strides = [1, 1]} : vector<2x32xf32> to vector<2x16xf32>
    %93 = vector.extract_strided_slice %56 {offsets = [2, 0], sizes = [2, 128], strides = [1, 1]} : vector<12x128xf32> to vector<2x128xf32>
    %94 = vector.extract_strided_slice %57 {offsets = [8, 0], sizes = [2, 128], strides = [1, 1]} : vector<12x128xf32> to vector<2x128xf32>
    %95 = arith.addf %93, %94 : vector<2x128xf32>
    %cst_32 = arith.constant dense<0.000000e+00> : vector<2x128xf32>
    %96 = tpu.matmul %90, %58, %cst_32 {dimension_numbers = #tpu.dot_dimension_numbers<[1], [0], [0], [1], [0, 0, 1, 1], [], []>} : vector<2x32xf32>, vector<32x128xf32>, vector<2x128xf32> -> vector<2x128xf32>
    %97 = arith.addf %95, %96 : vector<2x128xf32>
    %98 = vector.extract_strided_slice %97 {offsets = [0, 0], sizes = [2, 32], strides = [1, 1]} : vector<2x128xf32> to vector<2x32xf32>
    %99 = arith.negf %98 : vector<2x32xf32>
    %100 = math.exp %99 : vector<2x32xf32>
    %cst_33 = arith.constant 1.000000e+00 : f32
    %101 = vector.broadcast %cst_33 : f32 to vector<2x32xf32>
    %102 = arith.addf %101, %100 : vector<2x32xf32>
    %103 = arith.divf %101, %102 : vector<2x32xf32>
    %104 = vector.extract_strided_slice %97 {offsets = [0, 32], sizes = [2, 32], strides = [1, 1]} : vector<2x128xf32> to vector<2x32xf32>
    %105 = arith.negf %104 : vector<2x32xf32>
    %106 = math.exp %105 : vector<2x32xf32>
    %cst_34 = arith.constant 1.000000e+00 : f32
    %107 = vector.broadcast %cst_34 : f32 to vector<2x32xf32>
    %108 = arith.addf %107, %106 : vector<2x32xf32>
    %109 = arith.divf %107, %108 : vector<2x32xf32>
    %110 = vector.extract_strided_slice %97 {offsets = [0, 64], sizes = [2, 32], strides = [1, 1]} : vector<2x128xf32> to vector<2x32xf32>
    %111 = math.tanh %110 : vector<2x32xf32>
    %112 = vector.extract_strided_slice %97 {offsets = [0, 96], sizes = [2, 32], strides = [1, 1]} : vector<2x128xf32> to vector<2x32xf32>
    %113 = arith.negf %112 : vector<2x32xf32>
    %114 = math.exp %113 : vector<2x32xf32>
    %cst_35 = arith.constant 1.000000e+00 : f32
    %115 = vector.broadcast %cst_35 : f32 to vector<2x32xf32>
    %116 = arith.addf %115, %114 : vector<2x32xf32>
    %117 = arith.divf %115, %116 : vector<2x32xf32>
    %118 = arith.mulf %109, %88 : vector<2x32xf32>
    %119 = arith.mulf %103, %111 : vector<2x32xf32>
    %120 = arith.addf %118, %119 : vector<2x32xf32>
    %121 = math.tanh %120 : vector<2x32xf32>
    %122 = arith.mulf %117, %121 : vector<2x32xf32>
    %123 = vector.extract_strided_slice %122 {offsets = [0, 0], sizes = [2, 16], strides = [1, 1]} : vector<2x32xf32> to vector<2x16xf32>
    %124 = vector.extract_strided_slice %122 {offsets = [0, 16], sizes = [2, 16], strides = [1, 1]} : vector<2x32xf32> to vector<2x16xf32>
    %125 = vector.extract_strided_slice %56 {offsets = [4, 0], sizes = [2, 128], strides = [1, 1]} : vector<12x128xf32> to vector<2x128xf32>
    %126 = vector.extract_strided_slice %57 {offsets = [6, 0], sizes = [2, 128], strides = [1, 1]} : vector<12x128xf32> to vector<2x128xf32>
    %127 = arith.addf %125, %126 : vector<2x128xf32>
    %cst_36 = arith.constant dense<0.000000e+00> : vector<2x128xf32>
    %128 = tpu.matmul %122, %58, %cst_36 {dimension_numbers = #tpu.dot_dimension_numbers<[1], [0], [0], [1], [0, 0, 1, 1], [], []>} : vector<2x32xf32>, vector<32x128xf32>, vector<2x128xf32> -> vector<2x128xf32>
    %129 = arith.addf %127, %128 : vector<2x128xf32>
    %130 = vector.extract_strided_slice %129 {offsets = [0, 0], sizes = [2, 32], strides = [1, 1]} : vector<2x128xf32> to vector<2x32xf32>
    %131 = arith.negf %130 : vector<2x32xf32>
    %132 = math.exp %131 : vector<2x32xf32>
    %cst_37 = arith.constant 1.000000e+00 : f32
    %133 = vector.broadcast %cst_37 : f32 to vector<2x32xf32>
    %134 = arith.addf %133, %132 : vector<2x32xf32>
    %135 = arith.divf %133, %134 : vector<2x32xf32>
    %136 = vector.extract_strided_slice %129 {offsets = [0, 32], sizes = [2, 32], strides = [1, 1]} : vector<2x128xf32> to vector<2x32xf32>
    %137 = arith.negf %136 : vector<2x32xf32>
    %138 = math.exp %137 : vector<2x32xf32>
    %cst_38 = arith.constant 1.000000e+00 : f32
    %139 = vector.broadcast %cst_38 : f32 to vector<2x32xf32>
    %140 = arith.addf %139, %138 : vector<2x32xf32>
    %141 = arith.divf %139, %140 : vector<2x32xf32>
    %142 = vector.extract_strided_slice %129 {offsets = [0, 64], sizes = [2, 32], strides = [1, 1]} : vector<2x128xf32> to vector<2x32xf32>
    %143 = math.tanh %142 : vector<2x32xf32>
    %144 = vector.extract_strided_slice %129 {offsets = [0, 96], sizes = [2, 32], strides = [1, 1]} : vector<2x128xf32> to vector<2x32xf32>
    %145 = arith.negf %144 : vector<2x32xf32>
    %146 = math.exp %145 : vector<2x32xf32>
    %cst_39 = arith.constant 1.000000e+00 : f32
    %147 = vector.broadcast %cst_39 : f32 to vector<2x32xf32>
    %148 = arith.addf %147, %146 : vector<2x32xf32>
    %149 = arith.divf %147, %148 : vector<2x32xf32>
    %150 = arith.mulf %141, %120 : vector<2x32xf32>
    %151 = arith.mulf %135, %143 : vector<2x32xf32>
    %152 = arith.addf %150, %151 : vector<2x32xf32>
    %153 = math.tanh %152 : vector<2x32xf32>
    %154 = arith.mulf %149, %153 : vector<2x32xf32>
    %155 = vector.extract_strided_slice %154 {offsets = [0, 0], sizes = [2, 16], strides = [1, 1]} : vector<2x32xf32> to vector<2x16xf32>
    %156 = vector.extract_strided_slice %154 {offsets = [0, 16], sizes = [2, 16], strides = [1, 1]} : vector<2x32xf32> to vector<2x16xf32>
    %157 = vector.extract_strided_slice %56 {offsets = [6, 0], sizes = [2, 128], strides = [1, 1]} : vector<12x128xf32> to vector<2x128xf32>
    %158 = vector.extract_strided_slice %57 {offsets = [4, 0], sizes = [2, 128], strides = [1, 1]} : vector<12x128xf32> to vector<2x128xf32>
    %159 = arith.addf %157, %158 : vector<2x128xf32>
    %cst_40 = arith.constant dense<0.000000e+00> : vector<2x128xf32>
    %160 = tpu.matmul %154, %58, %cst_40 {dimension_numbers = #tpu.dot_dimension_numbers<[1], [0], [0], [1], [0, 0, 1, 1], [], []>} : vector<2x32xf32>, vector<32x128xf32>, vector<2x128xf32> -> vector<2x128xf32>
    %161 = arith.addf %159, %160 : vector<2x128xf32>
    %162 = vector.extract_strided_slice %161 {offsets = [0, 0], sizes = [2, 32], strides = [1, 1]} : vector<2x128xf32> to vector<2x32xf32>
    %163 = arith.negf %162 : vector<2x32xf32>
    %164 = math.exp %163 : vector<2x32xf32>
    %cst_41 = arith.constant 1.000000e+00 : f32
    %165 = vector.broadcast %cst_41 : f32 to vector<2x32xf32>
    %166 = arith.addf %165, %164 : vector<2x32xf32>
    %167 = arith.divf %165, %166 : vector<2x32xf32>
    %168 = vector.extract_strided_slice %161 {offsets = [0, 32], sizes = [2, 32], strides = [1, 1]} : vector<2x128xf32> to vector<2x32xf32>
    %169 = arith.negf %168 : vector<2x32xf32>
    %170 = math.exp %169 : vector<2x32xf32>
    %cst_42 = arith.constant 1.000000e+00 : f32
    %171 = vector.broadcast %cst_42 : f32 to vector<2x32xf32>
    %172 = arith.addf %171, %170 : vector<2x32xf32>
    %173 = arith.divf %171, %172 : vector<2x32xf32>
    %174 = vector.extract_strided_slice %161 {offsets = [0, 64], sizes = [2, 32], strides = [1, 1]} : vector<2x128xf32> to vector<2x32xf32>
    %175 = math.tanh %174 : vector<2x32xf32>
    %176 = vector.extract_strided_slice %161 {offsets = [0, 96], sizes = [2, 32], strides = [1, 1]} : vector<2x128xf32> to vector<2x32xf32>
    %177 = arith.negf %176 : vector<2x32xf32>
    %178 = math.exp %177 : vector<2x32xf32>
    %cst_43 = arith.constant 1.000000e+00 : f32
    %179 = vector.broadcast %cst_43 : f32 to vector<2x32xf32>
    %180 = arith.addf %179, %178 : vector<2x32xf32>
    %181 = arith.divf %179, %180 : vector<2x32xf32>
    %182 = arith.mulf %173, %152 : vector<2x32xf32>
    %183 = arith.mulf %167, %175 : vector<2x32xf32>
    %184 = arith.addf %182, %183 : vector<2x32xf32>
    %185 = math.tanh %184 : vector<2x32xf32>
    %186 = arith.mulf %181, %185 : vector<2x32xf32>
    %187 = vector.extract_strided_slice %186 {offsets = [0, 0], sizes = [2, 16], strides = [1, 1]} : vector<2x32xf32> to vector<2x16xf32>
    %188 = vector.extract_strided_slice %186 {offsets = [0, 16], sizes = [2, 16], strides = [1, 1]} : vector<2x32xf32> to vector<2x16xf32>
    %189 = vector.extract_strided_slice %56 {offsets = [8, 0], sizes = [2, 128], strides = [1, 1]} : vector<12x128xf32> to vector<2x128xf32>
    %190 = vector.extract_strided_slice %57 {offsets = [2, 0], sizes = [2, 128], strides = [1, 1]} : vector<12x128xf32> to vector<2x128xf32>
    %191 = arith.addf %189, %190 : vector<2x128xf32>
    %cst_44 = arith.constant dense<0.000000e+00> : vector<2x128xf32>
    %192 = tpu.matmul %186, %58, %cst_44 {dimension_numbers = #tpu.dot_dimension_numbers<[1], [0], [0], [1], [0, 0, 1, 1], [], []>} : vector<2x32xf32>, vector<32x128xf32>, vector<2x128xf32> -> vector<2x128xf32>
    %193 = arith.addf %191, %192 : vector<2x128xf32>
    %194 = vector.extract_strided_slice %193 {offsets = [0, 0], sizes = [2, 32], strides = [1, 1]} : vector<2x128xf32> to vector<2x32xf32>
    %195 = arith.negf %194 : vector<2x32xf32>
    %196 = math.exp %195 : vector<2x32xf32>
    %cst_45 = arith.constant 1.000000e+00 : f32
    %197 = vector.broadcast %cst_45 : f32 to vector<2x32xf32>
    %198 = arith.addf %197, %196 : vector<2x32xf32>
    %199 = arith.divf %197, %198 : vector<2x32xf32>
    %200 = vector.extract_strided_slice %193 {offsets = [0, 32], sizes = [2, 32], strides = [1, 1]} : vector<2x128xf32> to vector<2x32xf32>
    %201 = arith.negf %200 : vector<2x32xf32>
    %202 = math.exp %201 : vector<2x32xf32>
    %cst_46 = arith.constant 1.000000e+00 : f32
    %203 = vector.broadcast %cst_46 : f32 to vector<2x32xf32>
    %204 = arith.addf %203, %202 : vector<2x32xf32>
    %205 = arith.divf %203, %204 : vector<2x32xf32>
    %206 = vector.extract_strided_slice %193 {offsets = [0, 64], sizes = [2, 32], strides = [1, 1]} : vector<2x128xf32> to vector<2x32xf32>
    %207 = math.tanh %206 : vector<2x32xf32>
    %208 = vector.extract_strided_slice %193 {offsets = [0, 96], sizes = [2, 32], strides = [1, 1]} : vector<2x128xf32> to vector<2x32xf32>
    %209 = arith.negf %208 : vector<2x32xf32>
    %210 = math.exp %209 : vector<2x32xf32>
    %cst_47 = arith.constant 1.000000e+00 : f32
    %211 = vector.broadcast %cst_47 : f32 to vector<2x32xf32>
    %212 = arith.addf %211, %210 : vector<2x32xf32>
    %213 = arith.divf %211, %212 : vector<2x32xf32>
    %214 = arith.mulf %205, %184 : vector<2x32xf32>
    %215 = arith.mulf %199, %207 : vector<2x32xf32>
    %216 = arith.addf %214, %215 : vector<2x32xf32>
    %217 = math.tanh %216 : vector<2x32xf32>
    %218 = arith.mulf %213, %217 : vector<2x32xf32>
    %219 = vector.extract_strided_slice %218 {offsets = [0, 0], sizes = [2, 16], strides = [1, 1]} : vector<2x32xf32> to vector<2x16xf32>
    %220 = vector.extract_strided_slice %218 {offsets = [0, 16], sizes = [2, 16], strides = [1, 1]} : vector<2x32xf32> to vector<2x16xf32>
    %221 = vector.extract_strided_slice %56 {offsets = [10, 0], sizes = [2, 128], strides = [1, 1]} : vector<12x128xf32> to vector<2x128xf32>
    %222 = vector.extract_strided_slice %57 {offsets = [0, 0], sizes = [2, 128], strides = [1, 1]} : vector<12x128xf32> to vector<2x128xf32>
    %223 = arith.addf %221, %222 : vector<2x128xf32>
    %cst_48 = arith.constant dense<0.000000e+00> : vector<2x128xf32>
    %224 = tpu.matmul %218, %58, %cst_48 {dimension_numbers = #tpu.dot_dimension_numbers<[1], [0], [0], [1], [0, 0, 1, 1], [], []>} : vector<2x32xf32>, vector<32x128xf32>, vector<2x128xf32> -> vector<2x128xf32>
    %225 = arith.addf %223, %224 : vector<2x128xf32>
    %226 = vector.extract_strided_slice %225 {offsets = [0, 0], sizes = [2, 32], strides = [1, 1]} : vector<2x128xf32> to vector<2x32xf32>
    %227 = arith.negf %226 : vector<2x32xf32>
    %228 = math.exp %227 : vector<2x32xf32>
    %cst_49 = arith.constant 1.000000e+00 : f32
    %229 = vector.broadcast %cst_49 : f32 to vector<2x32xf32>
    %230 = arith.addf %229, %228 : vector<2x32xf32>
    %231 = arith.divf %229, %230 : vector<2x32xf32>
    %232 = vector.extract_strided_slice %225 {offsets = [0, 32], sizes = [2, 32], strides = [1, 1]} : vector<2x128xf32> to vector<2x32xf32>
    %233 = arith.negf %232 : vector<2x32xf32>
    %234 = math.exp %233 : vector<2x32xf32>
    %cst_50 = arith.constant 1.000000e+00 : f32
    %235 = vector.broadcast %cst_50 : f32 to vector<2x32xf32>
    %236 = arith.addf %235, %234 : vector<2x32xf32>
    %237 = arith.divf %235, %236 : vector<2x32xf32>
    %238 = vector.extract_strided_slice %225 {offsets = [0, 64], sizes = [2, 32], strides = [1, 1]} : vector<2x128xf32> to vector<2x32xf32>
    %239 = math.tanh %238 : vector<2x32xf32>
    %240 = vector.extract_strided_slice %225 {offsets = [0, 96], sizes = [2, 32], strides = [1, 1]} : vector<2x128xf32> to vector<2x32xf32>
    %241 = arith.negf %240 : vector<2x32xf32>
    %242 = math.exp %241 : vector<2x32xf32>
    %cst_51 = arith.constant 1.000000e+00 : f32
    %243 = vector.broadcast %cst_51 : f32 to vector<2x32xf32>
    %244 = arith.addf %243, %242 : vector<2x32xf32>
    %245 = arith.divf %243, %244 : vector<2x32xf32>
    %246 = arith.mulf %237, %216 : vector<2x32xf32>
    %247 = arith.mulf %231, %239 : vector<2x32xf32>
    %248 = arith.addf %246, %247 : vector<2x32xf32>
    %249 = math.tanh %248 : vector<2x32xf32>
    %250 = arith.mulf %245, %249 : vector<2x32xf32>
    %251 = vector.extract_strided_slice %250 {offsets = [0, 0], sizes = [2, 16], strides = [1, 1]} : vector<2x32xf32> to vector<2x16xf32>
    %252 = vector.extract_strided_slice %250 {offsets = [0, 16], sizes = [2, 16], strides = [1, 1]} : vector<2x32xf32> to vector<2x16xf32>
    %253 = tpu.concatenate %91, %123, %155, %187, %219, %251 in 0 : vector<2x16xf32>, vector<2x16xf32>, vector<2x16xf32>, vector<2x16xf32>, vector<2x16xf32>, vector<2x16xf32> -> vector<12x16xf32>
    %254 = tpu.concatenate %252, %220, %188, %156, %124, %92 in 0 : vector<2x16xf32>, vector<2x16xf32>, vector<2x16xf32>, vector<2x16xf32>, vector<2x16xf32>, vector<2x16xf32> -> vector<12x16xf32>
    %255 = tpu.concatenate %253, %254 in 1 : vector<12x16xf32>, vector<12x16xf32> -> vector<12x32xf32>
    %c144 = arith.constant 144 : index
    %c0_52 = arith.constant 0 : index
    %256 = vector.load %arg1[%c144, %c0_52] : memref<584x128xf32, #tpu.memory_space<vmem>>, vector<32x128xf32>
    %cst_53 = arith.constant dense<0.000000e+00> : vector<12x128xf32>
    %257 = tpu.matmul %255, %256, %cst_53 {dimension_numbers = #tpu.dot_dimension_numbers<[1], [0], [0], [1], [0, 0, 1, 1], [], []>} : vector<12x32xf32>, vector<32x128xf32>, vector<12x128xf32> -> vector<12x128xf32>
    %c208 = arith.constant 208 : index
    %c0_54 = arith.constant 0 : index
    %258 = vector.load %arg1[%c208, %c0_54] : memref<584x128xf32, #tpu.memory_space<vmem>>, vector<1x128xf32>
    %259 = vector.broadcast %258 : vector<1x128xf32> to vector<12x128xf32>
    %260 = arith.addf %257, %259 : vector<12x128xf32>
    %261 = vector.broadcast %49 : vector<1x128xf32> to vector<12x128xf32>
    %262 = arith.mulf %260, %261 : vector<12x128xf32>
    %263 = arith.subf %260, %262 : vector<12x128xf32>
    %c176 = arith.constant 176 : index
    %c0_55 = arith.constant 0 : index
    %264 = vector.load %arg1[%c176, %c0_55] : memref<584x128xf32, #tpu.memory_space<vmem>>, vector<32x128xf32>
    %cst_56 = arith.constant 0.000000e+00 : f32
    %265 = vector.broadcast %cst_56 : f32 to vector<2x32xf32>
    %cst_57 = arith.constant 0.000000e+00 : f32
    %266 = vector.broadcast %cst_57 : f32 to vector<2x32xf32>
    %267 = vector.extract_strided_slice %262 {offsets = [0, 0], sizes = [2, 128], strides = [1, 1]} : vector<12x128xf32> to vector<2x128xf32>
    %268 = vector.extract_strided_slice %263 {offsets = [10, 0], sizes = [2, 128], strides = [1, 1]} : vector<12x128xf32> to vector<2x128xf32>
    %269 = arith.addf %267, %268 : vector<2x128xf32>
    %cst_58 = arith.constant dense<0.000000e+00> : vector<2x128xf32>
    %270 = tpu.matmul %265, %264, %cst_58 {dimension_numbers = #tpu.dot_dimension_numbers<[1], [0], [0], [1], [0, 0, 1, 1], [], []>} : vector<2x32xf32>, vector<32x128xf32>, vector<2x128xf32> -> vector<2x128xf32>
    %271 = arith.addf %269, %270 : vector<2x128xf32>
    %272 = vector.extract_strided_slice %271 {offsets = [0, 0], sizes = [2, 32], strides = [1, 1]} : vector<2x128xf32> to vector<2x32xf32>
    %273 = arith.negf %272 : vector<2x32xf32>
    %274 = math.exp %273 : vector<2x32xf32>
    %cst_59 = arith.constant 1.000000e+00 : f32
    %275 = vector.broadcast %cst_59 : f32 to vector<2x32xf32>
    %276 = arith.addf %275, %274 : vector<2x32xf32>
    %277 = arith.divf %275, %276 : vector<2x32xf32>
    %278 = vector.extract_strided_slice %271 {offsets = [0, 32], sizes = [2, 32], strides = [1, 1]} : vector<2x128xf32> to vector<2x32xf32>
    %279 = arith.negf %278 : vector<2x32xf32>
    %280 = math.exp %279 : vector<2x32xf32>
    %cst_60 = arith.constant 1.000000e+00 : f32
    %281 = vector.broadcast %cst_60 : f32 to vector<2x32xf32>
    %282 = arith.addf %281, %280 : vector<2x32xf32>
    %283 = arith.divf %281, %282 : vector<2x32xf32>
    %284 = vector.extract_strided_slice %271 {offsets = [0, 64], sizes = [2, 32], strides = [1, 1]} : vector<2x128xf32> to vector<2x32xf32>
    %285 = math.tanh %284 : vector<2x32xf32>
    %286 = vector.extract_strided_slice %271 {offsets = [0, 96], sizes = [2, 32], strides = [1, 1]} : vector<2x128xf32> to vector<2x32xf32>
    %287 = arith.negf %286 : vector<2x32xf32>
    %288 = math.exp %287 : vector<2x32xf32>
    %cst_61 = arith.constant 1.000000e+00 : f32
    %289 = vector.broadcast %cst_61 : f32 to vector<2x32xf32>
    %290 = arith.addf %289, %288 : vector<2x32xf32>
    %291 = arith.divf %289, %290 : vector<2x32xf32>
    %292 = arith.mulf %283, %266 : vector<2x32xf32>
    %293 = arith.mulf %277, %285 : vector<2x32xf32>
    %294 = arith.addf %292, %293 : vector<2x32xf32>
    %295 = math.tanh %294 : vector<2x32xf32>
    %296 = arith.mulf %291, %295 : vector<2x32xf32>
    %297 = vector.extract_strided_slice %296 {offsets = [0, 0], sizes = [2, 16], strides = [1, 1]} : vector<2x32xf32> to vector<2x16xf32>
    %298 = vector.extract_strided_slice %296 {offsets = [0, 16], sizes = [2, 16], strides = [1, 1]} : vector<2x32xf32> to vector<2x16xf32>
    %299 = vector.extract_strided_slice %262 {offsets = [2, 0], sizes = [2, 128], strides = [1, 1]} : vector<12x128xf32> to vector<2x128xf32>
    %300 = vector.extract_strided_slice %263 {offsets = [8, 0], sizes = [2, 128], strides = [1, 1]} : vector<12x128xf32> to vector<2x128xf32>
    %301 = arith.addf %299, %300 : vector<2x128xf32>
    %cst_62 = arith.constant dense<0.000000e+00> : vector<2x128xf32>
    %302 = tpu.matmul %296, %264, %cst_62 {dimension_numbers = #tpu.dot_dimension_numbers<[1], [0], [0], [1], [0, 0, 1, 1], [], []>} : vector<2x32xf32>, vector<32x128xf32>, vector<2x128xf32> -> vector<2x128xf32>
    %303 = arith.addf %301, %302 : vector<2x128xf32>
    %304 = vector.extract_strided_slice %303 {offsets = [0, 0], sizes = [2, 32], strides = [1, 1]} : vector<2x128xf32> to vector<2x32xf32>
    %305 = arith.negf %304 : vector<2x32xf32>
    %306 = math.exp %305 : vector<2x32xf32>
    %cst_63 = arith.constant 1.000000e+00 : f32
    %307 = vector.broadcast %cst_63 : f32 to vector<2x32xf32>
    %308 = arith.addf %307, %306 : vector<2x32xf32>
    %309 = arith.divf %307, %308 : vector<2x32xf32>
    %310 = vector.extract_strided_slice %303 {offsets = [0, 32], sizes = [2, 32], strides = [1, 1]} : vector<2x128xf32> to vector<2x32xf32>
    %311 = arith.negf %310 : vector<2x32xf32>
    %312 = math.exp %311 : vector<2x32xf32>
    %cst_64 = arith.constant 1.000000e+00 : f32
    %313 = vector.broadcast %cst_64 : f32 to vector<2x32xf32>
    %314 = arith.addf %313, %312 : vector<2x32xf32>
    %315 = arith.divf %313, %314 : vector<2x32xf32>
    %316 = vector.extract_strided_slice %303 {offsets = [0, 64], sizes = [2, 32], strides = [1, 1]} : vector<2x128xf32> to vector<2x32xf32>
    %317 = math.tanh %316 : vector<2x32xf32>
    %318 = vector.extract_strided_slice %303 {offsets = [0, 96], sizes = [2, 32], strides = [1, 1]} : vector<2x128xf32> to vector<2x32xf32>
    %319 = arith.negf %318 : vector<2x32xf32>
    %320 = math.exp %319 : vector<2x32xf32>
    %cst_65 = arith.constant 1.000000e+00 : f32
    %321 = vector.broadcast %cst_65 : f32 to vector<2x32xf32>
    %322 = arith.addf %321, %320 : vector<2x32xf32>
    %323 = arith.divf %321, %322 : vector<2x32xf32>
    %324 = arith.mulf %315, %294 : vector<2x32xf32>
    %325 = arith.mulf %309, %317 : vector<2x32xf32>
    %326 = arith.addf %324, %325 : vector<2x32xf32>
    %327 = math.tanh %326 : vector<2x32xf32>
    %328 = arith.mulf %323, %327 : vector<2x32xf32>
    %329 = vector.extract_strided_slice %328 {offsets = [0, 0], sizes = [2, 16], strides = [1, 1]} : vector<2x32xf32> to vector<2x16xf32>
    %330 = vector.extract_strided_slice %328 {offsets = [0, 16], sizes = [2, 16], strides = [1, 1]} : vector<2x32xf32> to vector<2x16xf32>
    %331 = vector.extract_strided_slice %262 {offsets = [4, 0], sizes = [2, 128], strides = [1, 1]} : vector<12x128xf32> to vector<2x128xf32>
    %332 = vector.extract_strided_slice %263 {offsets = [6, 0], sizes = [2, 128], strides = [1, 1]} : vector<12x128xf32> to vector<2x128xf32>
    %333 = arith.addf %331, %332 : vector<2x128xf32>
    %cst_66 = arith.constant dense<0.000000e+00> : vector<2x128xf32>
    %334 = tpu.matmul %328, %264, %cst_66 {dimension_numbers = #tpu.dot_dimension_numbers<[1], [0], [0], [1], [0, 0, 1, 1], [], []>} : vector<2x32xf32>, vector<32x128xf32>, vector<2x128xf32> -> vector<2x128xf32>
    %335 = arith.addf %333, %334 : vector<2x128xf32>
    %336 = vector.extract_strided_slice %335 {offsets = [0, 0], sizes = [2, 32], strides = [1, 1]} : vector<2x128xf32> to vector<2x32xf32>
    %337 = arith.negf %336 : vector<2x32xf32>
    %338 = math.exp %337 : vector<2x32xf32>
    %cst_67 = arith.constant 1.000000e+00 : f32
    %339 = vector.broadcast %cst_67 : f32 to vector<2x32xf32>
    %340 = arith.addf %339, %338 : vector<2x32xf32>
    %341 = arith.divf %339, %340 : vector<2x32xf32>
    %342 = vector.extract_strided_slice %335 {offsets = [0, 32], sizes = [2, 32], strides = [1, 1]} : vector<2x128xf32> to vector<2x32xf32>
    %343 = arith.negf %342 : vector<2x32xf32>
    %344 = math.exp %343 : vector<2x32xf32>
    %cst_68 = arith.constant 1.000000e+00 : f32
    %345 = vector.broadcast %cst_68 : f32 to vector<2x32xf32>
    %346 = arith.addf %345, %344 : vector<2x32xf32>
    %347 = arith.divf %345, %346 : vector<2x32xf32>
    %348 = vector.extract_strided_slice %335 {offsets = [0, 64], sizes = [2, 32], strides = [1, 1]} : vector<2x128xf32> to vector<2x32xf32>
    %349 = math.tanh %348 : vector<2x32xf32>
    %350 = vector.extract_strided_slice %335 {offsets = [0, 96], sizes = [2, 32], strides = [1, 1]} : vector<2x128xf32> to vector<2x32xf32>
    %351 = arith.negf %350 : vector<2x32xf32>
    %352 = math.exp %351 : vector<2x32xf32>
    %cst_69 = arith.constant 1.000000e+00 : f32
    %353 = vector.broadcast %cst_69 : f32 to vector<2x32xf32>
    %354 = arith.addf %353, %352 : vector<2x32xf32>
    %355 = arith.divf %353, %354 : vector<2x32xf32>
    %356 = arith.mulf %347, %326 : vector<2x32xf32>
    %357 = arith.mulf %341, %349 : vector<2x32xf32>
    %358 = arith.addf %356, %357 : vector<2x32xf32>
    %359 = math.tanh %358 : vector<2x32xf32>
    %360 = arith.mulf %355, %359 : vector<2x32xf32>
    %361 = vector.extract_strided_slice %360 {offsets = [0, 0], sizes = [2, 16], strides = [1, 1]} : vector<2x32xf32> to vector<2x16xf32>
    %362 = vector.extract_strided_slice %360 {offsets = [0, 16], sizes = [2, 16], strides = [1, 1]} : vector<2x32xf32> to vector<2x16xf32>
    %363 = vector.extract_strided_slice %262 {offsets = [6, 0], sizes = [2, 128], strides = [1, 1]} : vector<12x128xf32> to vector<2x128xf32>
    %364 = vector.extract_strided_slice %263 {offsets = [4, 0], sizes = [2, 128], strides = [1, 1]} : vector<12x128xf32> to vector<2x128xf32>
    %365 = arith.addf %363, %364 : vector<2x128xf32>
    %cst_70 = arith.constant dense<0.000000e+00> : vector<2x128xf32>
    %366 = tpu.matmul %360, %264, %cst_70 {dimension_numbers = #tpu.dot_dimension_numbers<[1], [0], [0], [1], [0, 0, 1, 1], [], []>} : vector<2x32xf32>, vector<32x128xf32>, vector<2x128xf32> -> vector<2x128xf32>
    %367 = arith.addf %365, %366 : vector<2x128xf32>
    %368 = vector.extract_strided_slice %367 {offsets = [0, 0], sizes = [2, 32], strides = [1, 1]} : vector<2x128xf32> to vector<2x32xf32>
    %369 = arith.negf %368 : vector<2x32xf32>
    %370 = math.exp %369 : vector<2x32xf32>
    %cst_71 = arith.constant 1.000000e+00 : f32
    %371 = vector.broadcast %cst_71 : f32 to vector<2x32xf32>
    %372 = arith.addf %371, %370 : vector<2x32xf32>
    %373 = arith.divf %371, %372 : vector<2x32xf32>
    %374 = vector.extract_strided_slice %367 {offsets = [0, 32], sizes = [2, 32], strides = [1, 1]} : vector<2x128xf32> to vector<2x32xf32>
    %375 = arith.negf %374 : vector<2x32xf32>
    %376 = math.exp %375 : vector<2x32xf32>
    %cst_72 = arith.constant 1.000000e+00 : f32
    %377 = vector.broadcast %cst_72 : f32 to vector<2x32xf32>
    %378 = arith.addf %377, %376 : vector<2x32xf32>
    %379 = arith.divf %377, %378 : vector<2x32xf32>
    %380 = vector.extract_strided_slice %367 {offsets = [0, 64], sizes = [2, 32], strides = [1, 1]} : vector<2x128xf32> to vector<2x32xf32>
    %381 = math.tanh %380 : vector<2x32xf32>
    %382 = vector.extract_strided_slice %367 {offsets = [0, 96], sizes = [2, 32], strides = [1, 1]} : vector<2x128xf32> to vector<2x32xf32>
    %383 = arith.negf %382 : vector<2x32xf32>
    %384 = math.exp %383 : vector<2x32xf32>
    %cst_73 = arith.constant 1.000000e+00 : f32
    %385 = vector.broadcast %cst_73 : f32 to vector<2x32xf32>
    %386 = arith.addf %385, %384 : vector<2x32xf32>
    %387 = arith.divf %385, %386 : vector<2x32xf32>
    %388 = arith.mulf %379, %358 : vector<2x32xf32>
    %389 = arith.mulf %373, %381 : vector<2x32xf32>
    %390 = arith.addf %388, %389 : vector<2x32xf32>
    %391 = math.tanh %390 : vector<2x32xf32>
    %392 = arith.mulf %387, %391 : vector<2x32xf32>
    %393 = vector.extract_strided_slice %392 {offsets = [0, 0], sizes = [2, 16], strides = [1, 1]} : vector<2x32xf32> to vector<2x16xf32>
    %394 = vector.extract_strided_slice %392 {offsets = [0, 16], sizes = [2, 16], strides = [1, 1]} : vector<2x32xf32> to vector<2x16xf32>
    %395 = vector.extract_strided_slice %262 {offsets = [8, 0], sizes = [2, 128], strides = [1, 1]} : vector<12x128xf32> to vector<2x128xf32>
    %396 = vector.extract_strided_slice %263 {offsets = [2, 0], sizes = [2, 128], strides = [1, 1]} : vector<12x128xf32> to vector<2x128xf32>
    %397 = arith.addf %395, %396 : vector<2x128xf32>
    %cst_74 = arith.constant dense<0.000000e+00> : vector<2x128xf32>
    %398 = tpu.matmul %392, %264, %cst_74 {dimension_numbers = #tpu.dot_dimension_numbers<[1], [0], [0], [1], [0, 0, 1, 1], [], []>} : vector<2x32xf32>, vector<32x128xf32>, vector<2x128xf32> -> vector<2x128xf32>
    %399 = arith.addf %397, %398 : vector<2x128xf32>
    %400 = vector.extract_strided_slice %399 {offsets = [0, 0], sizes = [2, 32], strides = [1, 1]} : vector<2x128xf32> to vector<2x32xf32>
    %401 = arith.negf %400 : vector<2x32xf32>
    %402 = math.exp %401 : vector<2x32xf32>
    %cst_75 = arith.constant 1.000000e+00 : f32
    %403 = vector.broadcast %cst_75 : f32 to vector<2x32xf32>
    %404 = arith.addf %403, %402 : vector<2x32xf32>
    %405 = arith.divf %403, %404 : vector<2x32xf32>
    %406 = vector.extract_strided_slice %399 {offsets = [0, 32], sizes = [2, 32], strides = [1, 1]} : vector<2x128xf32> to vector<2x32xf32>
    %407 = arith.negf %406 : vector<2x32xf32>
    %408 = math.exp %407 : vector<2x32xf32>
    %cst_76 = arith.constant 1.000000e+00 : f32
    %409 = vector.broadcast %cst_76 : f32 to vector<2x32xf32>
    %410 = arith.addf %409, %408 : vector<2x32xf32>
    %411 = arith.divf %409, %410 : vector<2x32xf32>
    %412 = vector.extract_strided_slice %399 {offsets = [0, 64], sizes = [2, 32], strides = [1, 1]} : vector<2x128xf32> to vector<2x32xf32>
    %413 = math.tanh %412 : vector<2x32xf32>
    %414 = vector.extract_strided_slice %399 {offsets = [0, 96], sizes = [2, 32], strides = [1, 1]} : vector<2x128xf32> to vector<2x32xf32>
    %415 = arith.negf %414 : vector<2x32xf32>
    %416 = math.exp %415 : vector<2x32xf32>
    %cst_77 = arith.constant 1.000000e+00 : f32
    %417 = vector.broadcast %cst_77 : f32 to vector<2x32xf32>
    %418 = arith.addf %417, %416 : vector<2x32xf32>
    %419 = arith.divf %417, %418 : vector<2x32xf32>
    %420 = arith.mulf %411, %390 : vector<2x32xf32>
    %421 = arith.mulf %405, %413 : vector<2x32xf32>
    %422 = arith.addf %420, %421 : vector<2x32xf32>
    %423 = math.tanh %422 : vector<2x32xf32>
    %424 = arith.mulf %419, %423 : vector<2x32xf32>
    %425 = vector.extract_strided_slice %424 {offsets = [0, 0], sizes = [2, 16], strides = [1, 1]} : vector<2x32xf32> to vector<2x16xf32>
    %426 = vector.extract_strided_slice %424 {offsets = [0, 16], sizes = [2, 16], strides = [1, 1]} : vector<2x32xf32> to vector<2x16xf32>
    %427 = vector.extract_strided_slice %262 {offsets = [10, 0], sizes = [2, 128], strides = [1, 1]} : vector<12x128xf32> to vector<2x128xf32>
    %428 = vector.extract_strided_slice %263 {offsets = [0, 0], sizes = [2, 128], strides = [1, 1]} : vector<12x128xf32> to vector<2x128xf32>
    %429 = arith.addf %427, %428 : vector<2x128xf32>
    %cst_78 = arith.constant dense<0.000000e+00> : vector<2x128xf32>
    %430 = tpu.matmul %424, %264, %cst_78 {dimension_numbers = #tpu.dot_dimension_numbers<[1], [0], [0], [1], [0, 0, 1, 1], [], []>} : vector<2x32xf32>, vector<32x128xf32>, vector<2x128xf32> -> vector<2x128xf32>
    %431 = arith.addf %429, %430 : vector<2x128xf32>
    %432 = vector.extract_strided_slice %431 {offsets = [0, 0], sizes = [2, 32], strides = [1, 1]} : vector<2x128xf32> to vector<2x32xf32>
    %433 = arith.negf %432 : vector<2x32xf32>
    %434 = math.exp %433 : vector<2x32xf32>
    %cst_79 = arith.constant 1.000000e+00 : f32
    %435 = vector.broadcast %cst_79 : f32 to vector<2x32xf32>
    %436 = arith.addf %435, %434 : vector<2x32xf32>
    %437 = arith.divf %435, %436 : vector<2x32xf32>
    %438 = vector.extract_strided_slice %431 {offsets = [0, 32], sizes = [2, 32], strides = [1, 1]} : vector<2x128xf32> to vector<2x32xf32>
    %439 = arith.negf %438 : vector<2x32xf32>
    %440 = math.exp %439 : vector<2x32xf32>
    %cst_80 = arith.constant 1.000000e+00 : f32
    %441 = vector.broadcast %cst_80 : f32 to vector<2x32xf32>
    %442 = arith.addf %441, %440 : vector<2x32xf32>
    %443 = arith.divf %441, %442 : vector<2x32xf32>
    %444 = vector.extract_strided_slice %431 {offsets = [0, 64], sizes = [2, 32], strides = [1, 1]} : vector<2x128xf32> to vector<2x32xf32>
    %445 = math.tanh %444 : vector<2x32xf32>
    %446 = vector.extract_strided_slice %431 {offsets = [0, 96], sizes = [2, 32], strides = [1, 1]} : vector<2x128xf32> to vector<2x32xf32>
    %447 = arith.negf %446 : vector<2x32xf32>
    %448 = math.exp %447 : vector<2x32xf32>
    %cst_81 = arith.constant 1.000000e+00 : f32
    %449 = vector.broadcast %cst_81 : f32 to vector<2x32xf32>
    %450 = arith.addf %449, %448 : vector<2x32xf32>
    %451 = arith.divf %449, %450 : vector<2x32xf32>
    %452 = arith.mulf %443, %422 : vector<2x32xf32>
    %453 = arith.mulf %437, %445 : vector<2x32xf32>
    %454 = arith.addf %452, %453 : vector<2x32xf32>
    %455 = math.tanh %454 : vector<2x32xf32>
    %456 = arith.mulf %451, %455 : vector<2x32xf32>
    %457 = vector.extract_strided_slice %456 {offsets = [0, 0], sizes = [2, 16], strides = [1, 1]} : vector<2x32xf32> to vector<2x16xf32>
    %458 = vector.extract_strided_slice %456 {offsets = [0, 16], sizes = [2, 16], strides = [1, 1]} : vector<2x32xf32> to vector<2x16xf32>
    %459 = tpu.concatenate %297, %329, %361, %393, %425, %457 in 0 : vector<2x16xf32>, vector<2x16xf32>, vector<2x16xf32>, vector<2x16xf32>, vector<2x16xf32>, vector<2x16xf32> -> vector<12x16xf32>
    %460 = tpu.concatenate %458, %426, %394, %362, %330, %298 in 0 : vector<2x16xf32>, vector<2x16xf32>, vector<2x16xf32>, vector<2x16xf32>, vector<2x16xf32>, vector<2x16xf32> -> vector<12x16xf32>
    %461 = tpu.concatenate %459, %460 in 1 : vector<12x16xf32>, vector<12x16xf32> -> vector<12x32xf32>
    %c224 = arith.constant 224 : index
    %c0_82 = arith.constant 0 : index
    %462 = vector.load %arg1[%c224, %c0_82] : memref<584x128xf32, #tpu.memory_space<vmem>>, vector<32x96xf32>
    %cst_83 = arith.constant dense<0.000000e+00> : vector<12x96xf32>
    %463 = tpu.matmul %461, %462, %cst_83 {dimension_numbers = #tpu.dot_dimension_numbers<[1], [0], [0], [1], [0, 0, 1, 1], [], []>} : vector<12x32xf32>, vector<32x96xf32>, vector<12x96xf32> -> vector<12x96xf32>
    %c256 = arith.constant 256 : index
    %c0_84 = arith.constant 0 : index
    %464 = vector.load %arg1[%c256, %c0_84] : memref<584x128xf32, #tpu.memory_space<vmem>>, vector<1x96xf32>
    %465 = vector.broadcast %464 : vector<1x96xf32> to vector<12x96xf32>
    %466 = arith.addf %463, %465 : vector<12x96xf32>
    %467 = vector.extract_strided_slice %466 {offsets = [0, 0], sizes = [12, 32], strides = [1, 1]} : vector<12x96xf32> to vector<12x32xf32>
    %468 = vector.extract_strided_slice %466 {offsets = [0, 32], sizes = [12, 64], strides = [1, 1]} : vector<12x96xf32> to vector<12x64xf32>
    %c128 = arith.constant 128 : index
    %c0_85 = arith.constant 0 : index
    %469 = vector.load %arg2[%c128, %c0_85] : memref<168x60xf32, #tpu.memory_space<vmem>>, vector<32x2xf32>
    %c96 = arith.constant 96 : index
    %c0_86 = arith.constant 0 : index
    %470 = vector.load %arg2[%c96, %c0_86] : memref<168x60xf32, #tpu.memory_space<vmem>>, vector<12x12xf32>
    %cst_87 = arith.constant dense<0.000000e+00> : vector<12x64xf32>
    %471 = tpu.matmul %470, %468, %cst_87 {dimension_numbers = #tpu.dot_dimension_numbers<[1], [0], [0], [1], [0, 0, 1, 1], [], []>} : vector<12x12xf32>, vector<12x64xf32>, vector<12x64xf32> -> vector<12x64xf32>
    %c112 = arith.constant 112 : index
    %c0_88 = arith.constant 0 : index
    %472 = vector.load %arg2[%c112, %c0_88] : memref<168x60xf32, #tpu.memory_space<vmem>>, vector<12x12xf32>
    %cst_89 = arith.constant dense<0.000000e+00> : vector<12x64xf32>
    %473 = tpu.matmul %472, %468, %cst_89 {dimension_numbers = #tpu.dot_dimension_numbers<[1], [0], [0], [1], [0, 0, 1, 1], [], []>} : vector<12x12xf32>, vector<12x64xf32>, vector<12x64xf32> -> vector<12x64xf32>
    %474 = vector.extract_strided_slice %471 {offsets = [0, 0], sizes = [12, 32], strides = [1, 1]} : vector<12x64xf32> to vector<12x32xf32>
    %475 = arith.mulf %467, %474 : vector<12x32xf32>
    %cst_90 = arith.constant dense<0.000000e+00> : vector<12x2xf32>
    %476 = tpu.matmul %475, %469, %cst_90 {dimension_numbers = #tpu.dot_dimension_numbers<[1], [0], [0], [1], [0, 0, 1, 1], [], []>} : vector<12x32xf32>, vector<32x2xf32>, vector<12x2xf32> -> vector<12x2xf32>
    %cst_91 = arith.constant 2.500000e-01 : f32
    %477 = vector.broadcast %cst_91 : f32 to vector<12x2xf32>
    %478 = arith.mulf %476, %477 : vector<12x2xf32>
    %479 = vector.extract_strided_slice %473 {offsets = [0, 0], sizes = [12, 32], strides = [1, 1]} : vector<12x64xf32> to vector<12x32xf32>
    %480 = arith.mulf %467, %479 : vector<12x32xf32>
    %cst_92 = arith.constant dense<0.000000e+00> : vector<12x2xf32>
    %481 = tpu.matmul %480, %469, %cst_92 {dimension_numbers = #tpu.dot_dimension_numbers<[1], [0], [0], [1], [0, 0, 1, 1], [], []>} : vector<12x32xf32>, vector<32x2xf32>, vector<12x2xf32> -> vector<12x2xf32>
    %cst_93 = arith.constant 2.500000e-01 : f32
    %482 = vector.broadcast %cst_93 : f32 to vector<12x2xf32>
    %483 = arith.mulf %481, %482 : vector<12x2xf32>
    %484 = arith.maximumf %478, %483 : vector<12x2xf32>
    %485 = arith.subf %478, %484 : vector<12x2xf32>
    %486 = math.exp %485 : vector<12x2xf32>
    %487 = arith.subf %483, %484 : vector<12x2xf32>
    %488 = math.exp %487 : vector<12x2xf32>
    %489 = arith.addf %486, %488 : vector<12x2xf32>
    %cst_94 = arith.constant 1.000000e+00 : f32
    %490 = vector.broadcast %cst_94 : f32 to vector<12x2xf32>
    %491 = arith.divf %490, %489 : vector<12x2xf32>
    %492 = arith.mulf %486, %491 : vector<12x2xf32>
    %493 = vector.extract_strided_slice %492 {offsets = [0, 0], sizes = [12, 1], strides = [1, 1]} : vector<12x2xf32> to vector<12x1xf32>
    %494 = vector.shape_cast %493 : vector<12x1xf32> to vector<12x1xf32>
    %495 = vector.broadcast %494 : vector<12x1xf32> to vector<12x16xf32>
    %496 = vector.extract_strided_slice %492 {offsets = [0, 1], sizes = [12, 1], strides = [1, 1]} : vector<12x2xf32> to vector<12x1xf32>
    %497 = vector.shape_cast %496 : vector<12x1xf32> to vector<12x1xf32>
    %498 = vector.broadcast %497 : vector<12x1xf32> to vector<12x16xf32>
    %499 = tpu.concatenate %495, %498 in 1 : vector<12x16xf32>, vector<12x16xf32> -> vector<12x32xf32>
    %500 = vector.extract_strided_slice %471 {offsets = [0, 32], sizes = [12, 32], strides = [1, 1]} : vector<12x64xf32> to vector<12x32xf32>
    %501 = arith.mulf %499, %500 : vector<12x32xf32>
    %502 = arith.mulf %488, %491 : vector<12x2xf32>
    %503 = vector.extract_strided_slice %502 {offsets = [0, 0], sizes = [12, 1], strides = [1, 1]} : vector<12x2xf32> to vector<12x1xf32>
    %504 = vector.shape_cast %503 : vector<12x1xf32> to vector<12x1xf32>
    %505 = vector.broadcast %504 : vector<12x1xf32> to vector<12x16xf32>
    %506 = vector.extract_strided_slice %502 {offsets = [0, 1], sizes = [12, 1], strides = [1, 1]} : vector<12x2xf32> to vector<12x1xf32>
    %507 = vector.shape_cast %506 : vector<12x1xf32> to vector<12x1xf32>
    %508 = vector.broadcast %507 : vector<12x1xf32> to vector<12x16xf32>
    %509 = tpu.concatenate %505, %508 in 1 : vector<12x16xf32>, vector<12x16xf32> -> vector<12x32xf32>
    %510 = vector.extract_strided_slice %473 {offsets = [0, 32], sizes = [12, 32], strides = [1, 1]} : vector<12x64xf32> to vector<12x32xf32>
    %511 = arith.mulf %509, %510 : vector<12x32xf32>
    %512 = arith.addf %501, %511 : vector<12x32xf32>
    %c264 = arith.constant 264 : index
    %c0_95 = arith.constant 0 : index
    %513 = vector.load %arg1[%c264, %c0_95] : memref<584x128xf32, #tpu.memory_space<vmem>>, vector<32x32xf32>
    %cst_96 = arith.constant dense<0.000000e+00> : vector<12x32xf32>
    %514 = tpu.matmul %512, %513, %cst_96 {dimension_numbers = #tpu.dot_dimension_numbers<[1], [0], [0], [1], [0, 0, 1, 1], [], []>} : vector<12x32xf32>, vector<32x32xf32>, vector<12x32xf32> -> vector<12x32xf32>
    %c296 = arith.constant 296 : index
    %c0_97 = arith.constant 0 : index
    %515 = vector.load %arg1[%c296, %c0_97] : memref<584x128xf32, #tpu.memory_space<vmem>>, vector<1x32xf32>
    %516 = vector.broadcast %515 : vector<1x32xf32> to vector<12x32xf32>
    %517 = arith.addf %514, %516 : vector<12x32xf32>
    %518 = arith.addf %461, %517 : vector<12x32xf32>
    %c304 = arith.constant 304 : index
    %c0_98 = arith.constant 0 : index
    %519 = vector.load %arg1[%c304, %c0_98] : memref<584x128xf32, #tpu.memory_space<vmem>>, vector<1x32xf32>
    %c312 = arith.constant 312 : index
    %c0_99 = arith.constant 0 : index
    %520 = vector.load %arg1[%c312, %c0_99] : memref<584x128xf32, #tpu.memory_space<vmem>>, vector<1x32xf32>
    %cst_100 = arith.constant dense<0.000000e+00> : vector<12xf32>
    %521 = vector.multi_reduction <add>, %518, %cst_100 [1] : vector<12x32xf32> to vector<12xf32>
    %522 = vector.shape_cast %521 : vector<12xf32> to vector<12x1xf32>
    %cst_101 = arith.constant 3.200000e+01 : f32
    %523 = vector.broadcast %cst_101 : f32 to vector<12x1xf32>
    %524 = arith.divf %522, %523 : vector<12x1xf32>
    %525 = vector.broadcast %524 : vector<12x1xf32> to vector<12x32xf32>
    %526 = arith.subf %518, %525 : vector<12x32xf32>
    %527 = arith.mulf %526, %526 : vector<12x32xf32>
    %cst_102 = arith.constant dense<0.000000e+00> : vector<12xf32>
    %528 = vector.multi_reduction <add>, %527, %cst_102 [1] : vector<12x32xf32> to vector<12xf32>
    %529 = vector.shape_cast %528 : vector<12xf32> to vector<12x1xf32>
    %cst_103 = arith.constant 3.200000e+01 : f32
    %530 = vector.broadcast %cst_103 : f32 to vector<12x1xf32>
    %531 = arith.divf %529, %530 : vector<12x1xf32>
    %532 = vector.broadcast %524 : vector<12x1xf32> to vector<12x32xf32>
    %533 = arith.subf %518, %532 : vector<12x32xf32>
    %cst_104 = arith.constant 9.99999974E-6 : f32
    %534 = vector.broadcast %cst_104 : f32 to vector<12x1xf32>
    %535 = arith.addf %531, %534 : vector<12x1xf32>
    %536 = math.rsqrt %535 : vector<12x1xf32>
    %537 = vector.broadcast %536 : vector<12x1xf32> to vector<12x32xf32>
    %538 = arith.mulf %533, %537 : vector<12x32xf32>
    %539 = vector.broadcast %519 : vector<1x32xf32> to vector<12x32xf32>
    %540 = arith.mulf %538, %539 : vector<12x32xf32>
    %541 = vector.broadcast %520 : vector<1x32xf32> to vector<12x32xf32>
    %542 = arith.addf %540, %541 : vector<12x32xf32>
    %c320 = arith.constant 320 : index
    %c0_105 = arith.constant 0 : index
    %543 = vector.load %arg1[%c320, %c0_105] : memref<584x128xf32, #tpu.memory_space<vmem>>, vector<32x128xf32>
    %cst_106 = arith.constant dense<0.000000e+00> : vector<12x128xf32>
    %544 = tpu.matmul %542, %543, %cst_106 {dimension_numbers = #tpu.dot_dimension_numbers<[1], [0], [0], [1], [0, 0, 1, 1], [], []>} : vector<12x32xf32>, vector<32x128xf32>, vector<12x128xf32> -> vector<12x128xf32>
    %c352 = arith.constant 352 : index
    %c0_107 = arith.constant 0 : index
    %545 = vector.load %arg1[%c352, %c0_107] : memref<584x128xf32, #tpu.memory_space<vmem>>, vector<1x128xf32>
    %546 = vector.broadcast %545 : vector<1x128xf32> to vector<12x128xf32>
    %547 = arith.addf %544, %546 : vector<12x128xf32>
    %cst_108 = arith.constant 0.000000e+00 : f32
    %548 = vector.broadcast %cst_108 : f32 to vector<12x128xf32>
    %549 = arith.maximumf %547, %548 : vector<12x128xf32>
    %c360 = arith.constant 360 : index
    %c0_109 = arith.constant 0 : index
    %550 = vector.load %arg1[%c360, %c0_109] : memref<584x128xf32, #tpu.memory_space<vmem>>, vector<128x32xf32>
    %cst_110 = arith.constant dense<0.000000e+00> : vector<12x32xf32>
    %551 = tpu.matmul %549, %550, %cst_110 {dimension_numbers = #tpu.dot_dimension_numbers<[1], [0], [0], [1], [0, 0, 1, 1], [], []>} : vector<12x128xf32>, vector<128x32xf32>, vector<12x32xf32> -> vector<12x32xf32>
    %552 = arith.addf %542, %551 : vector<12x32xf32>
    %c488 = arith.constant 488 : index
    %c0_111 = arith.constant 0 : index
    %553 = vector.load %arg1[%c488, %c0_111] : memref<584x128xf32, #tpu.memory_space<vmem>>, vector<1x32xf32>
    %554 = vector.broadcast %553 : vector<1x32xf32> to vector<12x32xf32>
    %555 = arith.addf %552, %554 : vector<12x32xf32>
    %c496 = arith.constant 496 : index
    %c0_112 = arith.constant 0 : index
    %556 = vector.load %arg1[%c496, %c0_112] : memref<584x128xf32, #tpu.memory_space<vmem>>, vector<1x32xf32>
    %c504 = arith.constant 504 : index
    %c0_113 = arith.constant 0 : index
    %557 = vector.load %arg1[%c504, %c0_113] : memref<584x128xf32, #tpu.memory_space<vmem>>, vector<1x32xf32>
    %cst_114 = arith.constant dense<0.000000e+00> : vector<12xf32>
    %558 = vector.multi_reduction <add>, %555, %cst_114 [1] : vector<12x32xf32> to vector<12xf32>
    %559 = vector.shape_cast %558 : vector<12xf32> to vector<12x1xf32>
    %cst_115 = arith.constant 3.200000e+01 : f32
    %560 = vector.broadcast %cst_115 : f32 to vector<12x1xf32>
    %561 = arith.divf %559, %560 : vector<12x1xf32>
    %562 = vector.broadcast %561 : vector<12x1xf32> to vector<12x32xf32>
    %563 = arith.subf %555, %562 : vector<12x32xf32>
    %564 = arith.mulf %563, %563 : vector<12x32xf32>
    %cst_116 = arith.constant dense<0.000000e+00> : vector<12xf32>
    %565 = vector.multi_reduction <add>, %564, %cst_116 [1] : vector<12x32xf32> to vector<12xf32>
    %566 = vector.shape_cast %565 : vector<12xf32> to vector<12x1xf32>
    %cst_117 = arith.constant 3.200000e+01 : f32
    %567 = vector.broadcast %cst_117 : f32 to vector<12x1xf32>
    %568 = arith.divf %566, %567 : vector<12x1xf32>
    %569 = vector.broadcast %561 : vector<12x1xf32> to vector<12x32xf32>
    %570 = arith.subf %555, %569 : vector<12x32xf32>
    %cst_118 = arith.constant 9.99999974E-6 : f32
    %571 = vector.broadcast %cst_118 : f32 to vector<12x1xf32>
    %572 = arith.addf %568, %571 : vector<12x1xf32>
    %573 = math.rsqrt %572 : vector<12x1xf32>
    %574 = vector.broadcast %573 : vector<12x1xf32> to vector<12x32xf32>
    %575 = arith.mulf %570, %574 : vector<12x32xf32>
    %576 = vector.broadcast %556 : vector<1x32xf32> to vector<12x32xf32>
    %577 = arith.mulf %575, %576 : vector<12x32xf32>
    %578 = vector.broadcast %557 : vector<1x32xf32> to vector<12x32xf32>
    %579 = arith.addf %577, %578 : vector<12x32xf32>
    %c160 = arith.constant 160 : index
    %c0_119 = arith.constant 0 : index
    %580 = vector.load %arg2[%c160, %c0_119] : memref<168x60xf32, #tpu.memory_space<vmem>>, vector<2x12xf32>
    %cst_120 = arith.constant dense<0.000000e+00> : vector<2x32xf32>
    %581 = tpu.matmul %580, %579, %cst_120 {dimension_numbers = #tpu.dot_dimension_numbers<[1], [0], [0], [1], [0, 0, 1, 1], [], []>} : vector<2x12xf32>, vector<12x32xf32>, vector<2x32xf32> -> vector<2x32xf32>
    %cst_121 = arith.constant 0.166666672 : f32
    %582 = vector.broadcast %cst_121 : f32 to vector<2x32xf32>
    %583 = arith.mulf %581, %582 : vector<2x32xf32>
    %584 = tpu.concatenate %583, %583, %583, %583, %583, %583 in 0 : vector<2x32xf32>, vector<2x32xf32>, vector<2x32xf32>, vector<2x32xf32>, vector<2x32xf32>, vector<2x32xf32> -> vector<12x32xf32>
    %585 = arith.subf %579, %584 : vector<12x32xf32>
    %c160_122 = arith.constant 160 : index
    %c0_123 = arith.constant 0 : index
    %586 = vector.load %arg2[%c160_122, %c0_123] : memref<168x60xf32, #tpu.memory_space<vmem>>, vector<2x12xf32>
    %587 = arith.mulf %585, %585 : vector<12x32xf32>
    %cst_124 = arith.constant dense<0.000000e+00> : vector<2x32xf32>
    %588 = tpu.matmul %586, %587, %cst_124 {dimension_numbers = #tpu.dot_dimension_numbers<[1], [0], [0], [1], [0, 0, 1, 1], [], []>} : vector<2x12xf32>, vector<12x32xf32>, vector<2x32xf32> -> vector<2x32xf32>
    %cst_125 = arith.constant 2.000000e-01 : f32
    %589 = vector.broadcast %cst_125 : f32 to vector<2x32xf32>
    %590 = arith.mulf %588, %589 : vector<2x32xf32>
    %591 = math.sqrt %590 : vector<2x32xf32>
    %c512 = arith.constant 512 : index
    %c0_126 = arith.constant 0 : index
    %592 = vector.load %arg1[%c512, %c0_126] : memref<584x128xf32, #tpu.memory_space<vmem>>, vector<64x4xf32>
    %593 = vector.extract_strided_slice %592 {offsets = [0, 0], sizes = [32, 4], strides = [1, 1]} : vector<64x4xf32> to vector<32x4xf32>
    %cst_127 = arith.constant dense<0.000000e+00> : vector<2x4xf32>
    %594 = tpu.matmul %583, %593, %cst_127 {dimension_numbers = #tpu.dot_dimension_numbers<[1], [0], [0], [1], [0, 0, 1, 1], [], []>} : vector<2x32xf32>, vector<32x4xf32>, vector<2x4xf32> -> vector<2x4xf32>
    %595 = vector.extract_strided_slice %592 {offsets = [32, 0], sizes = [32, 4], strides = [1, 1]} : vector<64x4xf32> to vector<32x4xf32>
    %cst_128 = arith.constant dense<0.000000e+00> : vector<2x4xf32>
    %596 = tpu.matmul %591, %595, %cst_128 {dimension_numbers = #tpu.dot_dimension_numbers<[1], [0], [0], [1], [0, 0, 1, 1], [], []>} : vector<2x32xf32>, vector<32x4xf32>, vector<2x4xf32> -> vector<2x4xf32>
    %597 = arith.addf %594, %596 : vector<2x4xf32>
    %c576 = arith.constant 576 : index
    %c0_129 = arith.constant 0 : index
    %598 = vector.load %arg1[%c576, %c0_129] : memref<584x128xf32, #tpu.memory_space<vmem>>, vector<1x4xf32>
    %599 = vector.broadcast %598 : vector<1x4xf32> to vector<2x4xf32>
    %600 = arith.addf %597, %599 : vector<2x4xf32>
    %c0_130 = arith.constant 0 : index
    %c0_131 = arith.constant 0 : index
    %601 = vector.load %arg3[%c0_130, %c0_131] : memref<2x4xf32, #tpu.memory_space<vmem>>, vector<2x4xf32>
    tpu.vector_store %arg3[%c0_130, %c0_131], %600 {strides = array<i32>} : memref<2x4xf32, #tpu.memory_space<vmem>>, vector<2x4xf32>,
    return
  }
}

</mosaic_0001>

<bundles_post_ra>
// kernel: forward.1
= control target key start
LH: loop header
LB: loop body
LE: loop exit
PB: predicated region body
PF: predicated region fallthrough
CT: control target
= control target key end

     0   :  { %8 = vsyncpa [#allocation3], 0  ;;  %s5402_s0 = inlined_call_operand.vmem [shape: f32[2,32,8], index: 0, kind: input, shape index: {}]   ;;  %s5403_s1 = inlined_call_operand.hbm [shape: f32[584,128], index: 1, kind: input, shape index: {}]   ;;  %s5404_s2 = inlined_call_operand.hbm [shape: f32[168,60], index: 2, kind: input, shape index: {}]   ;;  %s5405_s3 = inlined_call_operand.hbm [shape: f32[2,4], index: 3, kind: output, shape index: {}]  }
   0x1   :  { %9 = vsyncpa [#allocation6], 0 }
   0x2   :  { %10 = vsyncpa [#allocation4], 0  ;;  %s4825_s12 = smov [#allocation2]   ;;  %s4753_s16 = scalar_lea.hbm %s5403_s1, 9344 }
   0x3   :  { %s18_s13 = sshll.u32 %s4825_s12, 4  ;;  %p4754_p0 = scmp.ne.s32.totalorder %s5403_s1, %s4753_s16  ;;  %s19_s13 = int_to_ptr.vmem [resolvable:$true] %s18_s13 }
   0x4   :  { %p4757_p1 = scmp.lt.u32.totalorder %s4753_s16, %s5403_s1 }
   0x6   :  { %p4759_p2 = pnand %p4757_p1, %p4754_p0 }
   0x8   :  { %4762 = shalt.err (!%p4759_p2)
}
   0x9   :  { %s4763_s21 = scalar_lea.vmem %s19_s13, 9344  ;;  %p4768_p4 = scmp.lt.s32.totalorder %s19_s13, %s19_s13 }
   0xa   :  { %p4764_p3 = scmp.ne.s32.totalorder %s19_s13, %s4763_s21  ;;  %p4769_p5 = scmp.lt.s32.totalorder %s4763_s21, %s4763_s21 }
   0xc   :  { %p4770_p6 = por %p4769_p5, %p4768_p4 }
   0xe   :  { %p4771_p7 = pnand %p4770_p6, %p4764_p3 }
  0x10   :  { %4774 = shalt.err (!%p4771_p7)
}
  0x11   :  { %s4826_s22 = smov 128   ;;  %s4827_s23 = smov 8  }
  0x12   :  { %24 = dma.hbm_to_vmem [thread:$0]  %s5403_s1, 9344, %s19_s13, [#allocation3], %s4826_s22, %s4826_s22, %s4827_s23  }
  0x13   :  { %s4828_s26 = smov [#allocation5]   ;;  %s4775_s30 = scalar_lea.hbm %s5404_s2, 2688 }
  0x14   :  { %s30_s27 = sshll.u32 %s4828_s26, 4  ;;  %p4776_p8 = scmp.ne.s32.totalorder %s5404_s2, %s4775_s30  ;;  %s31_s27 = int_to_ptr.vmem [resolvable:$true] %s30_s27 }
  0x15   :  { %p4779_p9 = scmp.lt.u32.totalorder %s4775_s30, %s5404_s2 }
  0x17   :  { %p4781_p10 = pnand %p4779_p9, %p4776_p8 }
  0x19   :  { %4784 = shalt.err (!%p4781_p10)
}
  0x1a   :  { %s4785_s8 = scalar_lea.vmem %s31_s27, 2688  ;;  %p4790_p12 = scmp.lt.s32.totalorder %s31_s27, %s31_s27 }
  0x1b   :  { %p4786_p11 = scmp.ne.s32.totalorder %s31_s27, %s4785_s8  ;;  %p4791_p13 = scmp.lt.s32.totalorder %s4785_s8, %s4785_s8 }
  0x1d   :  { %p4792_p0 = por %p4791_p13, %p4790_p12 }
  0x1f   :  { %p4793_p1 = pnand %p4792_p0, %p4786_p11 }
  0x21   :  { %4796 = shalt.err (!%p4793_p1)
}
  0x22   :  { %36 = dma.hbm_to_vmem [thread:$0]  %s5404_s2, 2688, %s31_s27, [#allocation6], %s4826_s22, %s4826_s22, %s4827_s23  }
  0x23   :  { %4819 = dma.done.wait [#allocation3], 9344  }
  0x24   :  { %4820 = vsyncadd [#allocation3], 4294957952 }
  0x25   :  { %4821 = dma.done.wait [#allocation6], 2688  }
  0x26   :  { %4822 = vsyncadd [#allocation6], 4294964608  ;;  %v4889_v0 = vld [vmem:[%s5402_s0] sm:$0xff]  ;;  %v4894_v1 = vld [vmem:[%s5402_s0 + $0x8] sm:$0xff]  ;;  %vm75_vm0 = vcmask 1045504   ;;  %vm55_vm1 = vcmask 1046528  }
  0x27   :  { %v4899_v2 = vld [vmem:[%s5402_s0 + $0x10] sm:$0xff]  ;;  %v76_v3 = vrot.slane %v4889_v0, 2  ;;  %v77_v4 = vrot.slane %v4894_v1, 2  ;;  %v56_v5 = vrot.slane %v4889_v0, 1  ;;  %v57_v6 = vrot.slane %v4894_v1, 1  ;;  %v4908_v7 = vld [vmem:[%s5402_s0 + $0x20] sm:$0xff] }
  0x28   :  { %v4913_v8 = vld [vmem:[%s5402_s0 + $0x28] sm:$0xff]  ;;  %v79_v9 = vrot.slane %v4899_v2, 2  ;;  %v59_v10 = vrot.slane %v4899_v2, 1  ;;  %v168_v13 = vld [vmem:[#allocation2] sm:$0xff]  ;;  %s4829_s19 = smov 16   ;;  %v128_v15 = vrot.slane %v4908_v7, 2 }
  0x29   :  { %v78_v11 = vsel %vm75_vm0, %v76_v3, %v77_v4  ;;  %v58_v12 = vsel %vm55_vm1, %v56_v5, %v57_v6  ;;  %v169_v14 = vld [vmem:[#allocation2 + $0x8] sm:$0xff]  ;;  %v129_v16 = vrot.slane %v4913_v8, 2  ;;  %v109_v19 = vrot.slane %v4908_v7, 1  ;;  %v46_v21 = vld [vmem:[%s5402_s0 + $0x18] sm:$0xff]  ;;  %v170_v23 = vld [vmem:[#allocation2 + $0x10] sm:$0xff]  ;;  %s4836_s27 = smov 96  }
  0x2a   :  { %83 = vrot.lane.b32.xlu1 %v78_v11, %s4829_s19  ;;  %63 = vrot.lane.b32.xlu0 %v58_v12, %s4827_s23  ;;  %v80_v17 = vsel %vm75_vm0, %v77_v4, %v79_v9  ;;  %v60_v18 = vsel %vm55_vm1, %v57_v6, %v59_v10  ;;  %v110_v20 = vrot.slane %v4913_v8, 1  ;;  %v4350_v22 = vpack.c.bf16 %v169_v14, %v168_v13  ;;  %v49_v29 = vld [vmem:[%s5402_s0 + $0x30] sm:$0xff]  ;;  %v4943_v30 = vld [vmem:[%s5402_s0 + $0x38] sm:$0xff]  ;;  %s4831_s0 = smov 32   ;;  %s4839_s28 = smov [#allocation7]  }
  0x2b   :  { %v130_v24 = vsel %vm75_vm0, %v128_v15, %v129_v16  ;;  %v61_v26 = vrot.slane %v46_v21, 1  ;;  %v81_v28 = vrot.slane %v46_v21, 2  ;;  %v112_v32 = vrot.slane %v49_v29, 1  ;;  %s3659_s29 = sshll.u32 %s4839_s28, 4  ;;  %s3660_s29 = int_to_ptr.vmem [resolvable:$true] %s3659_s29 }
  0x2c   :  { %v111_v25 = vsel %vm55_vm1, %v109_v19, %v110_v20  ;;  %4351 = vmatprep.subr.bf16.mxu0 %v4350_v22  ;;  %v114_v33 = vrot.slane %v4943_v30, 1  ;;  %v131_v36 = vrot.slane %v49_v29, 2  ;;  %v133_v37 = vrot.slane %v4943_v30, 2  ;;  %s4797_s30 = scalar_lea.vmem %s3660_s29, 32  ;;  %p4802_p3 = scmp.lt.s32.totalorder %s3660_s29, %s3660_s29 }
  0x2d   :  { %4353 = vmatpush3.bf16.msra.mxu0 %v4350_v22  ;;  %v62_v27 = vsel %vm55_vm1, %v59_v10, %v61_v26  ;;  %v82_v31 = vsel %vm75_vm0, %v79_v9, %v81_v28  ;;  %v113_v35 = vsel %vm55_vm1, %v110_v20, %v112_v32  ;;  %vm95_vm2 = vcmask 64512   ;;  %p4798_p2 = scmp.ne.s32.totalorder %s3660_s29, %s4797_s30  ;;  %p4803_p4 = scmp.lt.s32.totalorder %s4797_s30, %s4797_s30 }
  0x2e   :  { %85 = vrot.lane.b32.xlu1 %v80_v17, %s4829_s19  ;;  %65 = vrot.lane.b32.xlu0 %v60_v18, %s4827_s23  ;;  %v115_v34 = vsel %vm55_vm1, %v112_v32, %v114_v33  ;;  %v134_v38 = vsel %vm75_vm0, %v131_v36, %v133_v37  ;;  %v132_v39 = vsel %vm75_vm0, %v129_v16, %v131_v36  ;;  %vm100_vm3 = vcmask 130048   ;;  %v302_v16 = vld [vmem:[#allocation5] sm:$0xff]  ;;  %v3669_v18 = vld [vmem:[#allocation2 + $0x18] ss:$0 sm:$0xff] }
  0x2f   :  { %3962 = vmatprep.subr.mxu0 %v170_v23  ;;  %vm176_vm4 = vcmask 195584   ;;  %vm306_vm5 = vcmask 490496   ;;  %v408_v17 = vld [vmem:[#allocation5 + $0x20] sm:$0xff]  ;;  %vm319_vm6 = vcmask 1043456   ;;  %vm4830_vm7 = vmmov 1   ;;  %p4804_p5 = por %p4803_p4, %p4802_p3 }
  0x30   :  { %3992 = vmatprep.mubr.msk.f32.mxu1 %vm306_vm5, %v302_v16  ;;  %vm5000_vm8 = vmpackc.low %vm319_vm6, %vm4830_vm7  ;;  %vm596_vm9 = vcmask 392192   ;;  %vm539_vm10 = vcmask 261120   ;;  %vm583_vm11 = vcmask 1044480   ;;  %vm694_vm12 = vcmask 211968  }
  0x31   :  { %3963 = vmatpush3.msra.mxu0 %v170_v23  ;;  %vm701_vm13 = vcmask 1041408   ;;  %vm4833_vm15 = vmmov 0   ;;  %p4805_p6 = pnand %p4804_p5, %p4798_p2 }
  0x32   :  { %135 = vrot.lane.b32.xlu1 %v130_v24, %s4829_s19  ;;  %116 = vrot.lane.b32.xlu0 %v111_v25, %s4827_s23  ;;  %vm4407_vm14 = vmpackc.low %vm701_vm13, %vm4830_vm7 }
  0x36   :  { %69 = vrot.lane.b32.xlu1 %v61_v26, %s4827_s23  ;;  %67 = vrot.lane.b32.xlu0 %v62_v27, %s4827_s23 }
  0x3a   :  { %89 = vrot.lane.b32.xlu1 %v81_v28, %s4829_s19  ;;  %87 = vrot.lane.b32.xlu0 %v82_v31, %s4829_s19 }
  0x3e   :  { %120 = vrot.lane.b32.xlu1 %v115_v34, %s4827_s23  ;;  %118 = vrot.lane.b32.xlu0 %v113_v35, %s4827_s23 }
  0x42   :  { %139 = vrot.lane.b32.xlu1 %v134_v38, %s4829_s19  ;;  %137 = vrot.lane.b32.xlu0 %v132_v39, %s4829_s19 }
  0x46   :  { %122 = vrot.lane.b32.xlu0 %v114_v33, %s4827_s23  ;;  %141 = vrot.lane.b32.xlu1 %v133_v37, %s4829_s19  ;;  %s4835_s23 = smov 64  }
  0x9c   :  { %v84_v40 = vpop.permute.xlu1 %83  ;;  %v64_v41 = vpop.permute.xlu0 %63 }
  0x9d   :  { %v96_v42 = vsel %vm95_vm2, %v4889_v0, %v64_v41  ;;  %v409_v41 = vld [vmem:[#allocation5 + $0x28] sm:$0xff] }
  0x9e   :  { %v101_v43 = vsel %vm100_vm3, %v96_v42, %v84_v40  ;;  %v303_v40 = vld [vmem:[#allocation5 + $0x8] sm:$0xff]  ;;  %v304_v42 = vld [vmem:[#allocation5 + $0x10] sm:$0xff] }
  0x9f   :  { %3964 = vmatprep.mubr.msk.f32.mxu0 %vm176_vm4, %v101_v43  ;;  %v410_v43 = vld [vmem:[#allocation5 + $0x30] sm:$0xff] }
  0xa0   :  { %v86_v44 = vpop.permute.xlu1 %85  ;;  %v66_v45 = vpop.permute.xlu0 %65 }
  0xa1   :  { %v97_v46 = vsel %vm95_vm2, %v4894_v1, %v66_v45  ;;  %v411_v45 = vld [vmem:[#allocation5 + $0x38] sm:$0x3f] }
  0xa2   :  { %v102_v47 = vsel %vm100_vm3, %v97_v46, %v86_v44  ;;  %v305_v44 = vld [vmem:[#allocation5 + $0x18] sm:$0x3f] }
  0xa3   :  { %3965 = vmatmul.mubr.msk.f32.vlgmr.msra.gmra.mrb[0].mxu0 %vm176_vm4, %v102_v47  ;;  %v585_v46 = vld [vmem:[#allocation2 + $0x20] sm:$0xff]  ;;  %v586_v47 = vld [vmem:[#allocation2 + $0x28] sm:$0xff] }
  0xa4   :  { %v136_v48 = vpop.permute.xlu1 %135  ;;  %v117_v49 = vpop.permute.xlu0 %116 }
  0xa5   :  { %v147_v50 = vsel %vm95_vm2, %v4908_v7, %v117_v49 }
  0xa6   :  { %v151_v53 = vsel %vm100_vm3, %v147_v50, %v136_v48  ;;  %v4390_v48 = vpack.c.bf16 %v586_v47, %v585_v46  ;;  %v692_v46 = vld [vmem:[#allocation5 + $0x40] sm:$0xff]  ;;  %v780_v47 = vld [vmem:[#allocation5 + $0x50] sm:$0xff] }
  0xa7   :  { %v159_v54 = vrot.slane %v151_v53, 2 }
  0xa8   :  { %v70_v51 = vpop.permute.xlu1 %69  ;;  %v68_v52 = vpop.permute.xlu0 %67 }
  0xa9   :  { %v99_v55 = vsel %vm95_vm2, %v46_v21, %v70_v51  ;;  %v98_v56 = vsel %vm95_vm2, %v4899_v2, %v68_v52 }
  0xac   :  { %v90_v57 = vpop.permute.xlu1 %89  ;;  %v88_v58 = vpop.permute.xlu0 %87 }
  0xad   :  { %v104_v59 = vsel %vm100_vm3, %v99_v55, %v90_v57  ;;  %v103_v60 = vsel %vm100_vm3, %v98_v56, %v88_v58  ;;  %v587_v55 = vld [vmem:[#allocation2 + $0x30] sm:$0xff]  ;;  %v588_v56 = vld [vmem:[#allocation2 + $0x38] sm:$0xff] }
  0xae   :  { %3967 = vmatprep.mubr.msk.f32.mxu0 %vm176_vm4, %v103_v60  ;;  %v167_v61 = vsel %vm75_vm0, %v104_v59, %v159_v54  ;;  %v4394_v58 = vpack.c.bf16 %v588_v56, %v587_v55 }
  0xaf   :  { %3968 = vmatmul.mubr.msk.f32.gmra.mrb[2].mxu0 %vm176_vm4, %v167_v61 }
  0xb0   :  { %v121_v62 = vpop.permute.xlu1 %120  ;;  %v119_v63 = vpop.permute.xlu0 %118 }
  0xb1   :  { %v149_v0 = vsel %vm95_vm2, %v49_v29, %v121_v62  ;;  %v148_v1 = vsel %vm95_vm2, %v4913_v8, %v119_v63 }
  0xb4   :  { %v140_v2 = vpop.permute.xlu1 %139  ;;  %v138_v3 = vpop.permute.xlu0 %137 }
  0xb5   :  { %v153_v4 = vsel %vm100_vm3, %v149_v0, %v140_v2  ;;  %v152_v5 = vsel %vm100_vm3, %v148_v1, %v138_v3 }
  0xb6   :  { %v162_v6 = vrot.slane %v153_v4, 2  ;;  %v160_v7 = vrot.slane %v152_v5, 2  ;;  %v589_v4 = vld [vmem:[#allocation2 + $0x40] sm:$0xff]  ;;  %v590_v5 = vld [vmem:[#allocation2 + $0x48] sm:$0xff] }
  0xb8   :  { %v123_v9 = vpop.permute.xlu0 %122  ;;  %v142_v10 = vpop.permute.xlu1 %141  ;;  %v161_v11 = vsel %vm75_vm0, %v159_v54, %v160_v7  ;;  %v163_v12 = vsel %vm75_vm0, %v160_v7, %v162_v6  ;;  %v4398_v7 = vpack.c.bf16 %v590_v5, %v589_v4  ;;  %v967_v4 = vld [vmem:[#allocation2 + $0x80] sm:$0xff]  ;;  %v4832_v5 = vmov 0.0|0.0  }
  0xb9   :  { %v150_v13 = vsel %vm95_vm2, %v4943_v30, %v123_v9  ;;  %3970 = vmatprep.mubr.msk.f32.mxu0 %vm176_vm4, %v161_v11  ;;  %vm3050_vm2 = vcmask 257024  }
  0xba   :  { %v154_v8 = vsel %vm100_vm3, %v150_v13, %v142_v10  ;;  %3971 = vmatmul.mubr.msk.f32.gmra.mrb[4].mxu0 %vm176_vm4, %v163_v12 }
  0xbb   :  { %v164_v14 = vrot.slane %v154_v8, 2 }
  0xbd   :  { %v165_v15 = vsel %vm75_vm0, %v162_v6, %v164_v14 }
  0xbe   :  { %3973 = vmatprep.mubr.msk.f32.mxu0 %vm176_vm4, %v165_v15 }
  0xbf   :  { %3974 = vmatmul.mubr.msk.f32.gmra.mrb[6].mxu0 %vm176_vm4, %v164_v14  ;;  %vm3651_vm4 = vcmask 25600  }
  0xc0   :  { %4014 = vmatprep.mubr.msk.f32.mxu0 %vm306_vm5, %v408_v17 }
 0x176   :  { %v3966_v19 = vpop.f32.mrb[0].mxu0 }
 0x177   :  { %v269_v20 = vadd.f32 %v3966_v19, %v3669_v18  ;;  %v263_v21 = vpop.f32.mrb[1].mxu0 }
 0x178   :  { %v264_v22 = vadd.f32 %v3669_v18, %v263_v21 }
 0x17a   :  { %v4354_v23 = vpack.c.bf16 %v269_v20, %v264_v22 }
 0x17c   :  { %4355 = vmatprep.subr.bf16.mxu1 %v4354_v23  ;;  %4373 = vmatprep.subr.bf16.mxu0 %v4354_v23 }
 0x17d   :  { %4357 = vmatpush3.bf16.msra.mxu1 %v4354_v23  ;;  %4375 = vmatpush3.bf16.msra.mxu0 %v4354_v23 }
 0x182   :  { %v3969_v24 = vpop.f32.mrb[2].mxu0 }
 0x183   :  { %v279_v25 = vadd.f32 %v3969_v24, %v3669_v18  ;;  %v273_v26 = vpop.f32.mrb[3].mxu0 }
 0x184   :  { %v274_v27 = vadd.f32 %v3669_v18, %v273_v26 }
 0x186   :  { %v4358_v28 = vpack.c.bf16 %v279_v25, %v274_v27 }
 0x188   :  { %4359 = vmatprep.subr.bf16.mxu1 %v4358_v28  ;;  %4377 = vmatprep.subr.bf16.mxu0 %v4358_v28 }
 0x189   :  { %4361 = vmatpush3.bf16.msra.mxu1 %v4358_v28  ;;  %4379 = vmatpush3.bf16.msra.mxu0 %v4358_v28 }
 0x18d   :  { %v3972_v29 = vpop.f32.mrb[4].mxu0 }
 0x18e   :  { %v289_v30 = vadd.f32 %v3972_v29, %v3669_v18  ;;  %v283_v31 = vpop.f32.mrb[5].mxu0 }
 0x18f   :  { %v284_v32 = vadd.f32 %v3669_v18, %v283_v31 }
 0x191   :  { %v4362_v33 = vpack.c.bf16 %v289_v30, %v284_v32 }
 0x192   :  { %v3975_v34 = vpop.f32.mrb[6].mxu0 }
 0x193   :  { %v299_v35 = vadd.f32 %v3975_v34, %v3669_v18  ;;  %v293_v36 = vpop.f32.mrb[7].mxu0  ;;  %4363 = vmatprep.subr.bf16.mxu1 %v4362_v33  ;;  %4381 = vmatprep.subr.bf16.mxu0 %v4362_v33 }
 0x194   :  { %v294_v37 = vadd.f32 %v3669_v18, %v293_v36  ;;  %4365 = vmatpush3.bf16.msra.mxu1 %v4362_v33  ;;  %4383 = vmatpush3.bf16.msra.mxu0 %v4362_v33 }
 0x196   :  { %v4366_v39 = vpack.c.bf16 %v299_v35, %v294_v37 }
 0x198   :  { %4368 = vmatprep.subr.msk.bf16.mxu1 %vm5000_vm8, %v4366_v39  ;;  %4386 = vmatprep.subr.msk.bf16.mxu0 %vm5000_vm8, %v4366_v39 }
 0x199   :  { %4371 = vmatpush3.bf16.msk.msra.mxu1 %vm5000_vm8, %v4366_v39  ;;  %4389 = vmatpush3.bf16.msk.msra.mxu0 %vm5000_vm8, %v4366_v39 }
 0x19a   :  { %4391 = vmatprep.subr.bf16.mxu1 %v4390_v48 }
 0x19c   :  { %3993 = vmatmul.mubr.msk.f32.vlgmr.msra.gmra.mrb[0].mxu1 %vm306_vm5, %v303_v40  ;;  %4015 = vmatmul.mubr.msk.f32.vlgmr.msra.gmra.mrb[8].mxu0 %vm306_vm5, %v409_v41 }
 0x19d   :  { %3995 = vmatprep.mubr.msk.f32.mxu1 %vm306_vm5, %v304_v42  ;;  %4017 = vmatprep.mubr.msk.f32.mxu0 %vm306_vm5, %v410_v43 }
 0x19e   :  { %4393 = vmatpush3.bf16.msra.mxu1 %v4390_v48  ;;  %v3688_v48 = vld [vmem:[#allocation2 + $0x50] ss:$0 sm:$0xff] }
 0x19f   :  { %4395 = vmatprep.subr.bf16.mxu1 %v4394_v58 }
 0x1a0   :  { %3996 = vmatmul.mubr.msk.f32.gmra.mrb[2].mxu1 %vm306_vm5, %v305_v44  ;;  %4018 = vmatmul.mubr.msk.f32.gmra.mrb[10].mxu0 %vm306_vm5, %v411_v45 }
 0x1a1   :  { %4046 = vmatprep.mubr.msk.f32.mxu0 %vm694_vm12, %v692_v46 }
 0x1a2   :  { %4397 = vmatpush3.bf16.msra.mxu1 %v4394_v58 }
 0x1a3   :  { %4399 = vmatprep.subr.bf16.mxu1 %v4398_v7 }
 0x1a6   :  { %4401 = vmatpush3.bf16.msra.mxu1 %v4398_v7 }
 0x26f   :  { %v3994_v49 = vpop.f32.mrb[0].mxu1  ;;  %v4016_v50 = vpop.f32.mrb[8].mxu0 }
 0x270   :  { %v510_v51 = vmax.f32 %v3994_v49, %v4016_v50  ;;  %v389_v52 = vpop.f32.mrb[1].mxu1  ;;  %v490_v53 = vpop.f32.mrb[9].mxu0 }
 0x271   :  { %v509_v54 = vmax.f32 %v389_v52, %v490_v53 }
 0x272   :  { %v514_v57 = vmax.f32 %v510_v51, 0.0 }
 0x273   :  { %v513_v59 = vmax.f32 %v509_v54, 0.0  ;;  %v3997_v60 = vpop.f32.mrb[2].mxu1  ;;  %v4019_v61 = vpop.f32.mrb[10].mxu0 }
 0x274   :  { %v512_v62 = vmax.f32 %v3997_v60, %v4019_v61  ;;  %v500_v63 = vpop.f32.mrb[11].mxu0  ;;  %v520_v0 = vrot.slane %v514_v57, 1  ;;  %v399_v1 = vpop.f32.mrb[3].mxu1  ;;  %v529_v12 = vrot.slane %v514_v57, 2  ;;  %v781_v60 = vld [vmem:[#allocation5 + $0x58] sm:$0xf] }
 0x275   :  { %v519_v2 = vrot.slane %v513_v59, 1  ;;  %v511_v3 = vmax.f32 %v399_v1, %v500_v63  ;;  %v528_v9 = vrot.slane %v513_v59, 2  ;;  %v868_v61 = vld [vmem:[#allocation2 + $0x58] sm:$0xff]  ;;  %v965_v1 = vld [vmem:[#allocation2 + $0x70] sm:$0xff] }
 0x276   :  { %v516_v6 = vmax.f32 %v512_v62, 0.0  ;;  %524 = vrot.lane.b32.xlu1 %v520_v0, %s4829_s19  ;;  %v869_v62 = vld [vmem:[#allocation2 + $0x60] sm:$0xff] }
 0x277   :  { %v515_v10 = vmax.f32 %v511_v3, 0.0  ;;  %v521_v11 = vsel %vm55_vm1, %v519_v2, %v520_v0  ;;  %v530_v14 = vsel %vm75_vm0, %v528_v9, %v529_v12  ;;  %v4422_v63 = vpack.c.bf16 %v869_v62, %v868_v61  ;;  %v964_v0 = vld [vmem:[#allocation2 + $0x68] sm:$0xff]  ;;  %v966_v3 = vld [vmem:[#allocation2 + $0x78] sm:$0xff] }
 0x278   :  { %v545_v13 = vrot.slane %v516_v6, 1  ;;  %522 = vrot.lane.b32.xlu0 %v521_v11, %s4829_s19  ;;  %v557_v16 = vrot.slane %v516_v6, 2  ;;  %v5054_v2 = vpack.c.bf16 %v965_v1, %v964_v0  ;;  %v5060_v7 = vpack.c.bf16 %v967_v4, %v966_v3 }
 0x279   :  { %v544_v8 = vrot.slane %v515_v10, 1  ;;  %v556_v17 = vrot.slane %v515_v10, 2 }
 0x27a   :  { %533 = vrot.lane.b32.xlu1 %v529_v12, %s4831_s0 }
 0x27b   :  { %v546_v15 = vsel %vm55_vm1, %v544_v8, %v545_v13  ;;  %v558_v18 = vsel %vm75_vm0, %v556_v17, %v557_v16  ;;  %vm2530_vm1 = vcmask 97280  }
 0x27c   :  { %531 = vrot.lane.b32.xlu0 %v530_v14, %s4831_s0 }
 0x27e   :  { %549 = vrot.lane.b32.xlu1 %v546_v15, %s4829_s19 }
 0x280   :  { %547 = vrot.lane.b32.xlu0 %v544_v8, %s4829_s19 }
 0x282   :  { %561 = vrot.lane.b32.xlu1 %v558_v18, %s4831_s0  ;;  %v3699_v18 = vld [vmem:[#allocation2 + $0x88] ss:$0 sm:$0xff] }
 0x284   :  { %559 = vrot.lane.b32.xlu0 %v556_v17, %s4831_s0 }
 0x286   :  { %563 = vrot.lane.b32.xlu1 %v557_v16, %s4831_s0 }
 0x288   :  { %551 = vrot.lane.b32.xlu0 %v545_v13, %s4829_s19 }
 0x2e8   :  { %v525_v19 = vpop.permute.xlu1 %524 }
 0x2e9   :  { %v538_v35 = vsel %vm100_vm3, %v514_v57, %v525_v19  ;;  %v5081_v19 = vld [vmem:[#allocation2 + $0xd8] ss:$0 sm:$0xff] }
 0x2ea   :  { %v523_v20 = vpop.permute.xlu0 %522 }
 0x2eb   :  { %v537_v22 = vsel %vm100_vm3, %v513_v59, %v523_v20  ;;  %v693_v59 = vld [vmem:[#allocation5 + $0x48] sm:$0xf] }
 0x2ec   :  { %v534_v21 = vpop.permute.xlu1 %533 }
 0x2ed   :  { %v541_v36 = vsel %vm539_vm10, %v538_v35, %v534_v21 }
 0x2ee   :  { %v532_v23 = vpop.permute.xlu0 %531 }
 0x2ef   :  { %v540_v24 = vsel %vm539_vm10, %v537_v22, %v532_v23 }
 0x2f0   :  { %4032 = vmatprep.mubr.msk.f32.mxu1 %vm596_vm9, %v540_v24  ;;  %v550_v25 = vpop.permute.xlu1 %549 }
 0x2f1   :  { %v569_v27 = vsel %vm100_vm3, %v515_v10, %v550_v25 }
 0x2f2   :  { %v548_v26 = vpop.permute.xlu0 %547 }
 0x2f3   :  { %v568_v30 = vsel %vm100_vm3, %v514_v57, %v548_v26 }
 0x2f4   :  { %v562_v28 = vpop.permute.xlu1 %561 }
 0x2f5   :  { %v572_v29 = vsel %vm539_vm10, %v569_v27, %v562_v28 }
 0x2f6   :  { %v560_v31 = vpop.permute.xlu0 %559  ;;  %v578_v33 = vrot.slane %v572_v29, 2 }
 0x2f7   :  { %v571_v32 = vsel %vm539_vm10, %v568_v30, %v560_v31 }
 0x2f8   :  { %v577_v34 = vrot.slane %v571_v32, 2  ;;  %v564_v40 = vpop.permute.xlu1 %563 }
 0x2fa   :  { %v579_v37 = vsel %vm75_vm0, %v577_v34, %v578_v33  ;;  %v552_v39 = vpop.permute.xlu0 %551 }
 0x2fb   :  { %v570_v41 = vsel %vm100_vm3, %v516_v6, %v552_v39  ;;  %v584_v42 = vsel %vm583_vm11, %v541_v36, %v579_v37  ;;  %v4834_v6 = vmov 0.0  }
 0x2fc   :  { %v573_v43 = vsel %vm539_vm10, %v570_v41, %v564_v40  ;;  %4033 = vmatmul.mubr.msk.f32.vlgmr.msra.gmra.mrb[4].mxu1 %vm596_vm9, %v584_v42 }
 0x2fd   :  { %v580_v44 = vrot.slane %v573_v43, 2 }
 0x2ff   :  { %v581_v45 = vsel %vm75_vm0, %v578_v33, %v580_v44 }
 0x300   :  { %4035 = vmatprep.mubr.msk.f32.mxu1 %vm596_vm9, %v581_v45 }
 0x301   :  { %4036 = vmatmul.mubr.msk.f32.gmra.mrb[6].mxu1 %vm596_vm9, %v580_v44 }
 0x302   :  { %4057 = vmatprep.mubr.msk.f32.mxu1 %vm694_vm12, %v780_v47 }
 0x3cf   :  { %v4034_v49 = vpop.f32.mrb[4].mxu1 }
 0x3d0   :  { %v679_v50 = vadd.f32 %v4034_v49, %v3688_v48  ;;  %v673_v51 = vpop.f32.mrb[5].mxu1 }
 0x3d1   :  { %v674_v52 = vadd.f32 %v3688_v48, %v673_v51 }
 0x3d3   :  { %v4402_v53 = vpack.c.bf16 %v679_v50, %v674_v52 }
 0x3d4   :  { %v4037_v54 = vpop.f32.mrb[6].mxu1 }
 0x3d5   :  { %v689_v55 = vadd.f32 %v4037_v54, %v3688_v48  ;;  %v683_v56 = vpop.f32.mrb[7].mxu1  ;;  %4403 = vmatprep.subr.bf16.mxu0 %v4402_v53  ;;  %4413 = vmatprep.subr.bf16.mxu1 %v4402_v53 }
 0x3d6   :  { %v684_v57 = vadd.f32 %v3688_v48, %v683_v56  ;;  %4405 = vmatpush3.bf16.msra.mxu0 %v4402_v53  ;;  %4415 = vmatpush3.bf16.msra.mxu1 %v4402_v53 }
 0x3d8   :  { %v4406_v58 = vpack.c.bf16 %v689_v55, %v684_v57 }
 0x3da   :  { %4408 = vmatprep.subr.msk.bf16.mxu0 %vm4407_vm14, %v4406_v58  ;;  %4418 = vmatprep.subr.msk.bf16.mxu1 %vm4407_vm14, %v4406_v58 }
 0x3db   :  { %4411 = vmatpush3.bf16.msk.msra.mxu0 %vm4407_vm14, %v4406_v58  ;;  %4421 = vmatpush3.bf16.msk.msra.mxu1 %vm4407_vm14, %v4406_v58 }
 0x3dc   :  { %4423 = vmatprep.subr.bf16.mxu1 %v4422_v63  ;;  %4426 = vmatprep.subr.bf16.mxu0 %v4832_v5 }
 0x3de   :  { %4047 = vmatmul.mubr.msk.f32.vlgmr.msra.gmra.mrb[12].mxu0 %vm694_vm12, %v693_v59  ;;  %4058 = vmatmul.mubr.msk.f32.vlgmr.msra.gmra.mrb[8].mxu1 %vm694_vm12, %v781_v60 }
 0x3df   :  { %4425 = vmatpush3.bf16.msra.mxu1 %v4422_v63  ;;  %4075 = vmatprep.mubr.msk.f32.mxu0 %vm4833_vm15, %v4834_v6 }
 0x3e0   :  { %4428 = vmatpush3.bf16.msra.mxu0 %v5054_v2  ;;  %4432 = vmatprep.subr.bf16.mxu1 %v4832_v5 }
 0x3e1   :  { %4429 = vmatprep.subr.bf16.mxu0 %v4832_v5 }
 0x3e4   :  { %4431 = vmatpush3.bf16.msra.mxu0 %v5060_v7 }
 0x3e5   :  { %4438 = vmatprep.subr.bf16.mxu0 %v4832_v5 }
 0x3e7   :  { %4076 = vmatmul.mubr.f32.vlgmr.msra.gmra.mrb[14].mxu0 %v4834_v6 }
 0x3e8   :  { %4440 = vmatpush3.bf16.msra.mxu0 %v5054_v2  ;;  %4097 = vmatprep.mubr.msk.f32.mxu0 %vm4833_vm15, %v4834_v6 }
 0x3e9   :  { %4441 = vmatprep.subr.bf16.mxu0 %v4832_v5 }
 0x3ec   :  { %4443 = vmatpush3.bf16.msra.mxu0 %v5060_v7 }
 0x3ed   :  { %4450 = vmatprep.subr.bf16.mxu0 %v4832_v5 }
 0x4b1   :  { %v4048_v9 = vpop.f32.mrb[12].mxu0  ;;  %v4059_v10 = vpop.f32.mrb[8].mxu1 }
 0x4b2   :  { %v864_v11 = vmax.f32 %v4048_v9, %v4059_v10  ;;  %v771_v12 = vpop.f32.mrb[13].mxu0  ;;  %v854_v13 = vpop.f32.mrb[9].mxu1 }
 0x4b3   :  { %v863_v8 = vmax.f32 %v771_v12, %v854_v13 }
 0x4b4   :  { %v866_v15 = vmax.f32 %v864_v11, 0.0 }
 0x4b5   :  { %v865_v14 = vmax.f32 %v863_v8, 0.0 }
 0x4b7   :  { %4064 = vmatprep.mubr.msk.f32.mxu1 %vm100_vm3, %v865_v14 }
 0x4b8   :  { %4065 = vmatmul.mubr.msk.f32.vlgmr.msra.gmra.mrb[10].mxu1 %vm100_vm3, %v866_v15 }
 0x4b9   :  { %4434 = vmatpush3.bf16.msra.mxu1 %v5054_v2  ;;  %4086 = vmatprep.mubr.msk.f32.mxu1 %vm4833_vm15, %v4834_v6 }
 0x4ba   :  { %4435 = vmatprep.subr.bf16.mxu1 %v4832_v5  ;;  %v1041_v16 = vpop.f32.mrb[14].mxu0 }
 0x4bb   :  { %v4077_v17 = vpop.f32.mrb[15].mxu0 }
 0x4bd   :  { %4437 = vmatpush3.bf16.msra.mxu1 %v5060_v7 }
 0x4be   :  { %4444 = vmatprep.subr.bf16.mxu1 %v4832_v5 }
 0x58b   :  { %v4066_v20 = vpop.f32.mrb[10].mxu1 }
 0x58c   :  { %v953_v21 = vadd.f32 %v4066_v20, %v3699_v18  ;;  %v947_v22 = vpop.f32.mrb[11].mxu1 }
 0x58d   :  { %v948_v23 = vadd.f32 %v3699_v18, %v947_v22 }
 0x58e   :  { %v961_v24 = vmul.f32 %v5081_v19, %v953_v21 }
 0x58f   :  { %v960_v25 = vmul.f32 %v5081_v19, %v948_v23 }
 0x590   :  { %v963_v26 = vsub.f32 %v953_v21, %v961_v24 }
 0x591   :  { %v962_v27 = vsub.f32 %v948_v23, %v960_v25 }
 0x592   :  { %v1070_v28 = vrot.slane %v963_v26, 6  ;;  %v969_v29 = vrot.slane %v963_v26, 2 }
 0x593   :  { %v1180_v30 = vrot.slane %v962_v27, 2  ;;  %v1290_v31 = vrot.slane %v962_v27, 6 }
 0x594   :  { %v971_v32 = vadd.f32 %v969_v29, %v960_v25  ;;  %v1072_v33 = vadd.f32 %v1070_v28, %v960_v25 }
 0x595   :  { %v5085_v34 = vadd.f32 %v1180_v30, %v960_v25  ;;  %v5087_v35 = vadd.f32 %v1290_v31, %v960_v25  ;;  %v5089_v36 = vadd.f32 %v1180_v30, %v961_v24  ;;  %v5091_v37 = vadd.f32 %v1290_v31, %v961_v24 }
 0x596   :  { %v1045_v39 = vadd.f32 %v1041_v16, %v971_v32 }
 0x598   :  { %4635 = vtanh.f32 %v1045_v39  ;;  %v3703_v41 = vmul.f32 -1.442695, %v1045_v39 }
 0x59a   :  { %4637 = vpow2.f32 %v3703_v41 }
 0x5a2   :  { %v4636_v40 = vpop.eup %4635 }
 0x5a3   :  { %1055 = vrot.lane.b32.xlu0 %v4636_v40, %s4835_s23 }
 0x5a4   :  { %v4638_v42 = vpop.eup %4637 }
 0x5a5   :  { %v1049_v43 = vadd.f32 1.0, %v4638_v42 }
 0x5a7   :  { %4639 = vrcp.f32 %v1049_v43 }
 0x5b1   :  { %v4640_v44 = vpop.eup %4639 }
 0x5b2   :  { %v1053_v47 = vmul.f32 0.0, %v4640_v44 }
 0x615   :  { %v1056_v45 = vpop.permute.xlu0 %1055 }
 0x616   :  { %v1058_v46 = vmul.f32 %v4640_v44, %v1056_v45 }
 0x618   :  { %1060 = vrot.lane.b32.xlu1 %v1058_v46, %s4831_s0 }
 0x68a   :  { %v1061_v48 = vpop.permute.xlu1 %1060 }
 0x68b   :  { %v1063_v49 = vadd.f32 %v1061_v48, %v1053_v47 }
 0x68d   :  { %4641 = vtanh.f32 %v1063_v49  ;;  %v1160_v1 = vrot.slane %v1063_v49, 6 }
 0x697   :  { %v4642_v50 = vpop.eup %4641 }
 0x698   :  { %1066 = vrot.lane.b32.xlu0 %v4642_v50, %s4835_s23 }
 0x70a   :  { %v1067_v51 = vpop.permute.xlu0 %1066 }
 0x70b   :  { %v5096_v52 = vmul.f32 %v4640_v44, %v1067_v51 }
 0x70d   :  { %1074 = vrot.lane.b32.xlu1 %v5096_v52, %s4831_s0 }
 0x77f   :  { %v1075_v53 = vpop.permute.xlu1 %1074 }
 0x780   :  { %4087 = vmatmul.mubr.msk.f32.vlgmr.msra.gmra.mrb[12].mxu1 %vm539_vm10, %v1075_v53 }
 0x781   :  { %4446 = vmatpush3.bf16.msra.mxu1 %v5054_v2  ;;  %4108 = vmatprep.mubr.msk.f32.mxu1 %vm4833_vm15, %v4834_v6 }
 0x782   :  { %4447 = vmatprep.subr.bf16.mxu1 %v4832_v5 }
 0x785   :  { %4449 = vmatpush3.bf16.msra.mxu1 %v5060_v7 }
 0x786   :  { %4456 = vmatprep.subr.bf16.mxu1 %v4832_v5 }
 0x853   :  { %v1144_v54 = vpop.f32.mrb[12].mxu1 }
 0x854   :  { %v1149_v55 = vrot.slane %v1144_v54, 6  ;;  %v4088_v56 = vpop.f32.mrb[13].mxu1 }
 0x856   :  { %v1151_v57 = vadd.f32 %v1149_v55, %v1072_v33 }
 0x858   :  { %4643 = vtanh.f32 %v1151_v57  ;;  %v3705_v59 = vmul.f32 -1.442695, %v1151_v57 }
 0x85a   :  { %4645 = vpow2.f32 %v3705_v59 }
 0x862   :  { %v4644_v58 = vpop.eup %4643 }
 0x863   :  { %1164 = vrot.lane.b32.xlu0 %v4644_v58, %s4835_s23 }
 0x864   :  { %v4646_v60 = vpop.eup %4645 }
 0x865   :  { %v1155_v61 = vadd.f32 1.0, %v4646_v60 }
 0x867   :  { %4647 = vrcp.f32 %v1155_v61 }
 0x871   :  { %v4648_v62 = vpop.eup %4647 }
 0x872   :  { %v1162_v3 = vmul.f32 %v4648_v62, %v1160_v1 }
 0x8d5   :  { %v1165_v63 = vpop.permute.xlu0 %1164 }
 0x8d6   :  { %v1167_v0 = vmul.f32 %v4648_v62, %v1165_v63 }
 0x8d8   :  { %1169 = vrot.lane.b32.xlu1 %v1167_v0, %s4831_s0 }
 0x94a   :  { %v1170_v4 = vpop.permute.xlu1 %1169 }
 0x94b   :  { %v1172_v9 = vadd.f32 %v1170_v4, %v1162_v3 }
 0x94d   :  { %4649 = vtanh.f32 %v1172_v9  ;;  %v1271_v26 = vrot.slane %v1172_v9, 6 }
 0x957   :  { %v4650_v10 = vpop.eup %4649 }
 0x958   :  { %1175 = vrot.lane.b32.xlu0 %v4650_v10, %s4835_s23 }
 0x9ca   :  { %v1176_v11 = vpop.permute.xlu0 %1175 }
 0x9cb   :  { %v5110_v12 = vmul.f32 %v4648_v62, %v1176_v11 }
 0x9cd   :  { %v1184_v13 = vrot.slane %v5110_v12, 2  ;;  %v1612_v33 = vsel %vm701_vm13, %v5096_v52, %v5110_v12 }
 0x9cf   :  { %1185 = vrot.lane.b32.xlu1 %v1184_v13, %s4831_s0 }
 0xa41   :  { %v1186_v8 = vpop.permute.xlu1 %1185 }
 0xa42   :  { %4098 = vmatmul.mubr.msk.f32.vlgmr.msra.gmra.mrb[16].mxu0 %vm539_vm10, %v1186_v8 }
 0xa43   :  { %4452 = vmatpush3.bf16.msra.mxu0 %v5054_v2  ;;  %4119 = vmatprep.mubr.msk.f32.mxu0 %vm4833_vm15, %v4834_v6 }
 0xa44   :  { %4453 = vmatprep.subr.bf16.mxu0 %v4832_v5 }
 0xa47   :  { %4455 = vmatpush3.bf16.msra.mxu0 %v5060_v7 }
 0xb15   :  { %v1255_v14 = vpop.f32.mrb[16].mxu0 }
 0xb16   :  { %v1260_v15 = vrot.slane %v1255_v14, 4  ;;  %v4099_v16 = vpop.f32.mrb[17].mxu0 }
 0xb18   :  { %v1262_v17 = vadd.f32 %v1260_v15, %v5085_v34 }
 0xb1a   :  { %4651 = vtanh.f32 %v1262_v17  ;;  %v3707_v20 = vmul.f32 -1.442695, %v1262_v17 }
 0xb1c   :  { %4653 = vpow2.f32 %v3707_v20 }
 0xb24   :  { %v4652_v18 = vpop.eup %4651 }
 0xb25   :  { %1275 = vrot.lane.b32.xlu0 %v4652_v18, %s4835_s23 }
 0xb26   :  { %v4654_v21 = vpop.eup %4653 }
 0xb27   :  { %v1266_v22 = vadd.f32 1.0, %v4654_v21 }
 0xb29   :  { %4655 = vrcp.f32 %v1266_v22 }
 0xb33   :  { %v4656_v23 = vpop.eup %4655 }
 0xb34   :  { %v1273_v27 = vmul.f32 %v4656_v23, %v1271_v26 }
 0xb97   :  { %v1276_v24 = vpop.permute.xlu0 %1275 }
 0xb98   :  { %v1278_v25 = vmul.f32 %v4656_v23, %v1276_v24 }
 0xb9a   :  { %1280 = vrot.lane.b32.xlu1 %v1278_v25, %s4831_s0 }
 0xc0c   :  { %v1281_v28 = vpop.permute.xlu1 %1280 }
 0xc0d   :  { %v1283_v29 = vadd.f32 %v1281_v28, %v1273_v27 }
 0xc0f   :  { %4657 = vtanh.f32 %v1283_v29 }
 0xc19   :  { %v4658_v30 = vpop.eup %4657 }
 0xc1a   :  { %1286 = vrot.lane.b32.xlu0 %v4658_v30, %s4835_s23 }
 0xc8c   :  { %v1287_v31 = vpop.permute.xlu0 %1286 }
 0xc8d   :  { %v5126_v32 = vmul.f32 %v4656_v23, %v1287_v31 }
 0xc8f   :  { %v1294_v34 = vrot.slane %v5126_v32, 4  ;;  %v1613_v39 = vsel %vm319_vm6, %v1612_v33, %v5126_v32 }
 0xc91   :  { %1295 = vrot.lane.b32.xlu1 %v1294_v34, %s4831_s0 }
 0xd03   :  { %v1296_v40 = vpop.permute.xlu1 %1295 }
 0xd04   :  { %4109 = vmatmul.mubr.msk.f32.vlgmr.msra.gmra.mrb[14].mxu1 %vm539_vm10, %v1296_v40  ;;  %v1650_v40 = vld [vmem:[#allocation2 + $0x90] sm:$0xff] }
 0xd05   :  { %4458 = vmatpush3.bf16.msra.mxu1 %v5054_v2  ;;  %4130 = vmatprep.mubr.msk.f32.mxu1 %vm4833_vm15, %v4834_v6 }
 0xd06   :  { %4459 = vmatprep.subr.bf16.mxu1 %v4832_v5 }
 0xd09   :  { %4461 = vmatpush3.bf16.msra.mxu1 %v5060_v7  ;;  %v1381_v7 = vrot.slane %v1283_v29, 6 }
 0xd0a   :  { %4470 = vmatprep.subr.bf16.mxu1 %v4832_v5 }
 0xdd7   :  { %v1365_v41 = vpop.f32.mrb[14].mxu1 }
 0xdd8   :  { %v1370_v42 = vrot.slane %v1365_v41, 2  ;;  %v4110_v43 = vpop.f32.mrb[15].mxu1  ;;  %v1651_v41 = vld [vmem:[#allocation2 + $0x98] sm:$0xff] }
 0xdd9   :  { %v1652_v43 = vld [vmem:[#allocation2 + $0xa0] sm:$0xff] }
 0xdda   :  { %v1372_v44 = vadd.f32 %v1370_v42, %v5087_v35  ;;  %v4462_v42 = vpack.c.bf16 %v1651_v41, %v1650_v40 }
 0xddc   :  { %4659 = vtanh.f32 %v1372_v44  ;;  %v3709_v46 = vmul.f32 -1.442695, %v1372_v44  ;;  %4463 = vmatprep.subr.bf16.mxu0 %v4462_v42  ;;  %v1653_v44 = vld [vmem:[#allocation2 + $0xa8] sm:$0xff] }
 0xdde   :  { %4661 = vpow2.f32 %v3709_v46  ;;  %v1744_v46 = vld [vmem:[#allocation2 + $0xb0] sm:$0xff] }
 0xde6   :  { %v4660_v45 = vpop.eup %4659 }
 0xde7   :  { %1385 = vrot.lane.b32.xlu0 %v4660_v45, %s4835_s23  ;;  %v4466_v45 = vpack.c.bf16 %v1653_v44, %v1652_v43 }
 0xde8   :  { %v4662_v2 = vpop.eup %4661 }
 0xde9   :  { %v1376_v47 = vadd.f32 1.0, %v4662_v2  ;;  %v1745_v2 = vld [vmem:[#allocation2 + $0xb8] sm:$0xff] }
 0xdeb   :  { %4663 = vrcp.f32 %v1376_v47 }
 0xdf5   :  { %v4664_v48 = vpop.eup %4663 }
 0xdf6   :  { %v1383_v51 = vmul.f32 %v4664_v48, %v1381_v7 }
 0xe59   :  { %v1386_v49 = vpop.permute.xlu0 %1385 }
 0xe5a   :  { %v1388_v50 = vmul.f32 %v4664_v48, %v1386_v49  ;;  %v1746_v49 = vld [vmem:[#allocation2 + $0xc0] sm:$0xff] }
 0xe5c   :  { %1390 = vrot.lane.b32.xlu1 %v1388_v50, %s4831_s0  ;;  %v1747_v50 = vld [vmem:[#allocation2 + $0xc8] sm:$0xff] }
 0xece   :  { %v1391_v53 = vpop.permute.xlu1 %1390 }
 0xecf   :  { %v1393_v54 = vadd.f32 %v1391_v53, %v1383_v51  ;;  %v5170_v51 = vpack.c.bf16 %v1747_v50, %v1746_v49 }
 0xed1   :  { %4665 = vtanh.f32 %v1393_v54  ;;  %v1486_v11 = vrot.slane %v1393_v54, 6 }
 0xedb   :  { %v4666_v35 = vpop.eup %4665 }
 0xedc   :  { %1396 = vrot.lane.b32.xlu0 %v4666_v35, %s4835_s23 }
 0xf4e   :  { %v1397_v55 = vpop.permute.xlu0 %1396 }
 0xf4f   :  { %v5146_v56 = vmul.f32 %v4664_v48, %v1397_v55  ;;  %v5167_v48 = vpack.c.bf16 %v1745_v2, %v1744_v46 }
 0xf51   :  { %v1402_v57 = vrot.slane %v5146_v56, 6  ;;  %v1614_v58 = vsel %vm75_vm0, %v1613_v39, %v5146_v56  ;;  %v1621_v55 = vrot.slane %v5146_v56, 2 }
 0xf53   :  { %1403 = vrot.lane.b32.xlu1 %v1402_v57, %s4831_s0  ;;  %v1623_v57 = vrot.slane %v5126_v32, 6 }
 0xfc5   :  { %v1404_v59 = vpop.permute.xlu1 %1403 }
 0xfc6   :  { %4120 = vmatmul.mubr.msk.f32.vlgmr.msra.gmra.mrb[18].mxu0 %vm539_vm10, %v1404_v59 }
 0xfc7   :  { %4465 = vmatpush3.bf16.msra.mxu0 %v4462_v42 }
 0xfc8   :  { %4467 = vmatprep.subr.bf16.mxu0 %v4466_v45 }
 0xfcb   :  { %4469 = vmatpush3.bf16.msra.mxu0 %v4466_v45 }
 0xfcc   :  { %4476 = vmatprep.subr.bf16.mxu0 %v4832_v5 }
0x1099   :  { %v1473_v60 = vpop.f32.mrb[18].mxu0 }
0x109a   :  { %v1477_v61 = vadd.f32 %v1473_v60, %v5089_v36  ;;  %v4121_v62 = vpop.f32.mrb[19].mxu0 }
0x109c   :  { %4667 = vtanh.f32 %v1477_v61  ;;  %v3711_v0 = vmul.f32 -1.442695, %v1477_v61  ;;  %v1626_v61 = vrot.slane %v5096_v52, 6 }
0x109e   :  { %4669 = vpow2.f32 %v3711_v0  ;;  %v1631_v32 = vsel %vm701_vm13, %v1184_v13, %v1626_v61 }
0x10a6   :  { %v4668_v63 = vpop.eup %4667 }
0x10a7   :  { %1490 = vrot.lane.b32.xlu0 %v4668_v63, %s4835_s23 }
0x10a8   :  { %v4670_v1 = vpop.eup %4669 }
0x10a9   :  { %v1481_v3 = vadd.f32 1.0, %v4670_v1 }
0x10ab   :  { %4671 = vrcp.f32 %v1481_v3  ;;  %v3714_v3 = vld [vmem:[#allocation2 + $0xd0] ss:$0 sm:$0xff] }
0x10b5   :  { %v4672_v4 = vpop.eup %4671 }
0x10b6   :  { %v1488_v8 = vmul.f32 %v4672_v4, %v1486_v11 }
0x1119   :  { %v1491_v9 = vpop.permute.xlu0 %1490 }
0x111a   :  { %v1493_v10 = vmul.f32 %v4672_v4, %v1491_v9 }
0x111c   :  { %1495 = vrot.lane.b32.xlu1 %v1493_v10, %s4831_s0 }
0x118e   :  { %v1496_v14 = vpop.permute.xlu1 %1495 }
0x118f   :  { %v1498_v15 = vadd.f32 %v1496_v14, %v1488_v8 }
0x1191   :  { %4673 = vtanh.f32 %v1498_v15  ;;  %v1593_v31 = vrot.slane %v1498_v15, 6 }
0x119b   :  { %v4674_v36 = vpop.eup %4673 }
0x119c   :  { %1501 = vrot.lane.b32.xlu0 %v4674_v36, %s4835_s23 }
0x120e   :  { %v1502_v16 = vpop.permute.xlu0 %1501 }
0x120f   :  { %v1504_v17 = vmul.f32 %v4672_v4, %v1502_v16 }
0x1211   :  { %1507 = vrot.lane.b32.xlu1 %v1504_v17, %s4831_s0  ;;  %v1619_v53 = vrot.slane %v1504_v17, 6 }
0x1283   :  { %v1508_v18 = vpop.permute.xlu1 %1507 }
0x1284   :  { %4131 = vmatmul.mubr.msk.f32.vlgmr.msra.gmra.mrb[16].mxu1 %vm539_vm10, %v1508_v18 }
0x1285   :  { %4152 = vmatprep.mubr.msk.f32.mxu1 %vm4833_vm15, %v4834_v6  ;;  %4472 = vmatpush3.bf16.msra.mxu1 %v5167_v48 }
0x1286   :  { %4473 = vmatprep.subr.bf16.mxu1 %v4832_v5 }
0x1289   :  { %4475 = vmatpush3.bf16.msra.mxu1 %v5170_v51 }
0x128a   :  { %4482 = vmatprep.subr.bf16.mxu1 %v4832_v5 }
0x128c   :  { %4153 = vmatmul.mubr.f32.vlgmr.msra.gmra.mrb[18].mxu1 %v4834_v6 }
0x128d   :  { %4484 = vmatpush3.bf16.msra.mxu1 %v5167_v48  ;;  %4174 = vmatprep.mubr.msk.f32.mxu1 %vm4833_vm15, %v4834_v6 }
0x128e   :  { %4485 = vmatprep.subr.bf16.mxu1 %v4832_v5 }
0x1291   :  { %4487 = vmatpush3.bf16.msra.mxu1 %v5170_v51 }
0x1292   :  { %4494 = vmatprep.subr.bf16.mxu1 %v4832_v5 }
0x1357   :  { %v1577_v20 = vpop.f32.mrb[16].mxu1 }
0x1358   :  { %v1582_v21 = vrot.slane %v1577_v20, 6  ;;  %v4132_v22 = vpop.f32.mrb[17].mxu1 }
0x135a   :  { %v1584_v23 = vadd.f32 %v1582_v21, %v5091_v37 }
0x135c   :  { %4675 = vtanh.f32 %v1584_v23  ;;  %v3713_v25 = vmul.f32 -1.442695, %v1584_v23 }
0x135e   :  { %4677 = vpow2.f32 %v3713_v25 }
0x135f   :  { %v1818_v13 = vpop.f32.mrb[18].mxu1 }
0x1360   :  { %v4154_v1 = vpop.f32.mrb[19].mxu1 }
0x1366   :  { %v4676_v24 = vpop.eup %4675 }
0x1367   :  { %1597 = vrot.lane.b32.xlu0 %v4676_v24, %s4835_s23 }
0x1368   :  { %v4678_v26 = vpop.eup %4677 }
0x1369   :  { %v1588_v27 = vadd.f32 1.0, %v4678_v26 }
0x136b   :  { %4679 = vrcp.f32 %v1588_v27 }
0x1375   :  { %v4680_v28 = vpop.eup %4679 }
0x1376   :  { %v1595_v33 = vmul.f32 %v4680_v28, %v1593_v31 }
0x13d9   :  { %v1598_v29 = vpop.permute.xlu0 %1597 }
0x13da   :  { %v1600_v30 = vmul.f32 %v4680_v28, %v1598_v29 }
0x13dc   :  { %1602 = vrot.lane.b32.xlu1 %v1600_v30, %s4831_s0 }
0x13e0   :  { %1634 = vrot.lane.b32.xlu1 %v1614_v58, %s4831_s0 }
0x144e   :  { %v1603_v34 = vpop.permute.xlu1 %1602 }
0x144f   :  { %v1605_v37 = vadd.f32 %v1603_v34, %v1595_v33 }
0x1451   :  { %4681 = vtanh.f32 %v1605_v37 }
0x1452   :  { %v1635_v52 = vpop.permute.xlu1 %1634 }
0x145b   :  { %v4682_v39 = vpop.eup %4681 }
0x145c   :  { %1608 = vrot.lane.b32.xlu0 %v4682_v39, %s4835_s23 }
0x14ce   :  { %v1609_v47 = vpop.permute.xlu0 %1608 }
0x14cf   :  { %v1611_v7 = vmul.f32 %v4680_v28, %v1609_v47 }
0x14d1   :  { %v1617_v54 = vrot.slane %v1611_v7, 2  ;;  %v1615_v35 = vsel %vm701_vm13, %v1504_v17, %v1611_v7 }
0x14d2   :  { %1636 = vrot.lane.b32.xlu1 %v1615_v35, %s4831_s0 }
0x14d3   :  { %v1628_v58 = vsel %vm701_vm13, %v1617_v54, %v1619_v53 }
0x14d4   :  { %v1629_v59 = vsel %vm319_vm6, %v1628_v58, %v1621_v55 }
0x14d5   :  { %v1630_v60 = vsel %vm75_vm0, %v1629_v59, %v1623_v57 }
0x14d6   :  { %1642 = vrot.lane.b32.xlu0 %v1630_v60, %s4831_s0 }
0x14da   :  { %1644 = vrot.lane.b32.xlu0 %v1631_v32, %s4831_s0 }
0x1544   :  { %v1637_v63 = vpop.permute.xlu1 %1636 }
0x1548   :  { %v1643_v56 = vpop.permute.xlu0 %1642 }
0x1549   :  { %v1648_v62 = vsel %vm100_vm3, %v1635_v52, %v1643_v56 }
0x154a   :  { %4141 = vmatprep.mubr.msk.f32.mxu0 %vm539_vm10, %v1648_v62 }
0x154c   :  { %v1645_v0 = vpop.permute.xlu0 %1644 }
0x154d   :  { %v1649_v12 = vsel %vm100_vm3, %v1637_v63, %v1645_v0 }
0x154e   :  { %4142 = vmatmul.mubr.msk.f32.vlgmr.msra.gmra.mrb[20].mxu0 %vm539_vm10, %v1649_v12 }
0x154f   :  { %4478 = vmatpush3.bf16.msra.mxu0 %v5167_v48  ;;  %4163 = vmatprep.mubr.msk.f32.mxu0 %vm4833_vm15, %v4834_v6 }
0x1550   :  { %4479 = vmatprep.subr.bf16.mxu0 %v4832_v5 }
0x1553   :  { %4481 = vmatpush3.bf16.msra.mxu0 %v5170_v51 }
0x1554   :  { %4488 = vmatprep.subr.bf16.mxu0 %v4832_v5 }
0x1621   :  { %v4143_v4 = vpop.f32.mrb[20].mxu0 }
0x1622   :  { %v1737_v9 = vadd.f32 %v4143_v4, %v3714_v3  ;;  %v1731_v10 = vpop.f32.mrb[21].mxu0 }
0x1623   :  { %v1732_v11 = vadd.f32 %v3714_v3, %v1731_v10 }
0x1624   :  { %v1741_v8 = vmul.f32 %v5081_v19, %v1737_v9 }
0x1625   :  { %v1740_v14 = vmul.f32 %v5081_v19, %v1732_v11 }
0x1626   :  { %v1743_v15 = vsub.f32 %v1737_v9, %v1741_v8 }
0x1627   :  { %v1742_v36 = vsub.f32 %v1732_v11, %v1740_v14 }
0x1628   :  { %v1847_v16 = vrot.slane %v1743_v15, 6  ;;  %v1749_v17 = vrot.slane %v1743_v15, 2 }
0x1629   :  { %v1957_v18 = vrot.slane %v1742_v36, 2  ;;  %v2067_v20 = vrot.slane %v1742_v36, 6 }
0x162a   :  { %v1751_v21 = vadd.f32 %v1749_v17, %v1740_v14  ;;  %v1849_v22 = vadd.f32 %v1847_v16, %v1740_v14 }
0x162b   :  { %v5207_v23 = vadd.f32 %v1957_v18, %v1740_v14  ;;  %v5209_v24 = vadd.f32 %v2067_v20, %v1740_v14  ;;  %v5211_v25 = vadd.f32 %v1957_v18, %v1741_v8  ;;  %v5213_v26 = vadd.f32 %v2067_v20, %v1741_v8 }
0x162c   :  { %v1822_v27 = vadd.f32 %v1818_v13, %v1751_v21 }
0x162e   :  { %4683 = vtanh.f32 %v1822_v27  ;;  %v3717_v19 = vmul.f32 -1.442695, %v1822_v27 }
0x1630   :  { %4685 = vpow2.f32 %v3717_v19 }
0x1638   :  { %v4684_v28 = vpop.eup %4683 }
0x1639   :  { %1832 = vrot.lane.b32.xlu1 %v4684_v28, %s4835_s23 }
0x163a   :  { %v4686_v29 = vpop.eup %4685 }
0x163b   :  { %v1826_v30 = vadd.f32 1.0, %v4686_v29 }
0x163d   :  { %4687 = vrcp.f32 %v1826_v30 }
0x1647   :  { %v4688_v31 = vpop.eup %4687 }
0x1648   :  { %v1830_v37 = vmul.f32 0.0, %v4688_v31 }
0x16ab   :  { %v1833_v33 = vpop.permute.xlu1 %1832 }
0x16ac   :  { %v1835_v34 = vmul.f32 %v4688_v31, %v1833_v33 }
0x16ae   :  { %1837 = vrot.lane.b32.xlu0 %v1835_v34, %s4831_s0 }
0x1720   :  { %v1838_v39 = vpop.permute.xlu0 %1837 }
0x1721   :  { %v1840_v40 = vadd.f32 %v1838_v39, %v1830_v37 }
0x1723   :  { %4689 = vtanh.f32 %v1840_v40  ;;  %v1937_v57 = vrot.slane %v1840_v40, 6 }
0x172d   :  { %v4690_v41 = vpop.eup %4689 }
0x172e   :  { %1843 = vrot.lane.b32.xlu1 %v4690_v41, %s4835_s23 }
0x17a0   :  { %v1844_v42 = vpop.permute.xlu1 %1843 }
0x17a1   :  { %v5218_v43 = vmul.f32 %v4688_v31, %v1844_v42 }
0x17a3   :  { %1851 = vrot.lane.b32.xlu0 %v5218_v43, %s4831_s0 }
0x1815   :  { %v1852_v44 = vpop.permute.xlu0 %1851 }
0x1816   :  { %4164 = vmatmul.mubr.msk.f32.vlgmr.msra.gmra.mrb[22].mxu0 %vm539_vm10, %v1852_v44 }
0x1817   :  { %4490 = vmatpush3.bf16.msra.mxu0 %v5167_v48  ;;  %4185 = vmatprep.mubr.msk.f32.mxu0 %vm4833_vm15, %v4834_v6 }
0x1818   :  { %4491 = vmatprep.subr.bf16.mxu0 %v4832_v5 }
0x181b   :  { %4493 = vmatpush3.bf16.msra.mxu0 %v5170_v51 }
0x181c   :  { %4500 = vmatprep.subr.bf16.mxu0 %v4832_v5 }
0x18e9   :  { %v1921_v45 = vpop.f32.mrb[22].mxu0 }
0x18ea   :  { %v1926_v46 = vrot.slane %v1921_v45, 6  ;;  %v4165_v2 = vpop.f32.mrb[23].mxu0 }
0x18ec   :  { %v1928_v47 = vadd.f32 %v1926_v46, %v1849_v22 }
0x18ee   :  { %4691 = vtanh.f32 %v1928_v47  ;;  %v3719_v50 = vmul.f32 -1.442695, %v1928_v47 }
0x18f0   :  { %4693 = vpow2.f32 %v3719_v50 }
0x18f8   :  { %v4692_v49 = vpop.eup %4691 }
0x18f9   :  { %1941 = vrot.lane.b32.xlu1 %v4692_v49, %s4835_s23 }
0x18fa   :  { %v4694_v7 = vpop.eup %4693 }
0x18fb   :  { %v1932_v53 = vadd.f32 1.0, %v4694_v7 }
0x18fd   :  { %4695 = vrcp.f32 %v1932_v53 }
0x1907   :  { %v4696_v54 = vpop.eup %4695 }
0x1908   :  { %v1939_v58 = vmul.f32 %v4696_v54, %v1937_v57 }
0x196b   :  { %v1942_v35 = vpop.permute.xlu1 %1941 }
0x196c   :  { %v1944_v55 = vmul.f32 %v4696_v54, %v1942_v35 }
0x196e   :  { %1946 = vrot.lane.b32.xlu0 %v1944_v55, %s4831_s0 }
0x19e0   :  { %v1947_v59 = vpop.permute.xlu0 %1946 }
0x19e1   :  { %v1949_v60 = vadd.f32 %v1947_v59, %v1939_v58 }
0x19e3   :  { %4697 = vtanh.f32 %v1949_v60  ;;  %v2048_v14 = vrot.slane %v1949_v60, 6 }
0x19ed   :  { %v4698_v61 = vpop.eup %4697 }
0x19ee   :  { %1952 = vrot.lane.b32.xlu1 %v4698_v61, %s4835_s23 }
0x1a60   :  { %v1953_v32 = vpop.permute.xlu1 %1952 }
0x1a61   :  { %v5232_v52 = vmul.f32 %v4696_v54, %v1953_v32 }
0x1a63   :  { %v1961_v56 = vrot.slane %v5232_v52, 2  ;;  %v2389_v21 = vsel %vm701_vm13, %v5218_v43, %v5232_v52  ;;  %v2521_v52 = vld [vmem:[#allocation5 + $0x60] sm:$0xff] }
0x1a65   :  { %1962 = vrot.lane.b32.xlu0 %v1961_v56, %s4831_s0 }
0x1ad7   :  { %v1963_v62 = vpop.permute.xlu0 %1962 }
0x1ad8   :  { %4175 = vmatmul.mubr.msk.f32.vlgmr.msra.gmra.mrb[20].mxu1 %vm539_vm10, %v1963_v62 }
0x1ad9   :  { %4496 = vmatpush3.bf16.msra.mxu1 %v5167_v48  ;;  %4196 = vmatprep.mubr.msk.f32.mxu1 %vm4833_vm15, %v4834_v6 }
0x1ada   :  { %4497 = vmatprep.subr.bf16.mxu1 %v4832_v5 }
0x1add   :  { %4499 = vmatpush3.bf16.msra.mxu1 %v5170_v51 }
0x1bab   :  { %v2032_v63 = vpop.f32.mrb[20].mxu1 }
0x1bac   :  { %v2037_v0 = vrot.slane %v2032_v63, 4  ;;  %v4176_v12 = vpop.f32.mrb[21].mxu1 }
0x1bae   :  { %v2039_v13 = vadd.f32 %v2037_v0, %v5207_v23 }
0x1bb0   :  { %4699 = vtanh.f32 %v2039_v13  ;;  %v3721_v3 = vmul.f32 -1.442695, %v2039_v13 }
0x1bb2   :  { %4701 = vpow2.f32 %v3721_v3 }
0x1bba   :  { %v4700_v1 = vpop.eup %4699 }
0x1bbb   :  { %2052 = vrot.lane.b32.xlu1 %v4700_v1, %s4835_s23 }
0x1bbc   :  { %v4702_v4 = vpop.eup %4701 }
0x1bbd   :  { %v2043_v9 = vadd.f32 1.0, %v4702_v4 }
0x1bbf   :  { %4703 = vrcp.f32 %v2043_v9 }
0x1bc9   :  { %v4704_v10 = vpop.eup %4703 }
0x1bca   :  { %v2050_v15 = vmul.f32 %v4704_v10, %v2048_v14 }
0x1c2d   :  { %v2053_v11 = vpop.permute.xlu1 %2052 }
0x1c2e   :  { %v2055_v8 = vmul.f32 %v4704_v10, %v2053_v11 }
0x1c30   :  { %2057 = vrot.lane.b32.xlu0 %v2055_v8, %s4831_s0 }
0x1ca2   :  { %v2058_v36 = vpop.permute.xlu0 %2057 }
0x1ca3   :  { %v2060_v16 = vadd.f32 %v2058_v36, %v2050_v15 }
0x1ca5   :  { %4705 = vtanh.f32 %v2060_v16 }
0x1caf   :  { %v4706_v17 = vpop.eup %4705 }
0x1cb0   :  { %2063 = vrot.lane.b32.xlu1 %v4706_v17, %s4835_s23 }
0x1d22   :  { %v2064_v18 = vpop.permute.xlu1 %2063 }
0x1d23   :  { %v5248_v20 = vmul.f32 %v4704_v10, %v2064_v18 }
0x1d25   :  { %v2071_v22 = vrot.slane %v5248_v20, 4  ;;  %v2390_v23 = vsel %vm319_vm6, %v2389_v21, %v5248_v20 }
0x1d27   :  { %2072 = vrot.lane.b32.xlu0 %v2071_v22, %s4831_s0 }
0x1d99   :  { %v2073_v27 = vpop.permute.xlu0 %2072 }
0x1d9a   :  { %4186 = vmatmul.mubr.msk.f32.vlgmr.msra.gmra.mrb[24].mxu0 %vm539_vm10, %v2073_v27  ;;  %v2428_v27 = vld [vmem:[#allocation2 + $0xe8] sm:$0xff] }
0x1d9b   :  { %4502 = vmatpush3.bf16.msra.mxu0 %v5167_v48  ;;  %4207 = vmatprep.mubr.msk.f32.mxu0 %vm4833_vm15, %v4834_v6 }
0x1d9c   :  { %4503 = vmatprep.subr.bf16.mxu0 %v4832_v5 }
0x1d9f   :  { %4505 = vmatpush3.bf16.msra.mxu0 %v5170_v51  ;;  %v2158_v51 = vrot.slane %v2060_v16, 6 }
0x1e6d   :  { %v2142_v28 = vpop.f32.mrb[24].mxu0 }
0x1e6e   :  { %v2147_v19 = vrot.slane %v2142_v28, 2  ;;  %v4187_v29 = vpop.f32.mrb[25].mxu0 }
0x1e6f   :  { %v2430_v29 = vld [vmem:[#allocation2 + $0xf8] sm:$0xff] }
0x1e70   :  { %v2149_v30 = vadd.f32 %v2147_v19, %v5209_v24  ;;  %v2429_v19 = vld [vmem:[#allocation2 + $0xf0] sm:$0xff] }
0x1e72   :  { %4707 = vtanh.f32 %v2149_v30  ;;  %v3723_v33 = vmul.f32 -1.442695, %v2149_v30  ;;  %v4510_v30 = vpack.c.bf16 %v2430_v29, %v2429_v19 }
0x1e74   :  { %4709 = vpow2.f32 %v3723_v33 }
0x1e7c   :  { %v4708_v31 = vpop.eup %4707 }
0x1e7d   :  { %2162 = vrot.lane.b32.xlu1 %v4708_v31, %s4835_s23 }
0x1e7e   :  { %v4710_v34 = vpop.eup %4709 }
0x1e7f   :  { %v2153_v48 = vadd.f32 1.0, %v4710_v34 }
0x1e81   :  { %4711 = vrcp.f32 %v2153_v48 }
0x1e8b   :  { %v4712_v37 = vpop.eup %4711 }
0x1e8c   :  { %v2160_v41 = vmul.f32 %v4712_v37, %v2158_v51 }
0x1eef   :  { %v2163_v39 = vpop.permute.xlu1 %2162 }
0x1ef0   :  { %v2165_v40 = vmul.f32 %v4712_v37, %v2163_v39 }
0x1ef2   :  { %2167 = vrot.lane.b32.xlu0 %v2165_v40, %s4831_s0  ;;  %v2400_v40 = vrot.slane %v5248_v20, 6 }
0x1f64   :  { %v2168_v42 = vpop.permute.xlu0 %2167 }
0x1f65   :  { %v2170_v44 = vadd.f32 %v2168_v42, %v2160_v41 }
0x1f67   :  { %4713 = vtanh.f32 %v2170_v44  ;;  %v2263_v61 = vrot.slane %v2170_v44, 6  ;;  %v2403_v44 = vrot.slane %v5218_v43, 6  ;;  %v3728_v43 = vld [vmem:[#allocation2 + $0x100] ss:$0 sm:$0xff] }
0x1f71   :  { %v4714_v24 = vpop.eup %4713 }
0x1f72   :  { %2173 = vrot.lane.b32.xlu1 %v4714_v24, %s4835_s23  ;;  %v2408_v24 = vsel %vm701_vm13, %v1961_v56, %v2403_v44  ;;  %v2614_v56 = vld [vmem:[#allocation5 + $0x70] sm:$0xff] }
0x1fe4   :  { %v2174_v45 = vpop.permute.xlu1 %2173 }
0x1fe5   :  { %v5267_v46 = vmul.f32 %v4712_v37, %v2174_v45 }
0x1fe7   :  { %v2179_v2 = vrot.slane %v5267_v46, 6  ;;  %v2391_v47 = vsel %vm75_vm0, %v2390_v23, %v5267_v46  ;;  %v2427_v23 = vld [vmem:[#allocation2 + $0xe0] sm:$0xff]  ;;  %v2398_v39 = vrot.slane %v5267_v46, 2 }
0x1fe8   :  { %v4506_v28 = vpack.c.bf16 %v2428_v27, %v2427_v23 }
0x1fe9   :  { %2180 = vrot.lane.b32.xlu0 %v2179_v2, %s4831_s0 }
0x1fea   :  { %4507 = vmatprep.subr.bf16.mxu1 %v4506_v28 }
0x205b   :  { %v2181_v49 = vpop.permute.xlu0 %2180 }
0x205c   :  { %4197 = vmatmul.mubr.msk.f32.vlgmr.msra.gmra.mrb[22].mxu1 %vm539_vm10, %v2181_v49 }
0x205d   :  { %4509 = vmatpush3.bf16.msra.mxu1 %v4506_v28 }
0x205e   :  { %4511 = vmatprep.subr.bf16.mxu1 %v4510_v30 }
0x2061   :  { %4513 = vmatpush3.bf16.msra.mxu1 %v4510_v30 }
0x212f   :  { %v2250_v50 = vpop.f32.mrb[22].mxu1 }
0x2130   :  { %v2254_v7 = vadd.f32 %v2250_v50, %v5211_v25  ;;  %v4198_v53 = vpop.f32.mrb[23].mxu1 }
0x2132   :  { %4715 = vtanh.f32 %v2254_v7  ;;  %v3725_v35 = vmul.f32 -1.442695, %v2254_v7 }
0x2134   :  { %4717 = vpow2.f32 %v3725_v35 }
0x213c   :  { %v4716_v54 = vpop.eup %4715 }
0x213d   :  { %2267 = vrot.lane.b32.xlu1 %v4716_v54, %s4835_s23 }
0x213e   :  { %v4718_v55 = vpop.eup %4717 }
0x213f   :  { %v2258_v57 = vadd.f32 1.0, %v4718_v55 }
0x2141   :  { %4719 = vrcp.f32 %v2258_v57  ;;  %v2517_v57 = vld [vmem:[#allocation5 + $0x80] sm:$0xff] }
0x214b   :  { %v4720_v58 = vpop.eup %4719 }
0x214c   :  { %v2265_v32 = vmul.f32 %v4720_v58, %v2263_v61 }
0x21af   :  { %v2268_v59 = vpop.permute.xlu1 %2267 }
0x21b0   :  { %v2270_v60 = vmul.f32 %v4720_v58, %v2268_v59 }
0x21b2   :  { %2272 = vrot.lane.b32.xlu0 %v2270_v60, %s4831_s0 }
0x2224   :  { %v2273_v62 = vpop.permute.xlu0 %2272 }
0x2225   :  { %v2275_v63 = vadd.f32 %v2273_v62, %v2265_v32  ;;  %v2522_v62 = vld [vmem:[#allocation5 + $0x68] sm:$0xf] }
0x2227   :  { %4721 = vtanh.f32 %v2275_v63  ;;  %v2370_v17 = vrot.slane %v2275_v63, 6  ;;  %v2615_v63 = vld [vmem:[#allocation5 + $0x78] sm:$0xf] }
0x2231   :  { %v4722_v25 = vpop.eup %4721 }
0x2232   :  { %2278 = vrot.lane.b32.xlu1 %v4722_v25, %s4835_s23  ;;  %v2519_v25 = vld [vmem:[#allocation5 + $0x90] sm:$0xff] }
0x22a4   :  { %v2279_v0 = vpop.permute.xlu1 %2278 }
0x22a5   :  { %v2281_v12 = vmul.f32 %v4720_v58, %v2279_v0  ;;  %v2518_v58 = vld [vmem:[#allocation5 + $0x88] sm:$0xff]  ;;  %v2520_v0 = vld [vmem:[#allocation5 + $0x98] sm:$0xff] }
0x22a6   :  { %v4526_v32 = vpack.c.bf16 %v2518_v58, %v2517_v57 }
0x22a7   :  { %2284 = vrot.lane.b32.xlu0 %v2281_v12, %s4831_s0  ;;  %v2396_v34 = vrot.slane %v2281_v12, 6 }
0x2319   :  { %v2285_v13 = vpop.permute.xlu0 %2284 }
0x231a   :  { %4208 = vmatmul.mubr.msk.f32.vlgmr.msra.gmra.mrb[26].mxu0 %vm539_vm10, %v2285_v13 }
0x231b   :  { %4225 = vmatprep.mubr.msk.f32.mxu0 %vm2530_vm1, %v2521_v52  ;;  %v2953_v52 = vld [vmem:[#allocation2 + $0x108] sm:$0xff] }
0x23ed   :  { %v2354_v1 = vpop.f32.mrb[26].mxu0 }
0x23ee   :  { %v2359_v3 = vrot.slane %v2354_v1, 6  ;;  %v4209_v4 = vpop.f32.mrb[27].mxu0 }
0x23f0   :  { %v2361_v9 = vadd.f32 %v2359_v3, %v5213_v26 }
0x23f2   :  { %4723 = vtanh.f32 %v2361_v9  ;;  %v3727_v11 = vmul.f32 -1.442695, %v2361_v9 }
0x23f4   :  { %4725 = vpow2.f32 %v3727_v11 }
0x23fc   :  { %v4724_v10 = vpop.eup %4723 }
0x23fd   :  { %2374 = vrot.lane.b32.xlu1 %v4724_v10, %s4835_s23 }
0x23fe   :  { %v4726_v8 = vpop.eup %4725 }
0x23ff   :  { %v2365_v14 = vadd.f32 1.0, %v4726_v8 }
0x2401   :  { %4727 = vrcp.f32 %v2365_v14  ;;  %v4837_v14 = vmov 1  }
0x2402   :  { %4631 = vset.pattern.permute.xlu1 %v4837_v14 }
0x240b   :  { %v4728_v15 = vpop.eup %4727 }
0x240c   :  { %v2372_v18 = vmul.f32 %v4728_v15, %v2370_v17 }
0x246f   :  { %v2375_v36 = vpop.permute.xlu1 %2374 }
0x2470   :  { %v2377_v16 = vmul.f32 %v4728_v15, %v2375_v36 }
0x2472   :  { %2379 = vrot.lane.b32.xlu0 %v2377_v16, %s4831_s0 }
0x2476   :  { %2411 = vrot.lane.b32.xlu0 %v2391_v47, %s4831_s0 }
0x24e4   :  { %v2380_v21 = vpop.permute.xlu0 %2379 }
0x24e5   :  { %v2382_v26 = vadd.f32 %v2380_v21, %v2372_v18 }
0x24e7   :  { %4729 = vtanh.f32 %v2382_v26 }
0x24e8   :  { %v2412_v45 = vpop.permute.xlu0 %2411 }
0x24f1   :  { %v4730_v22 = vpop.eup %4729 }
0x24f2   :  { %2385 = vrot.lane.b32.xlu1 %v4730_v22, %s4835_s23 }
0x2564   :  { %v2386_v31 = vpop.permute.xlu1 %2385 }
0x2565   :  { %v2388_v33 = vmul.f32 %v4728_v15, %v2386_v31  ;;  %v4838_v15 = vmov 0  }
0x2566   :  { %4630 = vset.pattern.permute.xlu0 %v4838_v15 }
0x2567   :  { %v2394_v48 = vrot.slane %v2388_v33, 2  ;;  %v2392_v37 = vsel %vm701_vm13, %v2281_v12, %v2388_v33  ;;  %v4530_v12 = vpack.c.bf16 %v2520_v0, %v2519_v25 }
0x2568   :  { %2413 = vrot.lane.b32.xlu0 %v2392_v37, %s4831_s0 }
0x2569   :  { %v2405_v51 = vsel %vm701_vm13, %v2394_v48, %v2396_v34 }
0x256a   :  { %v2406_v41 = vsel %vm319_vm6, %v2405_v51, %v2398_v39 }
0x256b   :  { %v2407_v42 = vsel %vm75_vm0, %v2406_v41, %v2400_v40 }
0x256c   :  { %2419 = vrot.lane.b32.xlu1 %v2407_v42, %s4831_s0 }
0x2570   :  { %2421 = vrot.lane.b32.xlu1 %v2408_v24, %s4831_s0 }
0x25da   :  { %v2414_v2 = vpop.permute.xlu0 %2413 }
0x25de   :  { %v2420_v46 = vpop.permute.xlu1 %2419 }
0x25df   :  { %v5299_v20 = vsel %vm100_vm3, %v2412_v45, %v2420_v46 }
0x25e0   :  { %4218 = vmatprep.mubr.msk.f32.mxu1 %vm539_vm10, %v5299_v20 }
0x25e2   :  { %v2422_v47 = vpop.permute.xlu1 %2421 }
0x25e3   :  { %v5304_v49 = vsel %vm100_vm3, %v2414_v2, %v2422_v47 }
0x25e4   :  { %4219 = vmatmul.mubr.msk.f32.vlgmr.msra.gmra.mrb[24].mxu1 %vm539_vm10, %v5304_v49 }
0x25e5   :  { %4232 = vmatprep.mubr.msk.f32.mxu1 %vm2530_vm1, %v2614_v56  ;;  %v2954_v56 = vld [vmem:[#allocation2 + $0x110] sm:$0xff] }
0x26b7   :  { %v4220_v50 = vpop.f32.mrb[24].mxu1 }
0x26b8   :  { %v2514_v7 = vadd.f32 %v4220_v50, %v3728_v43  ;;  %v2508_v53 = vpop.f32.mrb[25].mxu1  ;;  %v4542_v50 = vpack.c.bf16 %v2954_v56, %v2953_v52  ;;  %v3185_v56 = vld [vmem:[#allocation2 + $0x198] sm:$0xff] }
0x26b9   :  { %v2509_v54 = vadd.f32 %v3728_v43, %v2508_v53  ;;  %v2956_v53 = vld [vmem:[#allocation2 + $0x120] sm:$0xff] }
0x26bb   :  { %v4625_v35 = vpack.i.bf16 %v2514_v7, %v2509_v54 }
0x26bd   :  { %4626 = vrot.lane.b32.xlu0 %v4625_v35, %s4836_s27 }
0x272f   :  { %v4627_v55 = vpop.permute.xlu0 %4626 }
0x2730   :  { %v4629_v59 = vunpack.i.h.bf16 %v4627_v55  ;;  %v4628_v60 = vunpack.i.l.bf16 %v4627_v55 }
0x2732   :  { %v4514_v61 = vpack.c.bf16 %v4629_v59, %v4628_v60 }
0x2734   :  { %4516 = vmatprep.subr.msk.bf16.mxu0 %vm5000_vm8, %v4514_v61  ;;  %4522 = vmatprep.subr.msk.bf16.mxu1 %vm5000_vm8, %v4514_v61 }
0x2735   :  { %4519 = vmatpush3.bf16.msk.msra.mxu0 %vm5000_vm8, %v4514_v61  ;;  %4525 = vmatpush3.bf16.msk.msra.mxu1 %vm5000_vm8, %v4514_v61 }
0x2736   :  { %4527 = vmatprep.subr.bf16.mxu0 %v4526_v32  ;;  %4535 = vmatprep.subr.bf16.mxu1 %v4526_v32 }
0x2738   :  { %4226 = vmatmul.mubr.msk.f32.vlgmr.msra.gmra.mrb[28].mxu0 %vm2530_vm1, %v2522_v62  ;;  %4233 = vmatmul.mubr.msk.f32.vlgmr.msra.gmra.mrb[26].mxu1 %vm2530_vm1, %v2615_v63 }
0x2739   :  { %4529 = vmatpush3.bf16.msra.mxu0 %v4526_v32  ;;  %4537 = vmatpush3.bf16.msra.mxu1 %v4526_v32 }
0x273a   :  { %4531 = vmatprep.subr.bf16.mxu0 %v4530_v12  ;;  %4539 = vmatprep.subr.bf16.mxu1 %v4530_v12 }
0x273d   :  { %4533 = vmatpush3.bf16.msra.mxu0 %v4530_v12  ;;  %4541 = vmatpush3.bf16.msra.mxu1 %v4530_v12 }
0x273e   :  { %4543 = vmatprep.subr.bf16.mxu0 %v4542_v50 }
0x280b   :  { %v4227_v13 = vpop.f32.mrb[28].mxu0  ;;  %v5321_v1 = vpop.f32.mrb[26].mxu1 }
0x280c   :  { %v2605_v3 = vpop.f32.mrb[29].mxu0  ;;  %v5323_v4 = vpop.f32.mrb[27].mxu1  ;;  %v2698_v11 = vmul.f32 %v4227_v13, %v2514_v7  ;;  %v2783_v8 = vmul.f32 %v5321_v1, %v2514_v7  ;;  %v2955_v7 = vld [vmem:[#allocation2 + $0x118] sm:$0xff] }
0x280d   :  { %v2697_v9 = vmul.f32 %v2605_v3, %v2509_v54  ;;  %v2782_v10 = vmul.f32 %v5323_v4, %v2509_v54  ;;  %v4546_v54 = vpack.c.bf16 %v2956_v53, %v2955_v7  ;;  %v3187_v53 = vld [vmem:[#allocation2 + $0x1a8] sm:$0xff] }
0x280f   :  { %4243 = vmatprep.mubr.msk.f32.mxu0 %vm539_vm10, %v2697_v9  ;;  %4254 = vmatprep.mubr.msk.f32.mxu1 %vm539_vm10, %v2782_v10 }
0x2810   :  { %4244 = vmatmul.mubr.msk.f32.vlgmr.msra.gmra.mrb[30].mxu0 %vm539_vm10, %v2698_v11  ;;  %4255 = vmatmul.mubr.msk.f32.vlgmr.msra.gmra.mrb[28].mxu1 %vm539_vm10, %v2783_v8 }
0x2811   :  { %4545 = vmatpush3.bf16.msra.mxu0 %v4542_v50  ;;  %v3186_v50 = vld [vmem:[#allocation2 + $0x1a0] sm:$0xff] }
0x2812   :  { %4547 = vmatprep.subr.bf16.mxu0 %v4546_v54  ;;  %v4570_v7 = vpack.c.bf16 %v3186_v50, %v3185_v56 }
0x2815   :  { %4549 = vmatpush3.bf16.msra.mxu0 %v4546_v54  ;;  %v3188_v54 = vld [vmem:[#allocation2 + $0x1b0] sm:$0xff] }
0x28e3   :  { %v4245_v36 = vpop.f32.mrb[30].mxu0  ;;  %v4256_v16 = vpop.f32.mrb[28].mxu1 }
0x28e4   :  { %v2781_v17 = vmul.f32 0.25, %v4245_v36  ;;  %v2866_v18 = vmul.f32 0.25, %v4256_v16  ;;  %v2771_v21 = vpop.f32.mrb[31].mxu0  ;;  %v2856_v26 = vpop.f32.mrb[29].mxu1 }
0x28e5   :  { %v2780_v22 = vmul.f32 0.25, %v2771_v21  ;;  %v2865_v23 = vmul.f32 0.25, %v2856_v26 }
0x28e6   :  { %v2868_v27 = vmax.f32 %v2781_v17, %v2866_v18 }
0x28e7   :  { %v2867_v28 = vmax.f32 %v2780_v22, %v2865_v23 }
0x28e8   :  { %v2870_v19 = vsub.f32 %v2781_v17, %v2868_v27  ;;  %v2876_v29 = vsub.f32 %v2866_v18, %v2868_v27 }
0x28e9   :  { %v2869_v30 = vsub.f32 %v2780_v22, %v2867_v28  ;;  %v2875_v31 = vsub.f32 %v2865_v23, %v2867_v28 }
0x28ea   :  { %v2873_v33 = vmul.f32 1.442695, %v2870_v19  ;;  %v2879_v34 = vmul.f32 1.442695, %v2876_v29 }
0x28eb   :  { %v2871_v48 = vmul.f32 1.442695, %v2869_v30  ;;  %v2877_v37 = vmul.f32 1.442695, %v2875_v31 }
0x28ec   :  { %4731 = vpow2.f32 %v2873_v33 }
0x28ed   :  { %4733 = vpow2.f32 %v2879_v34 }
0x28ee   :  { %4735 = vpow2.f32 %v2871_v48  ;;  %v3087_v48 = vld [vmem:[#allocation2 + $0x140] sm:$0xff] }
0x28ef   :  { %4737 = vpow2.f32 %v2877_v37  ;;  %v3088_v37 = vld [vmem:[#allocation2 + $0x148] sm:$0xff] }
0x28f6   :  { %v4732_v39 = vpop.eup %4731 }
0x28f7   :  { %v4734_v40 = vpop.eup %4733 }
0x28f8   :  { %v4736_v51 = vpop.eup %4735  ;;  %v2882_v41 = vadd.f32 %v4734_v40, %v4732_v39 }
0x28f9   :  { %v4738_v42 = vpop.eup %4737 }
0x28fa   :  { %v2881_v44 = vadd.f32 %v4738_v42, %v4736_v51  ;;  %4739 = vrcp.f32 %v2882_v41 }
0x28fc   :  { %4741 = vrcp.f32 %v2881_v44  ;;  %v3180_v44 = vld [vmem:[#allocation2 + $0x170] sm:$0xff] }
0x2904   :  { %v4740_v24 = vpop.eup %4739 }
0x2905   :  { %v2888_v45 = vmul.f32 %v4740_v24, %v4732_v39  ;;  %v2920_v46 = vmul.f32 %v4740_v24, %v4734_v40  ;;  %v4550_v39 = vpack.c.bf16 %v3088_v37, %v3087_v48  ;;  %v3089_v40 = vld [vmem:[#allocation2 + $0x150] sm:$0xff]  ;;  %v3181_v24 = vld [vmem:[#allocation2 + $0x178] sm:$0xff] }
0x2906   :  { %v4742_v2 = vpop.eup %4741 }
0x2907   :  { %2904 = vperm.xlu1 %4631, %v2888_v45   ;;  %2896 = vperm.xlu0 %4630, %v2888_v45   ;;  %v2887_v47 = vmul.f32 %v4742_v2, %v4736_v51  ;;  %v2919_v43 = vmul.f32 %v4742_v2, %v4738_v42  ;;  %v3090_v51 = vld [vmem:[#allocation2 + $0x158] sm:$0xff]  ;;  %v3179_v42 = vld [vmem:[#allocation2 + $0x168] sm:$0xff] }
0x2908   :  { %4551 = vmatprep.subr.bf16.mxu1 %v4550_v39  ;;  %v4554_v41 = vpack.c.bf16 %v3090_v51, %v3089_v40  ;;  %v4558_v45 = vpack.c.bf16 %v3180_v44, %v3179_v42 }
0x2909   :  { %4553 = vmatpush3.bf16.msra.mxu1 %v4550_v39 }
0x290a   :  { %4555 = vmatprep.subr.bf16.mxu1 %v4554_v41  ;;  %4559 = vmatprep.subr.bf16.mxu0 %v4558_v45 }
0x290b   :  { %4632 = vset.pattern.permute.xlu1 %v4838_v15  ;;  %4633 = vset.pattern.permute.xlu0 %v4837_v14  ;;  %v3741_v15 = vld [vmem:[#allocation2 + $0x128] ss:$0 sm:$0xff] }
0x290c   :  { %2928 = vperm.xlu1 %4632, %v2920_v46   ;;  %2900 = vperm.xlu0 %4633, %v2887_v47  }
0x290d   :  { %4557 = vmatpush3.bf16.msra.mxu1 %v4554_v41 }
0x290e   :  { %4590 = vmatprep.subr.bf16.mxu1 %v4832_v5 }
0x2910   :  { %2936 = vperm.xlu0 %4633, %v2920_v46   ;;  %2891 = vperm.xlu1 %4632, %v2887_v47   ;;  %v3182_v46 = vld [vmem:[#allocation2 + $0x180] sm:$0xff]  ;;  %v3183_v47 = vld [vmem:[#allocation2 + $0x188] sm:$0xff] }
0x2911   :  { %v4562_v2 = vpack.c.bf16 %v3182_v46, %v3181_v24 }
0x2914   :  { %2913 = vrot.lane.b32.xlu0 %v4227_v13, %s4836_s27  ;;  %2923 = vperm.xlu1 %4632, %v2919_v43  }
0x2918   :  { %4634 = vset.pattern.permute.xlu1 %v4837_v14 }
0x2919   :  { %2932 = vperm.xlu1 %4634, %v2919_v43   ;;  %v3184_v43 = vld [vmem:[#allocation2 + $0x190] sm:$0xff] }
0x291a   :  { %v4566_v52 = vpack.c.bf16 %v3184_v43, %v3183_v47 }
0x291d   :  { %2911 = vrot.lane.b32.xlu1 %v2605_v3, %s4836_s27 }
0x2921   :  { %2943 = vrot.lane.b32.xlu1 %v5323_v4, %s4836_s27 }
0x2925   :  { %2945 = vrot.lane.b32.xlu1 %v5321_v1, %s4836_s27 }
0x2986   :  { %v2905_v35 = vpop.permute.xlu1 %2904  ;;  %v2897_v58 = vpop.permute.xlu0 %2896 }
0x2987   :  { %v2908_v4 = vsel %vm100_vm3, %v2897_v58, %v2905_v35  ;;  %v4574_v35 = vpack.c.bf16 %v3188_v54, %v3187_v53  ;;  %v3750_v53 = vld [vmem:[#allocation2 + $0x1f0] ss:$0 sm:$0xff] }
0x298b   :  { %v2929_v55 = vpop.permute.xlu1 %2928  ;;  %v2901_v60 = vpop.permute.xlu0 %2900 }
0x298f   :  { %v2892_v57 = vpop.permute.xlu1 %2891  ;;  %v2937_v32 = vpop.permute.xlu0 %2936 }
0x2990   :  { %v2907_v63 = vsel %vm100_vm3, %v2892_v57, %v2901_v60  ;;  %v2940_v9 = vsel %vm100_vm3, %v2929_v55, %v2937_v32  ;;  %v3189_v55 = vld [vmem:[#allocation2 + $0x1b8] sm:$0xff]  ;;  %v3190_v57 = vld [vmem:[#allocation2 + $0x1c0] sm:$0xff]  ;;  %v3192_v60 = vld [vmem:[#allocation2 + $0x1d0] sm:$0xff] }
0x2991   :  { %v4578_v58 = vpack.c.bf16 %v3190_v57, %v3189_v55  ;;  %v3751_v57 = vld [vmem:[#allocation2 + $0x1f8] ss:$0 sm:$0xff] }
0x2993   :  { %v2924_v59 = vpop.permute.xlu1 %2923  ;;  %v2914_v3 = vpop.permute.xlu0 %2913 }
0x2994   :  { %v2918_v11 = vmul.f32 %v2914_v3, %v2908_v4  ;;  %v3744_v3 = vld [vmem:[#allocation2 + $0x130] ss:$0 sm:$0xff]  ;;  %v3745_v4 = vld [vmem:[#allocation2 + $0x138] ss:$0 sm:$0xff] }
0x2998   :  { %v2933_v61 = vpop.permute.xlu1 %2932 }
0x2999   :  { %v2939_v25 = vsel %vm100_vm3, %v2924_v59, %v2933_v61  ;;  %v3191_v59 = vld [vmem:[#allocation2 + $0x1c8] sm:$0xff] }
0x299a   :  { %v4582_v61 = vpack.c.bf16 %v3192_v60, %v3191_v59 }
0x299c   :  { %v2912_v62 = vpop.permute.xlu1 %2911 }
0x299d   :  { %v2917_v12 = vmul.f32 %v2912_v62, %v2907_v63 }
0x29a0   :  { %v2944_v0 = vpop.permute.xlu1 %2943 }
0x29a1   :  { %v2949_v13 = vmul.f32 %v2944_v0, %v2939_v25 }
0x29a3   :  { %v2951_v1 = vadd.f32 %v2949_v13, %v2917_v12 }
0x29a4   :  { %v2946_v10 = vpop.permute.xlu1 %2945 }
0x29a5   :  { %v2950_v8 = vmul.f32 %v2946_v10, %v2940_v9  ;;  %4265 = vmatprep.mubr.msk.f32.mxu0 %vm539_vm10, %v2951_v1 }
0x29a7   :  { %v2952_v14 = vadd.f32 %v2950_v8, %v2918_v11 }
0x29a9   :  { %4266 = vmatmul.mubr.msk.f32.vlgmr.msra.gmra.mrb[32].mxu0 %vm539_vm10, %v2952_v14 }
0x29aa   :  { %4561 = vmatpush3.bf16.msra.mxu0 %v4558_v45 }
0x29ab   :  { %4563 = vmatprep.subr.bf16.mxu0 %v4562_v2 }
0x29ae   :  { %4565 = vmatpush3.bf16.msra.mxu0 %v4562_v2 }
0x29af   :  { %4567 = vmatprep.subr.bf16.mxu0 %v4566_v52 }
0x29b2   :  { %4569 = vmatpush3.bf16.msra.mxu0 %v4566_v52 }
0x29b3   :  { %4571 = vmatprep.subr.bf16.mxu0 %v4570_v7 }
0x29b6   :  { %4573 = vmatpush3.bf16.msra.mxu0 %v4570_v7 }
0x29b7   :  { %4575 = vmatprep.subr.bf16.mxu0 %v4574_v35 }
0x29ba   :  { %4577 = vmatpush3.bf16.msra.mxu0 %v4574_v35 }
0x29bb   :  { %4579 = vmatprep.subr.bf16.mxu0 %v4578_v58 }
0x29be   :  { %4581 = vmatpush3.bf16.msra.mxu0 %v4578_v58 }
0x29bf   :  { %4583 = vmatprep.subr.bf16.mxu0 %v4582_v61 }
0x29c2   :  { %4585 = vmatpush3.bf16.msra.mxu0 %v4582_v61 }
0x2a7c   :  { %v4267_v36 = vpop.f32.mrb[32].mxu0 }
0x2a7d   :  { %v3040_v16 = vadd.f32 %v4267_v36, %v3741_v15  ;;  %v3034_v17 = vpop.f32.mrb[33].mxu0  ;;  %v3193_v36 = vld [vmem:[#allocation2 + $0x1d8] sm:$0xff] }
0x2a7e   :  { %v3035_v18 = vadd.f32 %v3741_v15, %v3034_v17 }
0x2a7f   :  { %v3044_v21 = vadd.f32 %v3040_v16, %v5304_v49  ;;  %v3194_v16 = vld [vmem:[#allocation2 + $0x1e0] sm:$0xff] }
0x2a80   :  { %v3043_v26 = vadd.f32 %v3035_v18, %v5299_v20  ;;  %v4586_v17 = vpack.c.bf16 %v3194_v16, %v3193_v36  ;;  %v3746_v18 = vld [vmem:[#allocation2 + $0x160] ss:$0 sm:$0xff]  ;;  %v3497_v16 = vld [vmem:[#allocation2 + $0x228] sm:$0xff] }
0x2a81   :  { %v3051_v22 = vsel %vm3050_vm2, %v3044_v21, 0.0  ;;  %v3496_v36 = vld [vmem:[#allocation2 + $0x220] sm:$0xff] }
0x2a82   :  { %3052 = vadd.xlane.f32.xlu1 %v3051_v22  ;;  %v3047_v23 = vsel %vm539_vm10, %v3043_v26, 0.0  ;;  %4587 = vmatprep.subr.bf16.mxu0 %v4586_v17 }
0x2a83   :  { %3048 = vadd.xlane.f32.xlu0 %v3047_v23  ;;  %4589 = vmatpush3.bf16.msra.mxu0 %v4586_v17  ;;  %v3498_v17 = vld [vmem:[#allocation2 + $0x230] sm:$0xff] }
0x2b0f   :  { %v3053_v27 = vpop.xlane.xlu1 %3052 }
0x2b10   :  { %v3056_v28 = vmul.f32 0.03125, %v3053_v27  ;;  %v3049_v19 = vpop.xlane.xlu0 %3048 }
0x2b11   :  { %v3055_v29 = vmul.f32 0.03125, %v3049_v19 }
0x2b12   :  { %v5347_v30 = vsub.f32 %v3044_v21, %v3056_v28 }
0x2b13   :  { %v5349_v31 = vsub.f32 %v3043_v26, %v3055_v29  ;;  %v3749_v29 = vld [vmem:[#allocation2 + $0x1e8] ss:$0 sm:$0xff] }
0x2b14   :  { %v3060_v20 = vmul.f32 %v5347_v30, %v5347_v30 }
0x2b15   :  { %v3059_v33 = vmul.f32 %v5349_v31, %v5349_v31 }
0x2b16   :  { %v3064_v34 = vsel %vm3050_vm2, %v3060_v20, 0.0 }
0x2b17   :  { %v3061_v49 = vsel %vm539_vm10, %v3059_v33, 0.0 }
0x2b18   :  { %3062 = vadd.xlane.f32.xlu0 %v3061_v49 }
0x2b1c   :  { %3065 = vadd.xlane.f32.xlu0 %v3064_v34 }
0x2ba5   :  { %v3063_v32 = vpop.xlane.xlu0 %3062 }
0x2ba6   :  { %v3067_v62 = vmul.f32 0.03125, %v3063_v32 }
0x2ba8   :  { %v3069_v63 = vadd.f32 1e-05, %v3067_v62  ;;  %v3319_v62 = vld [vmem:[#allocation5 + $0xa0] sm:$0x3] }
0x2ba9   :  { %v3066_v25 = vpop.xlane.xlu0 %3065 }
0x2baa   :  { %4743 = vrsqrt.f32 %v3069_v63  ;;  %v3068_v0 = vmul.f32 0.03125, %v3066_v25 }
0x2bac   :  { %v3070_v12 = vadd.f32 1e-05, %v3068_v0 }
0x2bae   :  { %4745 = vrsqrt.f32 %v3070_v12 }
0x2bb4   :  { %v4744_v13 = vpop.eup %4743 }
0x2bb5   :  { %v3073_v1 = vmul.f32 %v4744_v13, %v5349_v31 }
0x2bb7   :  { %v3079_v9 = vmul.f32 %v3744_v3, %v3073_v1 }
0x2bb8   :  { %v4746_v10 = vpop.eup %4745 }
0x2bb9   :  { %v3074_v11 = vmul.f32 %v4746_v10, %v5347_v30  ;;  %v3085_v8 = vadd.f32 %v3745_v4, %v3079_v9 }
0x2bbb   :  { %v3080_v14 = vmul.f32 %v3744_v3, %v3074_v11  ;;  %4276 = vmatprep.mubr.msk.f32.mxu1 %vm539_vm10, %v3085_v8 }
0x2bbd   :  { %v3086_v15 = vadd.f32 %v3745_v4, %v3080_v14 }
0x2bbf   :  { %4277 = vmatmul.mubr.msk.f32.vlgmr.msra.gmra.mrb[30].mxu1 %vm539_vm10, %v3086_v15 }
0x2bc0   :  { %4318 = vmatprep.mubr.msk.f32.mxu1 %vm4833_vm15, %v4834_v6 }
0x2c92   :  { %v4278_v21 = vpop.f32.mrb[30].mxu1 }
0x2c93   :  { %v3174_v26 = vadd.f32 %v4278_v21, %v3746_v18  ;;  %v3168_v22 = vpop.f32.mrb[31].mxu1  ;;  %v3499_v21 = vld [vmem:[#allocation2 + $0x238] sm:$0xff] }
0x2c94   :  { %v3169_v23 = vadd.f32 %v3746_v18, %v3168_v22  ;;  %v4599_v18 = vpack.c.bf16 %v3497_v16, %v3496_v36 }
0x2c95   :  { %v3178_v28 = vmax.f32 %v3174_v26, 0.0  ;;  %v4602_v26 = vpack.c.bf16 %v3499_v21, %v3498_v17 }
0x2c96   :  { %v3177_v27 = vmax.f32 %v3169_v23, 0.0 }
0x2c98   :  { %4311 = vmatprep.mubr.f32.mxu0 %v3177_v27  ;;  %v3492_v27 = vld [vmem:[#allocation2 + $0x200] sm:$0xff] }
0x2c99   :  { %4312 = vmatmul.mubr.f32.vlgmr.msra.gmra.mrb[34].mxu0 %v3178_v28  ;;  %v3493_v28 = vld [vmem:[#allocation2 + $0x208] sm:$0xff] }
0x2d6c   :  { %v4313_v19 = vpop.f32.mrb[34].mxu0 }
0x2d6d   :  { %v3271_v30 = vadd.f32 %v4313_v19, %v3086_v15  ;;  %v3261_v31 = vpop.f32.mrb[35].mxu0 }
0x2d6e   :  { %v3270_v33 = vadd.f32 %v3261_v31, %v3085_v8  ;;  %v4605_v31 = vpack.c.bf16 %v3493_v28, %v3492_v27 }
0x2d6f   :  { %v3278_v49 = vadd.f32 %v3749_v29, %v3271_v30 }
0x2d70   :  { %v3277_v20 = vadd.f32 %v3749_v29, %v3270_v33 }
0x2d71   :  { %v3284_v34 = vsel %vm3050_vm2, %v3278_v49, 0.0 }
0x2d72   :  { %3285 = vadd.xlane.f32.xlu0 %v3284_v34  ;;  %v3281_v48 = vsel %vm539_vm10, %v3277_v20, 0.0 }
0x2d73   :  { %3282 = vadd.xlane.f32.xlu1 %v3281_v48 }
0x2dff   :  { %v3286_v37 = vpop.xlane.xlu0 %3285 }
0x2e00   :  { %v3288_v39 = vmul.f32 0.03125, %v3286_v37  ;;  %v3283_v40 = vpop.xlane.xlu1 %3282 }
0x2e01   :  { %v3287_v51 = vmul.f32 0.03125, %v3283_v40 }
0x2e02   :  { %v3290_v41 = vsub.f32 %v3278_v49, %v3288_v39  ;;  %v3494_v49 = vld [vmem:[#allocation2 + $0x210] sm:$0xff] }
0x2e03   :  { %v3289_v42 = vsub.f32 %v3277_v20, %v3287_v51  ;;  %v3495_v20 = vld [vmem:[#allocation2 + $0x218] sm:$0xff]  ;;  %v3758_v51 = vld [vmem:[#allocation2 + $0x240] ss:$0 sm:$0xff] }
0x2e04   :  { %v3292_v44 = vmul.f32 %v3290_v41, %v3290_v41  ;;  %v4608_v48 = vpack.c.bf16 %v3495_v20, %v3494_v49 }
0x2e05   :  { %v3291_v24 = vmul.f32 %v3289_v42, %v3289_v42 }
0x2e06   :  { %v3296_v45 = vsel %vm3050_vm2, %v3292_v44, 0.0 }
0x2e07   :  { %3297 = vadd.xlane.f32.xlu0 %v3296_v45  ;;  %v3293_v46 = vsel %vm539_vm10, %v3291_v24, 0.0 }
0x2e08   :  { %3294 = vadd.xlane.f32.xlu1 %v3293_v46 }
0x2e94   :  { %v3298_v2 = vpop.xlane.xlu0 %3297 }
0x2e95   :  { %v3300_v47 = vmul.f32 0.03125, %v3298_v2  ;;  %v3295_v43 = vpop.xlane.xlu1 %3294 }
0x2e96   :  { %v3299_v52 = vmul.f32 0.03125, %v3295_v43 }
0x2e97   :  { %v3302_v56 = vadd.f32 1e-05, %v3300_v47 }
0x2e98   :  { %v3301_v50 = vadd.f32 1e-05, %v3299_v52 }
0x2e99   :  { %4747 = vrsqrt.f32 %v3302_v56 }
0x2e9a   :  { %4749 = vrsqrt.f32 %v3301_v50 }
0x2ea3   :  { %v4748_v7 = vpop.eup %4747 }
0x2ea4   :  { %v4750_v54 = vpop.eup %4749  ;;  %v3306_v35 = vmul.f32 %v4748_v7, %v3290_v41 }
0x2ea5   :  { %v3305_v55 = vmul.f32 %v4750_v54, %v3289_v42 }
0x2ea6   :  { %v3312_v58 = vmul.f32 %v3750_v53, %v3306_v35 }
0x2ea7   :  { %v3311_v59 = vmul.f32 %v3750_v53, %v3305_v55 }
0x2ea8   :  { %v3318_v60 = vadd.f32 %v3751_v57, %v3312_v58 }
0x2ea9   :  { %v3317_v61 = vadd.f32 %v3751_v57, %v3311_v59 }
0x2eab   :  { %v4591_v32 = vpack.c.bf16 %v3318_v60, %v3317_v61 }
0x2ead   :  { %4593 = vmatpush3.bf16.msk.msra.mxu1 %vm5000_vm8, %v4591_v32 }
0x2eae   :  { %4594 = vmatprep.subr.bf16.mxu1 %v4832_v5 }
0x2eb0   :  { %4319 = vmatmul.mubr.msk.f32.vlgmr.msra.gmra.mrb[32].mxu1 %vm2530_vm1, %v3319_v62 }
0x2eb1   :  { %4325 = vmatprep.mubr.msk.f32.mxu1 %vm4833_vm15, %v4834_v6 }
0x2f83   :  { %v3392_v63 = vpop.f32.mrb[32].mxu1 }
0x2f84   :  { %v3396_v25 = vmul.f32 0.16666667, %v3392_v63  ;;  %v4320_v0 = vpop.f32.mrb[33].mxu1 }
0x2f86   :  { %v3398_v12 = vrot.slane %v3396_v25, 6  ;;  %v3400_v13 = vrot.slane %v3396_v25, 4  ;;  %v3402_v3 = vrot.slane %v3396_v25, 2 }
0x2f88   :  { %v3404_v1 = vsel %vm701_vm13, %v3396_v25, %v3398_v12 }
0x2f89   :  { %v3405_v4 = vsel %vm319_vm6, %v3404_v1, %v3400_v13  ;;  %v3408_v9 = vsub.f32 %v3318_v60, %v3404_v1 }
0x2f8a   :  { %v3406_v10 = vsel %vm75_vm0, %v3405_v4, %v3402_v3 }
0x2f8b   :  { %v3407_v11 = vsub.f32 %v3317_v61, %v3406_v10  ;;  %v3410_v14 = vmul.f32 %v3408_v9, %v3408_v9 }
0x2f8d   :  { %v3409_v8 = vmul.f32 %v3407_v11, %v3407_v11 }
0x2f8f   :  { %v4595_v15 = vpack.c.bf16 %v3410_v14, %v3409_v8 }
0x2f91   :  { %4597 = vmatpush3.bf16.msk.msra.mxu1 %vm5000_vm8, %v4595_v15 }
0x2f92   :  { %4598 = vmatprep.subr.bf16.mxu1 %v4832_v5 }
0x2f94   :  { %4326 = vmatmul.mubr.msk.f32.vlgmr.msra.gmra.mrb[34].mxu1 %vm2530_vm1, %v3319_v62 }
0x2f95   :  { %4336 = vmatprep.mubr.msk.f32.mxu1 %vm4833_vm15, %v4834_v6  ;;  %4600 = vmatpush3.bf16.msra.mxu1 %v4599_v18 }
0x2f96   :  { %4601 = vmatprep.subr.bf16.mxu1 %v4832_v5 }
0x2f99   :  { %4603 = vmatpush3.bf16.msra.mxu1 %v4602_v26 }
0x2f9a   :  { %4604 = vmatprep.subr.bf16.mxu1 %v4832_v5 }
0x3067   :  { %v3480_v38 = vpop.f32.mrb[34].mxu1 }
0x3068   :  { %v3484_v22 = vmul.f32 0.2, %v3480_v38  ;;  %v4327_v23 = vpop.f32.mrb[35].mxu1 }
0x306a   :  { %4751 = vrsqrt.f32 %v3484_v22  ;;  %vm3487_vm0 = vcmp.eq.f32.partialorder %v3484_v22, inf  ;;  %v3490_v30 = vand.u32 2147483648, %v3484_v22  ;;  %vm3489_vm3 = vcmp.eq.f32.partialorder %v3484_v22, 0.0 }
0x3074   :  { %v4752_v19 = vpop.eup %4751 }
0x3075   :  { %v3486_v29 = vmul.f32 %v4752_v19, %v3484_v22 }
0x3077   :  { %v3488_v33 = vsel %vm3487_vm0, %v3484_v22, %v3486_v29 }
0x3078   :  { %v3491_v34 = vsel %vm3489_vm3, %v3490_v30, %v3488_v33 }
0x3079   :  { %4337 = vmatmul.mubr.msk.f32.vlgmr.msra.gmra.mrb[36].mxu1 %vm539_vm10, %v3491_v34 }
0x307a   :  { %4606 = vmatpush3.bf16.msra.mxu1 %v4605_v31  ;;  %4347 = vmatprep.mubr.msk.f32.mxu1 %vm4833_vm15, %v4834_v6 }
0x307b   :  { %4607 = vmatprep.subr.bf16.mxu1 %v4832_v5 }
0x307e   :  { %4609 = vmatpush3.bf16.msra.mxu1 %v4608_v48 }
0x3081   :  { %4348 = vmatmul.mubr.msk.f32.vlgmr.msra.gmra.mrb[38].mxu1 %vm539_vm10, %v3396_v25 }
0x314c   :  { %v3569_v37 = vpop.f32.mrb[36].mxu1 }
0x314d   :  { %v4338_v39 = vpop.f32.mrb[37].mxu1 }
0x3154   :  { %v3641_v40 = vpop.f32.mrb[38].mxu1 }
0x3155   :  { %v3642_v41 = vadd.f32 %v3641_v40, %v3569_v37  ;;  %v4349_v42 = vpop.f32.mrb[39].mxu1 }
0x3157   :  { %v3650_v44 = vadd.f32 %v3758_v51, %v3642_v41 }
0x3159   :  { %3652 = vst.msk [vmem:[#allocation7] sm:$0x3] %vm3651_vm4, %v3650_v44 }
0x315a   :  { %4808 = shalt.err (!%p4805_p6)
}
0x315b   :  { %s4809_s6 = scalar_lea.hbm %s5405_s3, 32 }
0x315c   :  { %p4810_p7 = scmp.ne.s32.totalorder %s5405_s3, %s4809_s6  ;;  %p4813_p8 = scmp.lt.u32.totalorder %s4809_s6, %s5405_s3 }
0x315e   :  { %p4815_p9 = pnand %p4813_p8, %p4810_p7 }
0x3160   :  { %4818 = shalt.err (!%p4815_p9)
}
0x3161   :  { %3662 = dma.vmem_to_hbm [thread:$0]  %s3660_s29, 32, %s5405_s3, [#allocation4]  }
0x3162   :  { %4823 = dma.done.wait [#allocation4], 32  }
0x3163   :  { %4824 = vsyncadd [#allocation4], 4294967264 }
0x3164   :  { %3666 = vsyncpa [#allocation3], 1 }
0x3165   :  { %3667 = vsyncpa [#allocation6], 1 }
0x3166   :  { %3668 = vsyncpa [#allocation4], 1 }

</bundles_post_ra>
